<compile_context>
chip_gen: v7x
topology: tpu7x:2x2x1
jax: 0.10.0
libtpu: 0.0.40
codegen_flags: <defaults>
</compile_context>

<pallas_src>
import functools

import jax
import jax.numpy as jnp
from jax.experimental import pallas as pl
from jax.experimental.pallas import tpu as pltpu


# ----------------------------- fused model kernel ---------------------------

def _bert_fused_kernel(
    # token ids / labels
    ids_ref, lab_ref,
    # embeddings
    word_ref, pos_ref, typ_ref, eg_ref, eb_ref,
    # per-(layer, head) attention weights (leading axis = layer*num_heads)
    wq_ref, wk_ref, wv_ref, bq_ref, bk_ref, bv_ref, wo_ref,
    # per-layer weights (leading axis = layer)
    bo_ref, l1g_ref, l1b_ref, wi_ref, bi_ref, wd_ref, bd_ref, l2g_ref, l2b_ref,
    # pooler / classifier
    pw_ref, pb_ref, cw_ref, cb_ref,
    # outputs
    loss_ref, pred_ref,
    *, B, S, H, nh, L, C, V, eps):
    M = B * S
    Dh = H // nh
    scale = 1.0 / (Dh ** 0.5)
    f32 = jnp.float32
    bf16 = jnp.bfloat16

    def ln(x, g, b):
        mu = jnp.mean(x, axis=-1, keepdims=True)
        xc = x - mu
        var = jnp.mean(xc * xc, axis=-1, keepdims=True)
        return xc * jax.lax.rsqrt(var + eps) * g + b

    def erf_approx(x):
        # Abramowitz & Stegun 7.1.26 (|err| <= 1.5e-7); erf itself has no
        # guaranteed Mosaic lowering, so build it from exp + VPU ops.
        a1, a2, a3, a4, a5 = (0.254829592, -0.284496736, 1.421413741,
                              -1.453152027, 1.061405429)
        ax = jnp.abs(x)
        t = 1.0 / (1.0 + 0.3275911 * ax)
        poly = ((((a5 * t + a4) * t + a3) * t + a2) * t + a1) * t
        y = 1.0 - poly * jnp.exp(-ax * ax)
        return jnp.where(x >= 0.0, y, -y)

    def gelu(x):
        # HF BERT default: exact erf-GELU.
        return 0.5 * x * (1.0 + erf_approx(x * 0.7071067811865476))

    # ---- embeddings: in-kernel gather via one-hot matmul + broadcast adds ---
    ids = ids_ref[...]                                             # [M, 1] i32
    tok_iota = jax.lax.broadcasted_iota(jnp.int32, (M, V), 1)
    tok_onehot = (tok_iota == ids).astype(f32)                     # [M, V]
    word = jnp.dot(tok_onehot, word_ref[...],
                   preferred_element_type=f32)                     # [M, H]

    pos_typ = pos_ref[...][:S, :] + typ_ref[...][0:1, :]           # [S, H]
    emb = (word.reshape(B, S, H) + pos_typ).reshape(M, H)          # [M, H]
    h = ln(emb, eg_ref[...], eb_ref[...])

    # ---- encoder layers (statically unrolled, all weights VMEM resident) ----
    for l in range(L):
        hb = h.astype(bf16)
        attn = jnp.zeros((M, H), f32)
        for hd in range(nh):
            idx = l * nh + hd
            q = jnp.dot(hb, wq_ref[idx], preferred_element_type=f32) + bq_ref[idx]
            k = jnp.dot(hb, wk_ref[idx], preferred_element_type=f32) + bk_ref[idx]
            v = jnp.dot(hb, wv_ref[idx], preferred_element_type=f32) + bv_ref[idx]
            q3 = q.reshape(B, S, Dh).astype(bf16)
            k3 = k.reshape(B, S, Dh).astype(bf16)
            v3 = v.reshape(B, S, Dh).astype(bf16)
            # batched scores / context (no explicit transpose, no concat)
            s = jnp.einsum('bqd,bkd->bqk', q3, k3,
                           preferred_element_type=f32) * scale     # [B,S,S]
            s = s - jnp.max(s, axis=-1, keepdims=True)
            p = jnp.exp(s)
            p = p / jnp.sum(p, axis=-1, keepdims=True)             # exact div
            ctx = jnp.einsum('bqk,bkd->bqd', p.astype(bf16), v3,
                             preferred_element_type=f32)           # [B,S,Dh]
            # fold per-head output projection directly (no head concat)
            attn = attn + jnp.dot(ctx.reshape(M, Dh).astype(bf16), wo_ref[idx],
                                  preferred_element_type=f32)
        attn = attn + bo_ref[l]
        h = ln(h + attn, l1g_ref[l], l1b_ref[l])

        inter = jnp.dot(h.astype(bf16), wi_ref[l],
                        preferred_element_type=f32) + bi_ref[l]
        inter = gelu(inter)
        ffn = jnp.dot(inter.astype(bf16), wd_ref[l],
                      preferred_element_type=f32) + bd_ref[l]
        h = ln(h + ffn, l2g_ref[l], l2b_ref[l])

    # ---- pooler (outputs[1]) + classifier + CE loss + argmax ---------------
    cls_tok = h.reshape(B, S, H)[:, 0, :]                          # [B, H]
    pooled = jnp.tanh(jnp.dot(cls_tok.astype(bf16), pw_ref[...],
                              preferred_element_type=f32) + pb_ref[...])
    # TODO(synk): nn.Dropout(hidden_dropout_prob) is identity at inference.
    z = jnp.dot(pooled.astype(bf16), cw_ref[...],
                preferred_element_type=f32) + cb_ref[...]          # [B, C]

    lab = lab_ref[...]                                             # [B, 1] i32
    cls_iota = jax.lax.broadcasted_iota(jnp.int32, (B, C), 1)
    onehot = (cls_iota == lab).astype(f32)

    m = jnp.max(z, axis=-1, keepdims=True)
    lse = jnp.log(jnp.sum(jnp.exp(z - m), axis=-1, keepdims=True)) + m
    nll = -jnp.sum(onehot * (z - lse), axis=-1, keepdims=True)     # [B, 1]
    loss_ref[...] = jnp.sum(nll, axis=0, keepdims=True) * (1.0 / B)

    # argmax with torch tie-break (first maximal index)
    pred_ref[...] = jnp.min(jnp.where(z >= m, cls_iota, C),
                            axis=-1, keepdims=True)


# --------------------------------- wrapper ----------------------------------

class Config:
    vocab_size = 100
    hidden_size = 64
    num_layers = 2
    num_heads = 2
    intermediate_size = 128
    max_position = 32
    num_classes = 4
    hidden_dropout_prob = 0.1


def init_params(cfg, key):
    H, I = cfg.hidden_size, cfg.intermediate_size
    L, C = cfg.num_layers, cfg.num_classes
    nh = cfg.num_heads
    Dh = H // nh
    bf16 = jnp.bfloat16

    def nrm(k, shape, scale=0.02):
        return (scale * jax.random.normal(k, shape)).astype(jnp.float32)

    keys = iter(jax.random.split(key, 32))
    return {
        "word_emb": nrm(next(keys), (cfg.vocab_size, H)),
        "pos_emb": nrm(next(keys), (cfg.max_position, H)),
        "type_emb": nrm(next(keys), (2, H)),
        "emb_ln_g": jnp.ones((1, H), jnp.float32),
        "emb_ln_b": jnp.zeros((1, H), jnp.float32),
        # per-(layer, head) projections -> lane-aligned dots, no head slicing
        "wq": nrm(next(keys), (L * nh, H, Dh)).astype(bf16),
        "wk": nrm(next(keys), (L * nh, H, Dh)).astype(bf16),
        "wv": nrm(next(keys), (L * nh, H, Dh)).astype(bf16),
        "bq": jnp.zeros((L * nh, 1, Dh), jnp.float32),
        "bk": jnp.zeros((L * nh, 1, Dh), jnp.float32),
        "bv": jnp.zeros((L * nh, 1, Dh), jnp.float32),
        "wo": nrm(next(keys), (L * nh, Dh, H)).astype(bf16),
        "bo": jnp.zeros((L, 1, H), jnp.float32),
        "ln1_g": jnp.ones((L, 1, H), jnp.float32),
        "ln1_b": jnp.zeros((L, 1, H), jnp.float32),
        "wi": nrm(next(keys), (L, H, I)).astype(bf16),
        "bi": jnp.zeros((L, 1, I), jnp.float32),
        "wd": nrm(next(keys), (L, I, H)).astype(bf16),
        "bd": jnp.zeros((L, 1, H), jnp.float32),
        "ln2_g": jnp.ones((L, 1, H), jnp.float32),
        "ln2_b": jnp.zeros((L, 1, H), jnp.float32),
        "pool_w": nrm(next(keys), (H, H)).astype(bf16),
        "pool_b": jnp.zeros((1, H), jnp.float32),
        "cls_w": nrm(next(keys), (H, C)).astype(bf16),
        "cls_b": jnp.zeros((1, C), jnp.float32),
    }


def forward(params, input_ids, attention_mask, labels, *, cfg):
    # NOTE: the reference forward calls self.bert(input_ids=input_ids) and does
    # NOT pass attention_mask to the encoder, so attention is unmasked here too.
    del attention_mask
    B, S = input_ids.shape
    H, nh = cfg.hidden_size, cfg.num_heads
    L, C = cfg.num_layers, cfg.num_classes
    V = cfg.vocab_size

    ids = input_ids.reshape(B * S, 1).astype(jnp.int32)
    if labels is not None:
        lab = labels.reshape(B, 1).astype(jnp.int32)
    else:
        lab = jnp.zeros((B, 1), jnp.int32)

    kernel = functools.partial(_bert_fused_kernel, B=B, S=S, H=H, nh=nh,
                               L=L, C=C, V=V, eps=1e-12)
    vmem = pl.BlockSpec(memory_space=pltpu.MemorySpace.VMEM)

    loss, preds = pl.pallas_call(
        kernel,
        out_shape=(jax.ShapeDtypeStruct((1, 1), jnp.float32),
                   jax.ShapeDtypeStruct((B, 1), jnp.int32)),
        in_specs=[vmem] * 27,
        out_specs=(vmem, vmem),
    )(ids, lab,
      params["word_emb"], params["pos_emb"], params["type_emb"],
      params["emb_ln_g"], params["emb_ln_b"],
      params["wq"], params["wk"], params["wv"],
      params["bq"], params["bk"], params["bv"],
      params["wo"], params["bo"],
      params["ln1_g"], params["ln1_b"],
      params["wi"], params["bi"], params["wd"], params["bd"],
      params["ln2_g"], params["ln2_b"],
      params["pool_w"], params["pool_b"], params["cls_w"], params["cls_b"])

    if labels is not None:
        return loss[0, 0], preds[:, 0]
    return preds[:, 0]


# --------------------------------- driver -----------------------------------

if __name__ == "__main__":
    cfg = Config()
    B, S = 2, 8

    key = jax.random.PRNGKey(0)
    k_param, k_ids, k_lbl = jax.random.split(key, 3)

    params = init_params(cfg, k_param)
    input_ids = jax.random.randint(k_ids, (B, S), 0, cfg.vocab_size,
                                   dtype=jnp.int32)
    attention_mask = jnp.ones((B, S), jnp.int32)
    labels = jax.random.randint(k_lbl, (B,), 0, cfg.num_classes,
                                dtype=jnp.int32)

    fwd = jax.jit(functools.partial(forward, cfg=cfg))
    loss, preds = fwd(params, input_ids, attention_mask, labels)
    jax.block_until_ready((loss, preds))

    assert loss.shape == () and preds.shape == (B,)
    print("KERNEL_OK")
</pallas_src>

<mosaic_0001>
module attributes {stable_mosaic.version = 11 : i64} {
  func.func @_bert_fused_kernel(%arg0: memref<16x1xi32, #tpu.memory_space<vmem>>, %arg1: memref<2x1xi32, #tpu.memory_space<vmem>>, %arg2: memref<100x64xf32, #tpu.memory_space<vmem>>, %arg3: memref<32x64xf32, #tpu.memory_space<vmem>>, %arg4: memref<2x64xf32, #tpu.memory_space<vmem>>, %arg5: memref<1x64xf32, #tpu.memory_space<vmem>>, %arg6: memref<1x64xf32, #tpu.memory_space<vmem>>, %arg7: memref<4x64x32xbf16, #tpu.memory_space<vmem>>, %arg8: memref<4x64x32xbf16, #tpu.memory_space<vmem>>, %arg9: memref<4x64x32xbf16, #tpu.memory_space<vmem>>, %arg10: memref<4x1x32xf32, #tpu.memory_space<vmem>>, %arg11: memref<4x1x32xf32, #tpu.memory_space<vmem>>, %arg12: memref<4x1x32xf32, #tpu.memory_space<vmem>>, %arg13: memref<4x32x64xbf16, #tpu.memory_space<vmem>>, %arg14: memref<2x1x64xf32, #tpu.memory_space<vmem>>, %arg15: memref<2x1x64xf32, #tpu.memory_space<vmem>>, %arg16: memref<2x1x64xf32, #tpu.memory_space<vmem>>, %arg17: memref<2x64x128xbf16, #tpu.memory_space<vmem>>, %arg18: memref<2x1x128xf32, #tpu.memory_space<vmem>>, %arg19: memref<2x128x64xbf16, #tpu.memory_space<vmem>>, %arg20: memref<2x1x64xf32, #tpu.memory_space<vmem>>, %arg21: memref<2x1x64xf32, #tpu.memory_space<vmem>>, %arg22: memref<2x1x64xf32, #tpu.memory_space<vmem>>, %arg23: memref<64x64xbf16, #tpu.memory_space<vmem>>, %arg24: memref<1x64xf32, #tpu.memory_space<vmem>>, %arg25: memref<64x4xbf16, #tpu.memory_space<vmem>>, %arg26: memref<1x4xf32, #tpu.memory_space<vmem>>, %arg27: memref<1x1xf32, #tpu.memory_space<vmem>>, %arg28: memref<2x1xi32, #tpu.memory_space<vmem>>) attributes {dimension_semantics = [], scalar_prefetch = 0 : i64, scratch_operands = 0 : i64, tpu.core_type = #tpu.core_type<tc>} {
    %c0 = arith.constant 0 : index
    %c0_0 = arith.constant 0 : index
    %0 = vector.load %arg0[%c0, %c0_0] : memref<16x1xi32, #tpu.memory_space<vmem>>, vector<16x1xi32>
    %1 = tpu.iota {dimensions = array<i32: 1>} : vector<16x100xi32>
    %2 = vector.broadcast %0 : vector<16x1xi32> to vector<16x100xi32>
    %3 = arith.cmpi eq, %1, %2 : vector<16x100xi32>
    %4 = arith.extui %3 : vector<16x100xi1> to vector<16x100xi32>
    %5 = arith.sitofp %4 : vector<16x100xi32> to vector<16x100xf32>
    %c0_1 = arith.constant 0 : index
    %c0_2 = arith.constant 0 : index
    %6 = vector.load %arg2[%c0_1, %c0_2] : memref<100x64xf32, #tpu.memory_space<vmem>>, vector<100x64xf32>
    %cst = arith.constant dense<0.000000e+00> : vector<16x64xf32>
    %7 = tpu.matmul %5, %6, %cst {dimension_numbers = #tpu.dot_dimension_numbers<[1], [0], [0], [1], [0, 0, 1, 1], [], []>} : vector<16x100xf32>, vector<100x64xf32>, vector<16x64xf32> -> vector<16x64xf32>
    %c0_3 = arith.constant 0 : index
    %c0_4 = arith.constant 0 : index
    %8 = vector.load %arg3[%c0_3, %c0_4] : memref<32x64xf32, #tpu.memory_space<vmem>>, vector<32x64xf32>
    %9 = vector.extract_strided_slice %8 {offsets = [0, 0], sizes = [8, 64], strides = [1, 1]} : vector<32x64xf32> to vector<8x64xf32>
    %c0_5 = arith.constant 0 : index
    %c0_6 = arith.constant 0 : index
    %10 = vector.load %arg4[%c0_5, %c0_6] : memref<2x64xf32, #tpu.memory_space<vmem>>, vector<2x64xf32>
    %11 = vector.extract_strided_slice %10 {offsets = [0, 0], sizes = [1, 64], strides = [1, 1]} : vector<2x64xf32> to vector<1x64xf32>
    %12 = vector.broadcast %11 : vector<1x64xf32> to vector<8x64xf32>
    %13 = arith.addf %9, %12 : vector<8x64xf32>
    %14 = vector.shape_cast %7 : vector<16x64xf32> to vector<2x8x64xf32>
    %15 = vector.shape_cast %13 : vector<8x64xf32> to vector<1x8x64xf32>
    %16 = vector.broadcast %15 : vector<1x8x64xf32> to vector<2x8x64xf32>
    %17 = arith.addf %14, %16 : vector<2x8x64xf32>
    %18 = vector.shape_cast %17 : vector<2x8x64xf32> to vector<16x64xf32>
    %c0_7 = arith.constant 0 : index
    %c0_8 = arith.constant 0 : index
    %19 = vector.load %arg5[%c0_7, %c0_8] : memref<1x64xf32, #tpu.memory_space<vmem>>, vector<1x64xf32>
    %c0_9 = arith.constant 0 : index
    %c0_10 = arith.constant 0 : index
    %20 = vector.load %arg6[%c0_9, %c0_10] : memref<1x64xf32, #tpu.memory_space<vmem>>, vector<1x64xf32>
    %cst_11 = arith.constant dense<0.000000e+00> : vector<16xf32>
    %21 = vector.multi_reduction <add>, %18, %cst_11 [1] : vector<16x64xf32> to vector<16xf32>
    %22 = vector.shape_cast %21 : vector<16xf32> to vector<16x1xf32>
    %cst_12 = arith.constant 6.400000e+01 : f32
    %23 = vector.broadcast %cst_12 : f32 to vector<16x1xf32>
    %24 = arith.divf %22, %23 : vector<16x1xf32>
    %25 = vector.broadcast %24 : vector<16x1xf32> to vector<16x64xf32>
    %26 = arith.subf %18, %25 : vector<16x64xf32>
    %27 = arith.mulf %26, %26 : vector<16x64xf32>
    %cst_13 = arith.constant dense<0.000000e+00> : vector<16xf32>
    %28 = vector.multi_reduction <add>, %27, %cst_13 [1] : vector<16x64xf32> to vector<16xf32>
    %29 = vector.shape_cast %28 : vector<16xf32> to vector<16x1xf32>
    %cst_14 = arith.constant 6.400000e+01 : f32
    %30 = vector.broadcast %cst_14 : f32 to vector<16x1xf32>
    %31 = arith.divf %29, %30 : vector<16x1xf32>
    %cst_15 = arith.constant 9.99999996E-13 : f32
    %32 = vector.broadcast %cst_15 : f32 to vector<16x1xf32>
    %33 = arith.addf %31, %32 : vector<16x1xf32>
    %34 = math.rsqrt %33 : vector<16x1xf32>
    %35 = vector.broadcast %34 : vector<16x1xf32> to vector<16x64xf32>
    %36 = arith.mulf %26, %35 : vector<16x64xf32>
    %37 = vector.broadcast %19 : vector<1x64xf32> to vector<16x64xf32>
    %38 = arith.mulf %36, %37 : vector<16x64xf32>
    %39 = vector.broadcast %20 : vector<1x64xf32> to vector<16x64xf32>
    %40 = arith.addf %38, %39 : vector<16x64xf32>
    %41 = arith.truncf %40 : vector<16x64xf32> to vector<16x64xbf16>
    %cst_16 = arith.constant 0.000000e+00 : f32
    %42 = vector.broadcast %cst_16 : f32 to vector<16x64xf32>
    %c0_17 = arith.constant 0 : index
    %c0_18 = arith.constant 0 : index
    %c0_19 = arith.constant 0 : index
    %43 = vector.load %arg7[%c0_17, %c0_18, %c0_19] : memref<4x64x32xbf16, #tpu.memory_space<vmem>>, vector<1x64x32xbf16>
    %44 = vector.shape_cast %43 : vector<1x64x32xbf16> to vector<64x32xbf16>
    %cst_20 = arith.constant dense<0.000000e+00> : vector<16x32xf32>
    %45 = tpu.matmul %41, %44, %cst_20 {dimension_numbers = #tpu.dot_dimension_numbers<[1], [0], [0], [1], [0, 0, 1, 1], [], []>} : vector<16x64xbf16>, vector<64x32xbf16>, vector<16x32xf32> -> vector<16x32xf32>
    %c0_21 = arith.constant 0 : index
    %c0_22 = arith.constant 0 : index
    %c0_23 = arith.constant 0 : index
    %46 = vector.load %arg10[%c0_21, %c0_22, %c0_23] : memref<4x1x32xf32, #tpu.memory_space<vmem>>, vector<1x1x32xf32>
    %47 = vector.shape_cast %46 : vector<1x1x32xf32> to vector<1x32xf32>
    %48 = vector.broadcast %47 : vector<1x32xf32> to vector<16x32xf32>
    %49 = arith.addf %45, %48 : vector<16x32xf32>
    %c0_24 = arith.constant 0 : index
    %c0_25 = arith.constant 0 : index
    %c0_26 = arith.constant 0 : index
    %50 = vector.load %arg8[%c0_24, %c0_25, %c0_26] : memref<4x64x32xbf16, #tpu.memory_space<vmem>>, vector<1x64x32xbf16>
    %51 = vector.shape_cast %50 : vector<1x64x32xbf16> to vector<64x32xbf16>
    %cst_27 = arith.constant dense<0.000000e+00> : vector<16x32xf32>
    %52 = tpu.matmul %41, %51, %cst_27 {dimension_numbers = #tpu.dot_dimension_numbers<[1], [0], [0], [1], [0, 0, 1, 1], [], []>} : vector<16x64xbf16>, vector<64x32xbf16>, vector<16x32xf32> -> vector<16x32xf32>
    %c0_28 = arith.constant 0 : index
    %c0_29 = arith.constant 0 : index
    %c0_30 = arith.constant 0 : index
    %53 = vector.load %arg11[%c0_28, %c0_29, %c0_30] : memref<4x1x32xf32, #tpu.memory_space<vmem>>, vector<1x1x32xf32>
    %54 = vector.shape_cast %53 : vector<1x1x32xf32> to vector<1x32xf32>
    %55 = vector.broadcast %54 : vector<1x32xf32> to vector<16x32xf32>
    %56 = arith.addf %52, %55 : vector<16x32xf32>
    %c0_31 = arith.constant 0 : index
    %c0_32 = arith.constant 0 : index
    %c0_33 = arith.constant 0 : index
    %57 = vector.load %arg9[%c0_31, %c0_32, %c0_33] : memref<4x64x32xbf16, #tpu.memory_space<vmem>>, vector<1x64x32xbf16>
    %58 = vector.shape_cast %57 : vector<1x64x32xbf16> to vector<64x32xbf16>
    %cst_34 = arith.constant dense<0.000000e+00> : vector<16x32xf32>
    %59 = tpu.matmul %41, %58, %cst_34 {dimension_numbers = #tpu.dot_dimension_numbers<[1], [0], [0], [1], [0, 0, 1, 1], [], []>} : vector<16x64xbf16>, vector<64x32xbf16>, vector<16x32xf32> -> vector<16x32xf32>
    %c0_35 = arith.constant 0 : index
    %c0_36 = arith.constant 0 : index
    %c0_37 = arith.constant 0 : index
    %60 = vector.load %arg12[%c0_35, %c0_36, %c0_37] : memref<4x1x32xf32, #tpu.memory_space<vmem>>, vector<1x1x32xf32>
    %61 = vector.shape_cast %60 : vector<1x1x32xf32> to vector<1x32xf32>
    %62 = vector.broadcast %61 : vector<1x32xf32> to vector<16x32xf32>
    %63 = arith.addf %59, %62 : vector<16x32xf32>
    %64 = vector.shape_cast %49 : vector<16x32xf32> to vector<2x8x32xf32>
    %65 = arith.truncf %64 : vector<2x8x32xf32> to vector<2x8x32xbf16>
    %66 = vector.shape_cast %56 : vector<16x32xf32> to vector<2x8x32xf32>
    %67 = arith.truncf %66 : vector<2x8x32xf32> to vector<2x8x32xbf16>
    %68 = vector.shape_cast %63 : vector<16x32xf32> to vector<2x8x32xf32>
    %69 = arith.truncf %68 : vector<2x8x32xf32> to vector<2x8x32xbf16>
    "tpu.trace_start"() <{level = 10 : i32, message = "bqd,bkd->bqk"}> : () -> ()
    %cst_38 = arith.constant dense<0.000000e+00> : vector<2x8x8xf32>
    %70 = tpu.matmul %65, %67, %cst_38 {dimension_numbers = #tpu.dot_dimension_numbers<[2], [2], [1], [1], [0, 0, 0, 1, 1, 1], [0], [0]>} : vector<2x8x32xbf16>, vector<2x8x32xbf16>, vector<2x8x8xf32> -> vector<2x8x8xf32>
    "tpu.trace_stop"() : () -> ()
    %cst_39 = arith.constant 0.176776692 : f32
    %71 = vector.broadcast %cst_39 : f32 to vector<2x8x8xf32>
    %72 = arith.mulf %70, %71 : vector<2x8x8xf32>
    %cst_40 = arith.constant dense<0xFF800000> : vector<2x8xf32>
    %73 = vector.multi_reduction <maximumf>, %72, %cst_40 [2] : vector<2x8x8xf32> to vector<2x8xf32>
    %74 = vector.shape_cast %73 : vector<2x8xf32> to vector<2x8x1xf32>
    %75 = vector.broadcast %74 : vector<2x8x1xf32> to vector<2x8x8xf32>
    %76 = arith.subf %72, %75 : vector<2x8x8xf32>
    %77 = math.exp %76 : vector<2x8x8xf32>
    %cst_41 = arith.constant dense<0.000000e+00> : vector<2x8xf32>
    %78 = vector.multi_reduction <add>, %77, %cst_41 [2] : vector<2x8x8xf32> to vector<2x8xf32>
    %79 = vector.shape_cast %78 : vector<2x8xf32> to vector<2x8x1xf32>
    %80 = vector.broadcast %79 : vector<2x8x1xf32> to vector<2x8x8xf32>
    %81 = arith.divf %77, %80 : vector<2x8x8xf32>
    %82 = arith.truncf %81 : vector<2x8x8xf32> to vector<2x8x8xbf16>
    "tpu.trace_start"() <{level = 10 : i32, message = "bqk,bkd->bqd"}> : () -> ()
    %cst_42 = arith.constant dense<0.000000e+00> : vector<2x8x32xf32>
    %83 = tpu.matmul %82, %69, %cst_42 {dimension_numbers = #tpu.dot_dimension_numbers<[2], [1], [1], [2], [0, 0, 0, 1, 1, 2], [0], [0]>} : vector<2x8x8xbf16>, vector<2x8x32xbf16>, vector<2x8x32xf32> -> vector<2x8x32xf32>
    "tpu.trace_stop"() : () -> ()
    %84 = vector.shape_cast %83 : vector<2x8x32xf32> to vector<16x32xf32>
    %85 = arith.truncf %84 : vector<16x32xf32> to vector<16x32xbf16>
    %c0_43 = arith.constant 0 : index
    %c0_44 = arith.constant 0 : index
    %c0_45 = arith.constant 0 : index
    %86 = vector.load %arg13[%c0_43, %c0_44, %c0_45] : memref<4x32x64xbf16, #tpu.memory_space<vmem>>, vector<1x32x64xbf16>
    %87 = vector.shape_cast %86 : vector<1x32x64xbf16> to vector<32x64xbf16>
    %cst_46 = arith.constant dense<0.000000e+00> : vector<16x64xf32>
    %88 = tpu.matmul %85, %87, %cst_46 {dimension_numbers = #tpu.dot_dimension_numbers<[1], [0], [0], [1], [0, 0, 1, 1], [], []>} : vector<16x32xbf16>, vector<32x64xbf16>, vector<16x64xf32> -> vector<16x64xf32>
    %89 = arith.addf %42, %88 : vector<16x64xf32>
    %c1 = arith.constant 1 : index
    %c0_47 = arith.constant 0 : index
    %c0_48 = arith.constant 0 : index
    %90 = vector.load %arg7[%c1, %c0_47, %c0_48] : memref<4x64x32xbf16, #tpu.memory_space<vmem>>, vector<1x64x32xbf16>
    %91 = vector.shape_cast %90 : vector<1x64x32xbf16> to vector<64x32xbf16>
    %cst_49 = arith.constant dense<0.000000e+00> : vector<16x32xf32>
    %92 = tpu.matmul %41, %91, %cst_49 {dimension_numbers = #tpu.dot_dimension_numbers<[1], [0], [0], [1], [0, 0, 1, 1], [], []>} : vector<16x64xbf16>, vector<64x32xbf16>, vector<16x32xf32> -> vector<16x32xf32>
    %c1_50 = arith.constant 1 : index
    %c0_51 = arith.constant 0 : index
    %c0_52 = arith.constant 0 : index
    %93 = vector.load %arg10[%c1_50, %c0_51, %c0_52] : memref<4x1x32xf32, #tpu.memory_space<vmem>>, vector<1x1x32xf32>
    %94 = vector.shape_cast %93 : vector<1x1x32xf32> to vector<1x32xf32>
    %95 = vector.broadcast %94 : vector<1x32xf32> to vector<16x32xf32>
    %96 = arith.addf %92, %95 : vector<16x32xf32>
    %c1_53 = arith.constant 1 : index
    %c0_54 = arith.constant 0 : index
    %c0_55 = arith.constant 0 : index
    %97 = vector.load %arg8[%c1_53, %c0_54, %c0_55] : memref<4x64x32xbf16, #tpu.memory_space<vmem>>, vector<1x64x32xbf16>
    %98 = vector.shape_cast %97 : vector<1x64x32xbf16> to vector<64x32xbf16>
    %cst_56 = arith.constant dense<0.000000e+00> : vector<16x32xf32>
    %99 = tpu.matmul %41, %98, %cst_56 {dimension_numbers = #tpu.dot_dimension_numbers<[1], [0], [0], [1], [0, 0, 1, 1], [], []>} : vector<16x64xbf16>, vector<64x32xbf16>, vector<16x32xf32> -> vector<16x32xf32>
    %c1_57 = arith.constant 1 : index
    %c0_58 = arith.constant 0 : index
    %c0_59 = arith.constant 0 : index
    %100 = vector.load %arg11[%c1_57, %c0_58, %c0_59] : memref<4x1x32xf32, #tpu.memory_space<vmem>>, vector<1x1x32xf32>
    %101 = vector.shape_cast %100 : vector<1x1x32xf32> to vector<1x32xf32>
    %102 = vector.broadcast %101 : vector<1x32xf32> to vector<16x32xf32>
    %103 = arith.addf %99, %102 : vector<16x32xf32>
    %c1_60 = arith.constant 1 : index
    %c0_61 = arith.constant 0 : index
    %c0_62 = arith.constant 0 : index
    %104 = vector.load %arg9[%c1_60, %c0_61, %c0_62] : memref<4x64x32xbf16, #tpu.memory_space<vmem>>, vector<1x64x32xbf16>
    %105 = vector.shape_cast %104 : vector<1x64x32xbf16> to vector<64x32xbf16>
    %cst_63 = arith.constant dense<0.000000e+00> : vector<16x32xf32>
    %106 = tpu.matmul %41, %105, %cst_63 {dimension_numbers = #tpu.dot_dimension_numbers<[1], [0], [0], [1], [0, 0, 1, 1], [], []>} : vector<16x64xbf16>, vector<64x32xbf16>, vector<16x32xf32> -> vector<16x32xf32>
    %c1_64 = arith.constant 1 : index
    %c0_65 = arith.constant 0 : index
    %c0_66 = arith.constant 0 : index
    %107 = vector.load %arg12[%c1_64, %c0_65, %c0_66] : memref<4x1x32xf32, #tpu.memory_space<vmem>>, vector<1x1x32xf32>
    %108 = vector.shape_cast %107 : vector<1x1x32xf32> to vector<1x32xf32>
    %109 = vector.broadcast %108 : vector<1x32xf32> to vector<16x32xf32>
    %110 = arith.addf %106, %109 : vector<16x32xf32>
    %111 = vector.shape_cast %96 : vector<16x32xf32> to vector<2x8x32xf32>
    %112 = arith.truncf %111 : vector<2x8x32xf32> to vector<2x8x32xbf16>
    %113 = vector.shape_cast %103 : vector<16x32xf32> to vector<2x8x32xf32>
    %114 = arith.truncf %113 : vector<2x8x32xf32> to vector<2x8x32xbf16>
    %115 = vector.shape_cast %110 : vector<16x32xf32> to vector<2x8x32xf32>
    %116 = arith.truncf %115 : vector<2x8x32xf32> to vector<2x8x32xbf16>
    "tpu.trace_start"() <{level = 10 : i32, message = "bqd,bkd->bqk"}> : () -> ()
    %cst_67 = arith.constant dense<0.000000e+00> : vector<2x8x8xf32>
    %117 = tpu.matmul %112, %114, %cst_67 {dimension_numbers = #tpu.dot_dimension_numbers<[2], [2], [1], [1], [0, 0, 0, 1, 1, 1], [0], [0]>} : vector<2x8x32xbf16>, vector<2x8x32xbf16>, vector<2x8x8xf32> -> vector<2x8x8xf32>
    "tpu.trace_stop"() : () -> ()
    %cst_68 = arith.constant 0.176776692 : f32
    %118 = vector.broadcast %cst_68 : f32 to vector<2x8x8xf32>
    %119 = arith.mulf %117, %118 : vector<2x8x8xf32>
    %cst_69 = arith.constant dense<0xFF800000> : vector<2x8xf32>
    %120 = vector.multi_reduction <maximumf>, %119, %cst_69 [2] : vector<2x8x8xf32> to vector<2x8xf32>
    %121 = vector.shape_cast %120 : vector<2x8xf32> to vector<2x8x1xf32>
    %122 = vector.broadcast %121 : vector<2x8x1xf32> to vector<2x8x8xf32>
    %123 = arith.subf %119, %122 : vector<2x8x8xf32>
    %124 = math.exp %123 : vector<2x8x8xf32>
    %cst_70 = arith.constant dense<0.000000e+00> : vector<2x8xf32>
    %125 = vector.multi_reduction <add>, %124, %cst_70 [2] : vector<2x8x8xf32> to vector<2x8xf32>
    %126 = vector.shape_cast %125 : vector<2x8xf32> to vector<2x8x1xf32>
    %127 = vector.broadcast %126 : vector<2x8x1xf32> to vector<2x8x8xf32>
    %128 = arith.divf %124, %127 : vector<2x8x8xf32>
    %129 = arith.truncf %128 : vector<2x8x8xf32> to vector<2x8x8xbf16>
    "tpu.trace_start"() <{level = 10 : i32, message = "bqk,bkd->bqd"}> : () -> ()
    %cst_71 = arith.constant dense<0.000000e+00> : vector<2x8x32xf32>
    %130 = tpu.matmul %129, %116, %cst_71 {dimension_numbers = #tpu.dot_dimension_numbers<[2], [1], [1], [2], [0, 0, 0, 1, 1, 2], [0], [0]>} : vector<2x8x8xbf16>, vector<2x8x32xbf16>, vector<2x8x32xf32> -> vector<2x8x32xf32>
    "tpu.trace_stop"() : () -> ()
    %131 = vector.shape_cast %130 : vector<2x8x32xf32> to vector<16x32xf32>
    %132 = arith.truncf %131 : vector<16x32xf32> to vector<16x32xbf16>
    %c1_72 = arith.constant 1 : index
    %c0_73 = arith.constant 0 : index
    %c0_74 = arith.constant 0 : index
    %133 = vector.load %arg13[%c1_72, %c0_73, %c0_74] : memref<4x32x64xbf16, #tpu.memory_space<vmem>>, vector<1x32x64xbf16>
    %134 = vector.shape_cast %133 : vector<1x32x64xbf16> to vector<32x64xbf16>
    %cst_75 = arith.constant dense<0.000000e+00> : vector<16x64xf32>
    %135 = tpu.matmul %132, %134, %cst_75 {dimension_numbers = #tpu.dot_dimension_numbers<[1], [0], [0], [1], [0, 0, 1, 1], [], []>} : vector<16x32xbf16>, vector<32x64xbf16>, vector<16x64xf32> -> vector<16x64xf32>
    %136 = arith.addf %89, %135 : vector<16x64xf32>
    %c0_76 = arith.constant 0 : index
    %c0_77 = arith.constant 0 : index
    %c0_78 = arith.constant 0 : index
    %137 = vector.load %arg14[%c0_76, %c0_77, %c0_78] : memref<2x1x64xf32, #tpu.memory_space<vmem>>, vector<1x1x64xf32>
    %138 = vector.shape_cast %137 : vector<1x1x64xf32> to vector<1x64xf32>
    %139 = vector.broadcast %138 : vector<1x64xf32> to vector<16x64xf32>
    %140 = arith.addf %136, %139 : vector<16x64xf32>
    %141 = arith.addf %40, %140 : vector<16x64xf32>
    %c0_79 = arith.constant 0 : index
    %c0_80 = arith.constant 0 : index
    %c0_81 = arith.constant 0 : index
    %142 = vector.load %arg15[%c0_79, %c0_80, %c0_81] : memref<2x1x64xf32, #tpu.memory_space<vmem>>, vector<1x1x64xf32>
    %143 = vector.shape_cast %142 : vector<1x1x64xf32> to vector<1x64xf32>
    %c0_82 = arith.constant 0 : index
    %c0_83 = arith.constant 0 : index
    %c0_84 = arith.constant 0 : index
    %144 = vector.load %arg16[%c0_82, %c0_83, %c0_84] : memref<2x1x64xf32, #tpu.memory_space<vmem>>, vector<1x1x64xf32>
    %145 = vector.shape_cast %144 : vector<1x1x64xf32> to vector<1x64xf32>
    %cst_85 = arith.constant dense<0.000000e+00> : vector<16xf32>
    %146 = vector.multi_reduction <add>, %141, %cst_85 [1] : vector<16x64xf32> to vector<16xf32>
    %147 = vector.shape_cast %146 : vector<16xf32> to vector<16x1xf32>
    %cst_86 = arith.constant 6.400000e+01 : f32
    %148 = vector.broadcast %cst_86 : f32 to vector<16x1xf32>
    %149 = arith.divf %147, %148 : vector<16x1xf32>
    %150 = vector.broadcast %149 : vector<16x1xf32> to vector<16x64xf32>
    %151 = arith.subf %141, %150 : vector<16x64xf32>
    %152 = arith.mulf %151, %151 : vector<16x64xf32>
    %cst_87 = arith.constant dense<0.000000e+00> : vector<16xf32>
    %153 = vector.multi_reduction <add>, %152, %cst_87 [1] : vector<16x64xf32> to vector<16xf32>
    %154 = vector.shape_cast %153 : vector<16xf32> to vector<16x1xf32>
    %cst_88 = arith.constant 6.400000e+01 : f32
    %155 = vector.broadcast %cst_88 : f32 to vector<16x1xf32>
    %156 = arith.divf %154, %155 : vector<16x1xf32>
    %cst_89 = arith.constant 9.99999996E-13 : f32
    %157 = vector.broadcast %cst_89 : f32 to vector<16x1xf32>
    %158 = arith.addf %156, %157 : vector<16x1xf32>
    %159 = math.rsqrt %158 : vector<16x1xf32>
    %160 = vector.broadcast %159 : vector<16x1xf32> to vector<16x64xf32>
    %161 = arith.mulf %151, %160 : vector<16x64xf32>
    %162 = vector.broadcast %143 : vector<1x64xf32> to vector<16x64xf32>
    %163 = arith.mulf %161, %162 : vector<16x64xf32>
    %164 = vector.broadcast %145 : vector<1x64xf32> to vector<16x64xf32>
    %165 = arith.addf %163, %164 : vector<16x64xf32>
    %166 = arith.truncf %165 : vector<16x64xf32> to vector<16x64xbf16>
    %c0_90 = arith.constant 0 : index
    %c0_91 = arith.constant 0 : index
    %c0_92 = arith.constant 0 : index
    %167 = vector.load %arg17[%c0_90, %c0_91, %c0_92] : memref<2x64x128xbf16, #tpu.memory_space<vmem>>, vector<1x64x128xbf16>
    %168 = vector.shape_cast %167 : vector<1x64x128xbf16> to vector<64x128xbf16>
    %cst_93 = arith.constant dense<0.000000e+00> : vector<16x128xf32>
    %169 = tpu.matmul %166, %168, %cst_93 {dimension_numbers = #tpu.dot_dimension_numbers<[1], [0], [0], [1], [0, 0, 1, 1], [], []>} : vector<16x64xbf16>, vector<64x128xbf16>, vector<16x128xf32> -> vector<16x128xf32>
    %c0_94 = arith.constant 0 : index
    %c0_95 = arith.constant 0 : index
    %c0_96 = arith.constant 0 : index
    %170 = vector.load %arg18[%c0_94, %c0_95, %c0_96] : memref<2x1x128xf32, #tpu.memory_space<vmem>>, vector<1x1x128xf32>
    %171 = vector.shape_cast %170 : vector<1x1x128xf32> to vector<1x128xf32>
    %172 = vector.broadcast %171 : vector<1x128xf32> to vector<16x128xf32>
    %173 = arith.addf %169, %172 : vector<16x128xf32>
    %cst_97 = arith.constant 5.000000e-01 : f32
    %174 = vector.broadcast %cst_97 : f32 to vector<16x128xf32>
    %175 = arith.mulf %174, %173 : vector<16x128xf32>
    %cst_98 = arith.constant 0.707106769 : f32
    %176 = vector.broadcast %cst_98 : f32 to vector<16x128xf32>
    %177 = arith.mulf %173, %176 : vector<16x128xf32>
    %178 = math.absf %177 : vector<16x128xf32>
    %cst_99 = arith.constant 0.327591091 : f32
    %179 = vector.broadcast %cst_99 : f32 to vector<16x128xf32>
    %180 = arith.mulf %179, %178 : vector<16x128xf32>
    %cst_100 = arith.constant 1.000000e+00 : f32
    %181 = vector.broadcast %cst_100 : f32 to vector<16x128xf32>
    %182 = arith.addf %181, %180 : vector<16x128xf32>
    %cst_101 = arith.constant 1.000000e+00 : f32
    %183 = vector.broadcast %cst_101 : f32 to vector<16x128xf32>
    %184 = arith.divf %183, %182 : vector<16x128xf32>
    %cst_102 = arith.constant 1.06140542 : f32
    %185 = vector.broadcast %cst_102 : f32 to vector<16x128xf32>
    %186 = arith.mulf %185, %184 : vector<16x128xf32>
    %cst_103 = arith.constant -1.45315206 : f32
    %187 = vector.broadcast %cst_103 : f32 to vector<16x128xf32>
    %188 = arith.addf %186, %187 : vector<16x128xf32>
    %189 = arith.mulf %188, %184 : vector<16x128xf32>
    %cst_104 = arith.constant 1.42141378 : f32
    %190 = vector.broadcast %cst_104 : f32 to vector<16x128xf32>
    %191 = arith.addf %189, %190 : vector<16x128xf32>
    %192 = arith.mulf %191, %184 : vector<16x128xf32>
    %cst_105 = arith.constant -0.284496725 : f32
    %193 = vector.broadcast %cst_105 : f32 to vector<16x128xf32>
    %194 = arith.addf %192, %193 : vector<16x128xf32>
    %195 = arith.mulf %194, %184 : vector<16x128xf32>
    %cst_106 = arith.constant 0.254829586 : f32
    %196 = vector.broadcast %cst_106 : f32 to vector<16x128xf32>
    %197 = arith.addf %195, %196 : vector<16x128xf32>
    %198 = arith.mulf %197, %184 : vector<16x128xf32>
    %cst_107 = arith.constant 0.000000e+00 : f32
    %199 = vector.broadcast %cst_107 : f32 to vector<16x128xf32>
    %200 = arith.subf %199, %178 : vector<16x128xf32>
    %201 = arith.mulf %200, %178 : vector<16x128xf32>
    %202 = math.exp %201 : vector<16x128xf32>
    %203 = arith.mulf %198, %202 : vector<16x128xf32>
    %cst_108 = arith.constant 1.000000e+00 : f32
    %204 = vector.broadcast %cst_108 : f32 to vector<16x128xf32>
    %205 = arith.subf %204, %203 : vector<16x128xf32>
    %cst_109 = arith.constant 0.000000e+00 : f32
    %206 = vector.broadcast %cst_109 : f32 to vector<16x128xf32>
    %207 = arith.cmpf oge, %177, %206 : vector<16x128xf32>
    %cst_110 = arith.constant 0.000000e+00 : f32
    %208 = vector.broadcast %cst_110 : f32 to vector<16x128xf32>
    %209 = arith.subf %208, %205 : vector<16x128xf32>
    %210 = arith.select %207, %205, %209 : vector<16x128xi1>, vector<16x128xf32>
    %cst_111 = arith.constant 1.000000e+00 : f32
    %211 = vector.broadcast %cst_111 : f32 to vector<16x128xf32>
    %212 = arith.addf %211, %210 : vector<16x128xf32>
    %213 = arith.mulf %175, %212 : vector<16x128xf32>
    %214 = arith.truncf %213 : vector<16x128xf32> to vector<16x128xbf16>
    %c0_112 = arith.constant 0 : index
    %c0_113 = arith.constant 0 : index
    %c0_114 = arith.constant 0 : index
    %215 = vector.load %arg19[%c0_112, %c0_113, %c0_114] : memref<2x128x64xbf16, #tpu.memory_space<vmem>>, vector<1x128x64xbf16>
    %216 = vector.shape_cast %215 : vector<1x128x64xbf16> to vector<128x64xbf16>
    %cst_115 = arith.constant dense<0.000000e+00> : vector<16x64xf32>
    %217 = tpu.matmul %214, %216, %cst_115 {dimension_numbers = #tpu.dot_dimension_numbers<[1], [0], [0], [1], [0, 0, 1, 1], [], []>} : vector<16x128xbf16>, vector<128x64xbf16>, vector<16x64xf32> -> vector<16x64xf32>
    %c0_116 = arith.constant 0 : index
    %c0_117 = arith.constant 0 : index
    %c0_118 = arith.constant 0 : index
    %218 = vector.load %arg20[%c0_116, %c0_117, %c0_118] : memref<2x1x64xf32, #tpu.memory_space<vmem>>, vector<1x1x64xf32>
    %219 = vector.shape_cast %218 : vector<1x1x64xf32> to vector<1x64xf32>
    %220 = vector.broadcast %219 : vector<1x64xf32> to vector<16x64xf32>
    %221 = arith.addf %217, %220 : vector<16x64xf32>
    %222 = arith.addf %165, %221 : vector<16x64xf32>
    %c0_119 = arith.constant 0 : index
    %c0_120 = arith.constant 0 : index
    %c0_121 = arith.constant 0 : index
    %223 = vector.load %arg21[%c0_119, %c0_120, %c0_121] : memref<2x1x64xf32, #tpu.memory_space<vmem>>, vector<1x1x64xf32>
    %224 = vector.shape_cast %223 : vector<1x1x64xf32> to vector<1x64xf32>
    %c0_122 = arith.constant 0 : index
    %c0_123 = arith.constant 0 : index
    %c0_124 = arith.constant 0 : index
    %225 = vector.load %arg22[%c0_122, %c0_123, %c0_124] : memref<2x1x64xf32, #tpu.memory_space<vmem>>, vector<1x1x64xf32>
    %226 = vector.shape_cast %225 : vector<1x1x64xf32> to vector<1x64xf32>
    %cst_125 = arith.constant dense<0.000000e+00> : vector<16xf32>
    %227 = vector.multi_reduction <add>, %222, %cst_125 [1] : vector<16x64xf32> to vector<16xf32>
    %228 = vector.shape_cast %227 : vector<16xf32> to vector<16x1xf32>
    %cst_126 = arith.constant 6.400000e+01 : f32
    %229 = vector.broadcast %cst_126 : f32 to vector<16x1xf32>
    %230 = arith.divf %228, %229 : vector<16x1xf32>
    %231 = vector.broadcast %230 : vector<16x1xf32> to vector<16x64xf32>
    %232 = arith.subf %222, %231 : vector<16x64xf32>
    %233 = arith.mulf %232, %232 : vector<16x64xf32>
    %cst_127 = arith.constant dense<0.000000e+00> : vector<16xf32>
    %234 = vector.multi_reduction <add>, %233, %cst_127 [1] : vector<16x64xf32> to vector<16xf32>
    %235 = vector.shape_cast %234 : vector<16xf32> to vector<16x1xf32>
    %cst_128 = arith.constant 6.400000e+01 : f32
    %236 = vector.broadcast %cst_128 : f32 to vector<16x1xf32>
    %237 = arith.divf %235, %236 : vector<16x1xf32>
    %cst_129 = arith.constant 9.99999996E-13 : f32
    %238 = vector.broadcast %cst_129 : f32 to vector<16x1xf32>
    %239 = arith.addf %237, %238 : vector<16x1xf32>
    %240 = math.rsqrt %239 : vector<16x1xf32>
    %241 = vector.broadcast %240 : vector<16x1xf32> to vector<16x64xf32>
    %242 = arith.mulf %232, %241 : vector<16x64xf32>
    %243 = vector.broadcast %224 : vector<1x64xf32> to vector<16x64xf32>
    %244 = arith.mulf %242, %243 : vector<16x64xf32>
    %245 = vector.broadcast %226 : vector<1x64xf32> to vector<16x64xf32>
    %246 = arith.addf %244, %245 : vector<16x64xf32>
    %247 = arith.truncf %246 : vector<16x64xf32> to vector<16x64xbf16>
    %cst_130 = arith.constant 0.000000e+00 : f32
    %248 = vector.broadcast %cst_130 : f32 to vector<16x64xf32>
    %c2 = arith.constant 2 : index
    %c0_131 = arith.constant 0 : index
    %c0_132 = arith.constant 0 : index
    %249 = vector.load %arg7[%c2, %c0_131, %c0_132] : memref<4x64x32xbf16, #tpu.memory_space<vmem>>, vector<1x64x32xbf16>
    %250 = vector.shape_cast %249 : vector<1x64x32xbf16> to vector<64x32xbf16>
    %cst_133 = arith.constant dense<0.000000e+00> : vector<16x32xf32>
    %251 = tpu.matmul %247, %250, %cst_133 {dimension_numbers = #tpu.dot_dimension_numbers<[1], [0], [0], [1], [0, 0, 1, 1], [], []>} : vector<16x64xbf16>, vector<64x32xbf16>, vector<16x32xf32> -> vector<16x32xf32>
    %c2_134 = arith.constant 2 : index
    %c0_135 = arith.constant 0 : index
    %c0_136 = arith.constant 0 : index
    %252 = vector.load %arg10[%c2_134, %c0_135, %c0_136] : memref<4x1x32xf32, #tpu.memory_space<vmem>>, vector<1x1x32xf32>
    %253 = vector.shape_cast %252 : vector<1x1x32xf32> to vector<1x32xf32>
    %254 = vector.broadcast %253 : vector<1x32xf32> to vector<16x32xf32>
    %255 = arith.addf %251, %254 : vector<16x32xf32>
    %c2_137 = arith.constant 2 : index
    %c0_138 = arith.constant 0 : index
    %c0_139 = arith.constant 0 : index
    %256 = vector.load %arg8[%c2_137, %c0_138, %c0_139] : memref<4x64x32xbf16, #tpu.memory_space<vmem>>, vector<1x64x32xbf16>
    %257 = vector.shape_cast %256 : vector<1x64x32xbf16> to vector<64x32xbf16>
    %cst_140 = arith.constant dense<0.000000e+00> : vector<16x32xf32>
    %258 = tpu.matmul %247, %257, %cst_140 {dimension_numbers = #tpu.dot_dimension_numbers<[1], [0], [0], [1], [0, 0, 1, 1], [], []>} : vector<16x64xbf16>, vector<64x32xbf16>, vector<16x32xf32> -> vector<16x32xf32>
    %c2_141 = arith.constant 2 : index
    %c0_142 = arith.constant 0 : index
    %c0_143 = arith.constant 0 : index
    %259 = vector.load %arg11[%c2_141, %c0_142, %c0_143] : memref<4x1x32xf32, #tpu.memory_space<vmem>>, vector<1x1x32xf32>
    %260 = vector.shape_cast %259 : vector<1x1x32xf32> to vector<1x32xf32>
    %261 = vector.broadcast %260 : vector<1x32xf32> to vector<16x32xf32>
    %262 = arith.addf %258, %261 : vector<16x32xf32>
    %c2_144 = arith.constant 2 : index
    %c0_145 = arith.constant 0 : index
    %c0_146 = arith.constant 0 : index
    %263 = vector.load %arg9[%c2_144, %c0_145, %c0_146] : memref<4x64x32xbf16, #tpu.memory_space<vmem>>, vector<1x64x32xbf16>
    %264 = vector.shape_cast %263 : vector<1x64x32xbf16> to vector<64x32xbf16>
    %cst_147 = arith.constant dense<0.000000e+00> : vector<16x32xf32>
    %265 = tpu.matmul %247, %264, %cst_147 {dimension_numbers = #tpu.dot_dimension_numbers<[1], [0], [0], [1], [0, 0, 1, 1], [], []>} : vector<16x64xbf16>, vector<64x32xbf16>, vector<16x32xf32> -> vector<16x32xf32>
    %c2_148 = arith.constant 2 : index
    %c0_149 = arith.constant 0 : index
    %c0_150 = arith.constant 0 : index
    %266 = vector.load %arg12[%c2_148, %c0_149, %c0_150] : memref<4x1x32xf32, #tpu.memory_space<vmem>>, vector<1x1x32xf32>
    %267 = vector.shape_cast %266 : vector<1x1x32xf32> to vector<1x32xf32>
    %268 = vector.broadcast %267 : vector<1x32xf32> to vector<16x32xf32>
    %269 = arith.addf %265, %268 : vector<16x32xf32>
    %270 = vector.shape_cast %255 : vector<16x32xf32> to vector<2x8x32xf32>
    %271 = arith.truncf %270 : vector<2x8x32xf32> to vector<2x8x32xbf16>
    %272 = vector.shape_cast %262 : vector<16x32xf32> to vector<2x8x32xf32>
    %273 = arith.truncf %272 : vector<2x8x32xf32> to vector<2x8x32xbf16>
    %274 = vector.shape_cast %269 : vector<16x32xf32> to vector<2x8x32xf32>
    %275 = arith.truncf %274 : vector<2x8x32xf32> to vector<2x8x32xbf16>
    "tpu.trace_start"() <{level = 10 : i32, message = "bqd,bkd->bqk"}> : () -> ()
    %cst_151 = arith.constant dense<0.000000e+00> : vector<2x8x8xf32>
    %276 = tpu.matmul %271, %273, %cst_151 {dimension_numbers = #tpu.dot_dimension_numbers<[2], [2], [1], [1], [0, 0, 0, 1, 1, 1], [0], [0]>} : vector<2x8x32xbf16>, vector<2x8x32xbf16>, vector<2x8x8xf32> -> vector<2x8x8xf32>
    "tpu.trace_stop"() : () -> ()
    %cst_152 = arith.constant 0.176776692 : f32
    %277 = vector.broadcast %cst_152 : f32 to vector<2x8x8xf32>
    %278 = arith.mulf %276, %277 : vector<2x8x8xf32>
    %cst_153 = arith.constant dense<0xFF800000> : vector<2x8xf32>
    %279 = vector.multi_reduction <maximumf>, %278, %cst_153 [2] : vector<2x8x8xf32> to vector<2x8xf32>
    %280 = vector.shape_cast %279 : vector<2x8xf32> to vector<2x8x1xf32>
    %281 = vector.broadcast %280 : vector<2x8x1xf32> to vector<2x8x8xf32>
    %282 = arith.subf %278, %281 : vector<2x8x8xf32>
    %283 = math.exp %282 : vector<2x8x8xf32>
    %cst_154 = arith.constant dense<0.000000e+00> : vector<2x8xf32>
    %284 = vector.multi_reduction <add>, %283, %cst_154 [2] : vector<2x8x8xf32> to vector<2x8xf32>
    %285 = vector.shape_cast %284 : vector<2x8xf32> to vector<2x8x1xf32>
    %286 = vector.broadcast %285 : vector<2x8x1xf32> to vector<2x8x8xf32>
    %287 = arith.divf %283, %286 : vector<2x8x8xf32>
    %288 = arith.truncf %287 : vector<2x8x8xf32> to vector<2x8x8xbf16>
    "tpu.trace_start"() <{level = 10 : i32, message = "bqk,bkd->bqd"}> : () -> ()
    %cst_155 = arith.constant dense<0.000000e+00> : vector<2x8x32xf32>
    %289 = tpu.matmul %288, %275, %cst_155 {dimension_numbers = #tpu.dot_dimension_numbers<[2], [1], [1], [2], [0, 0, 0, 1, 1, 2], [0], [0]>} : vector<2x8x8xbf16>, vector<2x8x32xbf16>, vector<2x8x32xf32> -> vector<2x8x32xf32>
    "tpu.trace_stop"() : () -> ()
    %290 = vector.shape_cast %289 : vector<2x8x32xf32> to vector<16x32xf32>
    %291 = arith.truncf %290 : vector<16x32xf32> to vector<16x32xbf16>
    %c2_156 = arith.constant 2 : index
    %c0_157 = arith.constant 0 : index
    %c0_158 = arith.constant 0 : index
    %292 = vector.load %arg13[%c2_156, %c0_157, %c0_158] : memref<4x32x64xbf16, #tpu.memory_space<vmem>>, vector<1x32x64xbf16>
    %293 = vector.shape_cast %292 : vector<1x32x64xbf16> to vector<32x64xbf16>
    %cst_159 = arith.constant dense<0.000000e+00> : vector<16x64xf32>
    %294 = tpu.matmul %291, %293, %cst_159 {dimension_numbers = #tpu.dot_dimension_numbers<[1], [0], [0], [1], [0, 0, 1, 1], [], []>} : vector<16x32xbf16>, vector<32x64xbf16>, vector<16x64xf32> -> vector<16x64xf32>
    %295 = arith.addf %248, %294 : vector<16x64xf32>
    %c3 = arith.constant 3 : index
    %c0_160 = arith.constant 0 : index
    %c0_161 = arith.constant 0 : index
    %296 = vector.load %arg7[%c3, %c0_160, %c0_161] : memref<4x64x32xbf16, #tpu.memory_space<vmem>>, vector<1x64x32xbf16>
    %297 = vector.shape_cast %296 : vector<1x64x32xbf16> to vector<64x32xbf16>
    %cst_162 = arith.constant dense<0.000000e+00> : vector<16x32xf32>
    %298 = tpu.matmul %247, %297, %cst_162 {dimension_numbers = #tpu.dot_dimension_numbers<[1], [0], [0], [1], [0, 0, 1, 1], [], []>} : vector<16x64xbf16>, vector<64x32xbf16>, vector<16x32xf32> -> vector<16x32xf32>
    %c3_163 = arith.constant 3 : index
    %c0_164 = arith.constant 0 : index
    %c0_165 = arith.constant 0 : index
    %299 = vector.load %arg10[%c3_163, %c0_164, %c0_165] : memref<4x1x32xf32, #tpu.memory_space<vmem>>, vector<1x1x32xf32>
    %300 = vector.shape_cast %299 : vector<1x1x32xf32> to vector<1x32xf32>
    %301 = vector.broadcast %300 : vector<1x32xf32> to vector<16x32xf32>
    %302 = arith.addf %298, %301 : vector<16x32xf32>
    %c3_166 = arith.constant 3 : index
    %c0_167 = arith.constant 0 : index
    %c0_168 = arith.constant 0 : index
    %303 = vector.load %arg8[%c3_166, %c0_167, %c0_168] : memref<4x64x32xbf16, #tpu.memory_space<vmem>>, vector<1x64x32xbf16>
    %304 = vector.shape_cast %303 : vector<1x64x32xbf16> to vector<64x32xbf16>
    %cst_169 = arith.constant dense<0.000000e+00> : vector<16x32xf32>
    %305 = tpu.matmul %247, %304, %cst_169 {dimension_numbers = #tpu.dot_dimension_numbers<[1], [0], [0], [1], [0, 0, 1, 1], [], []>} : vector<16x64xbf16>, vector<64x32xbf16>, vector<16x32xf32> -> vector<16x32xf32>
    %c3_170 = arith.constant 3 : index
    %c0_171 = arith.constant 0 : index
    %c0_172 = arith.constant 0 : index
    %306 = vector.load %arg11[%c3_170, %c0_171, %c0_172] : memref<4x1x32xf32, #tpu.memory_space<vmem>>, vector<1x1x32xf32>
    %307 = vector.shape_cast %306 : vector<1x1x32xf32> to vector<1x32xf32>
    %308 = vector.broadcast %307 : vector<1x32xf32> to vector<16x32xf32>
    %309 = arith.addf %305, %308 : vector<16x32xf32>
    %c3_173 = arith.constant 3 : index
    %c0_174 = arith.constant 0 : index
    %c0_175 = arith.constant 0 : index
    %310 = vector.load %arg9[%c3_173, %c0_174, %c0_175] : memref<4x64x32xbf16, #tpu.memory_space<vmem>>, vector<1x64x32xbf16>
    %311 = vector.shape_cast %310 : vector<1x64x32xbf16> to vector<64x32xbf16>
    %cst_176 = arith.constant dense<0.000000e+00> : vector<16x32xf32>
    %312 = tpu.matmul %247, %311, %cst_176 {dimension_numbers = #tpu.dot_dimension_numbers<[1], [0], [0], [1], [0, 0, 1, 1], [], []>} : vector<16x64xbf16>, vector<64x32xbf16>, vector<16x32xf32> -> vector<16x32xf32>
    %c3_177 = arith.constant 3 : index
    %c0_178 = arith.constant 0 : index
    %c0_179 = arith.constant 0 : index
    %313 = vector.load %arg12[%c3_177, %c0_178, %c0_179] : memref<4x1x32xf32, #tpu.memory_space<vmem>>, vector<1x1x32xf32>
    %314 = vector.shape_cast %313 : vector<1x1x32xf32> to vector<1x32xf32>
    %315 = vector.broadcast %314 : vector<1x32xf32> to vector<16x32xf32>
    %316 = arith.addf %312, %315 : vector<16x32xf32>
    %317 = vector.shape_cast %302 : vector<16x32xf32> to vector<2x8x32xf32>
    %318 = arith.truncf %317 : vector<2x8x32xf32> to vector<2x8x32xbf16>
    %319 = vector.shape_cast %309 : vector<16x32xf32> to vector<2x8x32xf32>
    %320 = arith.truncf %319 : vector<2x8x32xf32> to vector<2x8x32xbf16>
    %321 = vector.shape_cast %316 : vector<16x32xf32> to vector<2x8x32xf32>
    %322 = arith.truncf %321 : vector<2x8x32xf32> to vector<2x8x32xbf16>
    "tpu.trace_start"() <{level = 10 : i32, message = "bqd,bkd->bqk"}> : () -> ()
    %cst_180 = arith.constant dense<0.000000e+00> : vector<2x8x8xf32>
    %323 = tpu.matmul %318, %320, %cst_180 {dimension_numbers = #tpu.dot_dimension_numbers<[2], [2], [1], [1], [0, 0, 0, 1, 1, 1], [0], [0]>} : vector<2x8x32xbf16>, vector<2x8x32xbf16>, vector<2x8x8xf32> -> vector<2x8x8xf32>
    "tpu.trace_stop"() : () -> ()
    %cst_181 = arith.constant 0.176776692 : f32
    %324 = vector.broadcast %cst_181 : f32 to vector<2x8x8xf32>
    %325 = arith.mulf %323, %324 : vector<2x8x8xf32>
    %cst_182 = arith.constant dense<0xFF800000> : vector<2x8xf32>
    %326 = vector.multi_reduction <maximumf>, %325, %cst_182 [2] : vector<2x8x8xf32> to vector<2x8xf32>
    %327 = vector.shape_cast %326 : vector<2x8xf32> to vector<2x8x1xf32>
    %328 = vector.broadcast %327 : vector<2x8x1xf32> to vector<2x8x8xf32>
    %329 = arith.subf %325, %328 : vector<2x8x8xf32>
    %330 = math.exp %329 : vector<2x8x8xf32>
    %cst_183 = arith.constant dense<0.000000e+00> : vector<2x8xf32>
    %331 = vector.multi_reduction <add>, %330, %cst_183 [2] : vector<2x8x8xf32> to vector<2x8xf32>
    %332 = vector.shape_cast %331 : vector<2x8xf32> to vector<2x8x1xf32>
    %333 = vector.broadcast %332 : vector<2x8x1xf32> to vector<2x8x8xf32>
    %334 = arith.divf %330, %333 : vector<2x8x8xf32>
    %335 = arith.truncf %334 : vector<2x8x8xf32> to vector<2x8x8xbf16>
    "tpu.trace_start"() <{level = 10 : i32, message = "bqk,bkd->bqd"}> : () -> ()
    %cst_184 = arith.constant dense<0.000000e+00> : vector<2x8x32xf32>
    %336 = tpu.matmul %335, %322, %cst_184 {dimension_numbers = #tpu.dot_dimension_numbers<[2], [1], [1], [2], [0, 0, 0, 1, 1, 2], [0], [0]>} : vector<2x8x8xbf16>, vector<2x8x32xbf16>, vector<2x8x32xf32> -> vector<2x8x32xf32>
    "tpu.trace_stop"() : () -> ()
    %337 = vector.shape_cast %336 : vector<2x8x32xf32> to vector<16x32xf32>
    %338 = arith.truncf %337 : vector<16x32xf32> to vector<16x32xbf16>
    %c3_185 = arith.constant 3 : index
    %c0_186 = arith.constant 0 : index
    %c0_187 = arith.constant 0 : index
    %339 = vector.load %arg13[%c3_185, %c0_186, %c0_187] : memref<4x32x64xbf16, #tpu.memory_space<vmem>>, vector<1x32x64xbf16>
    %340 = vector.shape_cast %339 : vector<1x32x64xbf16> to vector<32x64xbf16>
    %cst_188 = arith.constant dense<0.000000e+00> : vector<16x64xf32>
    %341 = tpu.matmul %338, %340, %cst_188 {dimension_numbers = #tpu.dot_dimension_numbers<[1], [0], [0], [1], [0, 0, 1, 1], [], []>} : vector<16x32xbf16>, vector<32x64xbf16>, vector<16x64xf32> -> vector<16x64xf32>
    %342 = arith.addf %295, %341 : vector<16x64xf32>
    %c1_189 = arith.constant 1 : index
    %c0_190 = arith.constant 0 : index
    %c0_191 = arith.constant 0 : index
    %343 = vector.load %arg14[%c1_189, %c0_190, %c0_191] : memref<2x1x64xf32, #tpu.memory_space<vmem>>, vector<1x1x64xf32>
    %344 = vector.shape_cast %343 : vector<1x1x64xf32> to vector<1x64xf32>
    %345 = vector.broadcast %344 : vector<1x64xf32> to vector<16x64xf32>
    %346 = arith.addf %342, %345 : vector<16x64xf32>
    %347 = arith.addf %246, %346 : vector<16x64xf32>
    %c1_192 = arith.constant 1 : index
    %c0_193 = arith.constant 0 : index
    %c0_194 = arith.constant 0 : index
    %348 = vector.load %arg15[%c1_192, %c0_193, %c0_194] : memref<2x1x64xf32, #tpu.memory_space<vmem>>, vector<1x1x64xf32>
    %349 = vector.shape_cast %348 : vector<1x1x64xf32> to vector<1x64xf32>
    %c1_195 = arith.constant 1 : index
    %c0_196 = arith.constant 0 : index
    %c0_197 = arith.constant 0 : index
    %350 = vector.load %arg16[%c1_195, %c0_196, %c0_197] : memref<2x1x64xf32, #tpu.memory_space<vmem>>, vector<1x1x64xf32>
    %351 = vector.shape_cast %350 : vector<1x1x64xf32> to vector<1x64xf32>
    %cst_198 = arith.constant dense<0.000000e+00> : vector<16xf32>
    %352 = vector.multi_reduction <add>, %347, %cst_198 [1] : vector<16x64xf32> to vector<16xf32>
    %353 = vector.shape_cast %352 : vector<16xf32> to vector<16x1xf32>
    %cst_199 = arith.constant 6.400000e+01 : f32
    %354 = vector.broadcast %cst_199 : f32 to vector<16x1xf32>
    %355 = arith.divf %353, %354 : vector<16x1xf32>
    %356 = vector.broadcast %355 : vector<16x1xf32> to vector<16x64xf32>
    %357 = arith.subf %347, %356 : vector<16x64xf32>
    %358 = arith.mulf %357, %357 : vector<16x64xf32>
    %cst_200 = arith.constant dense<0.000000e+00> : vector<16xf32>
    %359 = vector.multi_reduction <add>, %358, %cst_200 [1] : vector<16x64xf32> to vector<16xf32>
    %360 = vector.shape_cast %359 : vector<16xf32> to vector<16x1xf32>
    %cst_201 = arith.constant 6.400000e+01 : f32
    %361 = vector.broadcast %cst_201 : f32 to vector<16x1xf32>
    %362 = arith.divf %360, %361 : vector<16x1xf32>
    %cst_202 = arith.constant 9.99999996E-13 : f32
    %363 = vector.broadcast %cst_202 : f32 to vector<16x1xf32>
    %364 = arith.addf %362, %363 : vector<16x1xf32>
    %365 = math.rsqrt %364 : vector<16x1xf32>
    %366 = vector.broadcast %365 : vector<16x1xf32> to vector<16x64xf32>
    %367 = arith.mulf %357, %366 : vector<16x64xf32>
    %368 = vector.broadcast %349 : vector<1x64xf32> to vector<16x64xf32>
    %369 = arith.mulf %367, %368 : vector<16x64xf32>
    %370 = vector.broadcast %351 : vector<1x64xf32> to vector<16x64xf32>
    %371 = arith.addf %369, %370 : vector<16x64xf32>
    %372 = arith.truncf %371 : vector<16x64xf32> to vector<16x64xbf16>
    %c1_203 = arith.constant 1 : index
    %c0_204 = arith.constant 0 : index
    %c0_205 = arith.constant 0 : index
    %373 = vector.load %arg17[%c1_203, %c0_204, %c0_205] : memref<2x64x128xbf16, #tpu.memory_space<vmem>>, vector<1x64x128xbf16>
    %374 = vector.shape_cast %373 : vector<1x64x128xbf16> to vector<64x128xbf16>
    %cst_206 = arith.constant dense<0.000000e+00> : vector<16x128xf32>
    %375 = tpu.matmul %372, %374, %cst_206 {dimension_numbers = #tpu.dot_dimension_numbers<[1], [0], [0], [1], [0, 0, 1, 1], [], []>} : vector<16x64xbf16>, vector<64x128xbf16>, vector<16x128xf32> -> vector<16x128xf32>
    %c1_207 = arith.constant 1 : index
    %c0_208 = arith.constant 0 : index
    %c0_209 = arith.constant 0 : index
    %376 = vector.load %arg18[%c1_207, %c0_208, %c0_209] : memref<2x1x128xf32, #tpu.memory_space<vmem>>, vector<1x1x128xf32>
    %377 = vector.shape_cast %376 : vector<1x1x128xf32> to vector<1x128xf32>
    %378 = vector.broadcast %377 : vector<1x128xf32> to vector<16x128xf32>
    %379 = arith.addf %375, %378 : vector<16x128xf32>
    %cst_210 = arith.constant 5.000000e-01 : f32
    %380 = vector.broadcast %cst_210 : f32 to vector<16x128xf32>
    %381 = arith.mulf %380, %379 : vector<16x128xf32>
    %cst_211 = arith.constant 0.707106769 : f32
    %382 = vector.broadcast %cst_211 : f32 to vector<16x128xf32>
    %383 = arith.mulf %379, %382 : vector<16x128xf32>
    %384 = math.absf %383 : vector<16x128xf32>
    %cst_212 = arith.constant 0.327591091 : f32
    %385 = vector.broadcast %cst_212 : f32 to vector<16x128xf32>
    %386 = arith.mulf %385, %384 : vector<16x128xf32>
    %cst_213 = arith.constant 1.000000e+00 : f32
    %387 = vector.broadcast %cst_213 : f32 to vector<16x128xf32>
    %388 = arith.addf %387, %386 : vector<16x128xf32>
    %cst_214 = arith.constant 1.000000e+00 : f32
    %389 = vector.broadcast %cst_214 : f32 to vector<16x128xf32>
    %390 = arith.divf %389, %388 : vector<16x128xf32>
    %cst_215 = arith.constant 1.06140542 : f32
    %391 = vector.broadcast %cst_215 : f32 to vector<16x128xf32>
    %392 = arith.mulf %391, %390 : vector<16x128xf32>
    %cst_216 = arith.constant -1.45315206 : f32
    %393 = vector.broadcast %cst_216 : f32 to vector<16x128xf32>
    %394 = arith.addf %392, %393 : vector<16x128xf32>
    %395 = arith.mulf %394, %390 : vector<16x128xf32>
    %cst_217 = arith.constant 1.42141378 : f32
    %396 = vector.broadcast %cst_217 : f32 to vector<16x128xf32>
    %397 = arith.addf %395, %396 : vector<16x128xf32>
    %398 = arith.mulf %397, %390 : vector<16x128xf32>
    %cst_218 = arith.constant -0.284496725 : f32
    %399 = vector.broadcast %cst_218 : f32 to vector<16x128xf32>
    %400 = arith.addf %398, %399 : vector<16x128xf32>
    %401 = arith.mulf %400, %390 : vector<16x128xf32>
    %cst_219 = arith.constant 0.254829586 : f32
    %402 = vector.broadcast %cst_219 : f32 to vector<16x128xf32>
    %403 = arith.addf %401, %402 : vector<16x128xf32>
    %404 = arith.mulf %403, %390 : vector<16x128xf32>
    %cst_220 = arith.constant 0.000000e+00 : f32
    %405 = vector.broadcast %cst_220 : f32 to vector<16x128xf32>
    %406 = arith.subf %405, %384 : vector<16x128xf32>
    %407 = arith.mulf %406, %384 : vector<16x128xf32>
    %408 = math.exp %407 : vector<16x128xf32>
    %409 = arith.mulf %404, %408 : vector<16x128xf32>
    %cst_221 = arith.constant 1.000000e+00 : f32
    %410 = vector.broadcast %cst_221 : f32 to vector<16x128xf32>
    %411 = arith.subf %410, %409 : vector<16x128xf32>
    %cst_222 = arith.constant 0.000000e+00 : f32
    %412 = vector.broadcast %cst_222 : f32 to vector<16x128xf32>
    %413 = arith.cmpf oge, %383, %412 : vector<16x128xf32>
    %cst_223 = arith.constant 0.000000e+00 : f32
    %414 = vector.broadcast %cst_223 : f32 to vector<16x128xf32>
    %415 = arith.subf %414, %411 : vector<16x128xf32>
    %416 = arith.select %413, %411, %415 : vector<16x128xi1>, vector<16x128xf32>
    %cst_224 = arith.constant 1.000000e+00 : f32
    %417 = vector.broadcast %cst_224 : f32 to vector<16x128xf32>
    %418 = arith.addf %417, %416 : vector<16x128xf32>
    %419 = arith.mulf %381, %418 : vector<16x128xf32>
    %420 = arith.truncf %419 : vector<16x128xf32> to vector<16x128xbf16>
    %c1_225 = arith.constant 1 : index
    %c0_226 = arith.constant 0 : index
    %c0_227 = arith.constant 0 : index
    %421 = vector.load %arg19[%c1_225, %c0_226, %c0_227] : memref<2x128x64xbf16, #tpu.memory_space<vmem>>, vector<1x128x64xbf16>
    %422 = vector.shape_cast %421 : vector<1x128x64xbf16> to vector<128x64xbf16>
    %cst_228 = arith.constant dense<0.000000e+00> : vector<16x64xf32>
    %423 = tpu.matmul %420, %422, %cst_228 {dimension_numbers = #tpu.dot_dimension_numbers<[1], [0], [0], [1], [0, 0, 1, 1], [], []>} : vector<16x128xbf16>, vector<128x64xbf16>, vector<16x64xf32> -> vector<16x64xf32>
    %c1_229 = arith.constant 1 : index
    %c0_230 = arith.constant 0 : index
    %c0_231 = arith.constant 0 : index
    %424 = vector.load %arg20[%c1_229, %c0_230, %c0_231] : memref<2x1x64xf32, #tpu.memory_space<vmem>>, vector<1x1x64xf32>
    %425 = vector.shape_cast %424 : vector<1x1x64xf32> to vector<1x64xf32>
    %426 = vector.broadcast %425 : vector<1x64xf32> to vector<16x64xf32>
    %427 = arith.addf %423, %426 : vector<16x64xf32>
    %428 = arith.addf %371, %427 : vector<16x64xf32>
    %c1_232 = arith.constant 1 : index
    %c0_233 = arith.constant 0 : index
    %c0_234 = arith.constant 0 : index
    %429 = vector.load %arg21[%c1_232, %c0_233, %c0_234] : memref<2x1x64xf32, #tpu.memory_space<vmem>>, vector<1x1x64xf32>
    %430 = vector.shape_cast %429 : vector<1x1x64xf32> to vector<1x64xf32>
    %c1_235 = arith.constant 1 : index
    %c0_236 = arith.constant 0 : index
    %c0_237 = arith.constant 0 : index
    %431 = vector.load %arg22[%c1_235, %c0_236, %c0_237] : memref<2x1x64xf32, #tpu.memory_space<vmem>>, vector<1x1x64xf32>
    %432 = vector.shape_cast %431 : vector<1x1x64xf32> to vector<1x64xf32>
    %cst_238 = arith.constant dense<0.000000e+00> : vector<16xf32>
    %433 = vector.multi_reduction <add>, %428, %cst_238 [1] : vector<16x64xf32> to vector<16xf32>
    %434 = vector.shape_cast %433 : vector<16xf32> to vector<16x1xf32>
    %cst_239 = arith.constant 6.400000e+01 : f32
    %435 = vector.broadcast %cst_239 : f32 to vector<16x1xf32>
    %436 = arith.divf %434, %435 : vector<16x1xf32>
    %437 = vector.broadcast %436 : vector<16x1xf32> to vector<16x64xf32>
    %438 = arith.subf %428, %437 : vector<16x64xf32>
    %439 = arith.mulf %438, %438 : vector<16x64xf32>
    %cst_240 = arith.constant dense<0.000000e+00> : vector<16xf32>
    %440 = vector.multi_reduction <add>, %439, %cst_240 [1] : vector<16x64xf32> to vector<16xf32>
    %441 = vector.shape_cast %440 : vector<16xf32> to vector<16x1xf32>
    %cst_241 = arith.constant 6.400000e+01 : f32
    %442 = vector.broadcast %cst_241 : f32 to vector<16x1xf32>
    %443 = arith.divf %441, %442 : vector<16x1xf32>
    %cst_242 = arith.constant 9.99999996E-13 : f32
    %444 = vector.broadcast %cst_242 : f32 to vector<16x1xf32>
    %445 = arith.addf %443, %444 : vector<16x1xf32>
    %446 = math.rsqrt %445 : vector<16x1xf32>
    %447 = vector.broadcast %446 : vector<16x1xf32> to vector<16x64xf32>
    %448 = arith.mulf %438, %447 : vector<16x64xf32>
    %449 = vector.broadcast %430 : vector<1x64xf32> to vector<16x64xf32>
    %450 = arith.mulf %448, %449 : vector<16x64xf32>
    %451 = vector.broadcast %432 : vector<1x64xf32> to vector<16x64xf32>
    %452 = arith.addf %450, %451 : vector<16x64xf32>
    %453 = vector.shape_cast %452 : vector<16x64xf32> to vector<2x8x64xf32>
    %454 = vector.extract_strided_slice %453 {offsets = [0, 0, 0], sizes = [2, 1, 64], strides = [1, 1, 1]} : vector<2x8x64xf32> to vector<2x1x64xf32>
    %455 = vector.shape_cast %454 : vector<2x1x64xf32> to vector<2x64xf32>
    %456 = arith.truncf %455 : vector<2x64xf32> to vector<2x64xbf16>
    %c0_243 = arith.constant 0 : index
    %c0_244 = arith.constant 0 : index
    %457 = vector.load %arg23[%c0_243, %c0_244] : memref<64x64xbf16, #tpu.memory_space<vmem>>, vector<64x64xbf16>
    %cst_245 = arith.constant dense<0.000000e+00> : vector<2x64xf32>
    %458 = tpu.matmul %456, %457, %cst_245 {dimension_numbers = #tpu.dot_dimension_numbers<[1], [0], [0], [1], [0, 0, 1, 1], [], []>} : vector<2x64xbf16>, vector<64x64xbf16>, vector<2x64xf32> -> vector<2x64xf32>
    %c0_246 = arith.constant 0 : index
    %c0_247 = arith.constant 0 : index
    %459 = vector.load %arg24[%c0_246, %c0_247] : memref<1x64xf32, #tpu.memory_space<vmem>>, vector<1x64xf32>
    %460 = vector.broadcast %459 : vector<1x64xf32> to vector<2x64xf32>
    %461 = arith.addf %458, %460 : vector<2x64xf32>
    %462 = math.tanh %461 : vector<2x64xf32>
    %463 = arith.truncf %462 : vector<2x64xf32> to vector<2x64xbf16>
    %c0_248 = arith.constant 0 : index
    %c0_249 = arith.constant 0 : index
    %464 = vector.load %arg25[%c0_248, %c0_249] : memref<64x4xbf16, #tpu.memory_space<vmem>>, vector<64x4xbf16>
    %cst_250 = arith.constant dense<0.000000e+00> : vector<2x4xf32>
    %465 = tpu.matmul %463, %464, %cst_250 {dimension_numbers = #tpu.dot_dimension_numbers<[1], [0], [0], [1], [0, 0, 1, 1], [], []>} : vector<2x64xbf16>, vector<64x4xbf16>, vector<2x4xf32> -> vector<2x4xf32>
    %c0_251 = arith.constant 0 : index
    %c0_252 = arith.constant 0 : index
    %466 = vector.load %arg26[%c0_251, %c0_252] : memref<1x4xf32, #tpu.memory_space<vmem>>, vector<1x4xf32>
    %467 = vector.broadcast %466 : vector<1x4xf32> to vector<2x4xf32>
    %468 = arith.addf %465, %467 : vector<2x4xf32>
    %c0_253 = arith.constant 0 : index
    %c0_254 = arith.constant 0 : index
    %469 = vector.load %arg1[%c0_253, %c0_254] : memref<2x1xi32, #tpu.memory_space<vmem>>, vector<2x1xi32>
    %470 = tpu.iota {dimensions = array<i32: 1>} : vector<2x4xi32>
    %471 = vector.broadcast %469 : vector<2x1xi32> to vector<2x4xi32>
    %472 = arith.cmpi eq, %470, %471 : vector<2x4xi32>
    %473 = arith.extui %472 : vector<2x4xi1> to vector<2x4xi32>
    %474 = arith.sitofp %473 : vector<2x4xi32> to vector<2x4xf32>
    %cst_255 = arith.constant dense<0xFF800000> : vector<2xf32>
    %475 = vector.multi_reduction <maximumf>, %468, %cst_255 [1] : vector<2x4xf32> to vector<2xf32>
    %476 = vector.shape_cast %475 : vector<2xf32> to vector<2x1xf32>
    %477 = vector.broadcast %476 : vector<2x1xf32> to vector<2x4xf32>
    %478 = arith.subf %468, %477 : vector<2x4xf32>
    %479 = math.exp %478 : vector<2x4xf32>
    %cst_256 = arith.constant dense<0.000000e+00> : vector<2xf32>
    %480 = vector.multi_reduction <add>, %479, %cst_256 [1] : vector<2x4xf32> to vector<2xf32>
    %481 = vector.shape_cast %480 : vector<2xf32> to vector<2x1xf32>
    %482 = math.log %481 : vector<2x1xf32>
    %483 = arith.addf %482, %476 : vector<2x1xf32>
    %484 = vector.broadcast %483 : vector<2x1xf32> to vector<2x4xf32>
    %485 = arith.subf %468, %484 : vector<2x4xf32>
    %486 = arith.mulf %474, %485 : vector<2x4xf32>
    %cst_257 = arith.constant dense<0.000000e+00> : vector<2xf32>
    %487 = vector.multi_reduction <add>, %486, %cst_257 [1] : vector<2x4xf32> to vector<2xf32>
    %488 = vector.shape_cast %487 : vector<2xf32> to vector<2x1xf32>
    %cst_258 = arith.constant 0.000000e+00 : f32
    %489 = vector.broadcast %cst_258 : f32 to vector<2x1xf32>
    %490 = arith.subf %489, %488 : vector<2x1xf32>
    %cst_259 = arith.constant dense<0.000000e+00> : vector<1xf32>
    %491 = vector.multi_reduction <add>, %490, %cst_259 [0] : vector<2x1xf32> to vector<1xf32>
    %492 = vector.shape_cast %491 : vector<1xf32> to vector<1x1xf32>
    %cst_260 = arith.constant 5.000000e-01 : f32
    %493 = vector.broadcast %cst_260 : f32 to vector<1x1xf32>
    %494 = arith.mulf %492, %493 : vector<1x1xf32>
    %c0_261 = arith.constant 0 : index
    %c0_262 = arith.constant 0 : index
    %495 = vector.load %arg27[%c0_261, %c0_262] : memref<1x1xf32, #tpu.memory_space<vmem>>, vector<1x1xf32>
    tpu.vector_store %arg27[%c0_261, %c0_262], %494 {strides = array<i32>} : memref<1x1xf32, #tpu.memory_space<vmem>>, vector<1x1xf32>,
    %496 = vector.broadcast %476 : vector<2x1xf32> to vector<2x4xf32>
    %497 = arith.cmpf oge, %468, %496 : vector<2x4xf32>
    %c4_i32 = arith.constant 4 : i32
    %498 = vector.broadcast %c4_i32 : i32 to vector<2x4xi32>
    %499 = arith.select %497, %470, %498 : vector<2x4xi1>, vector<2x4xi32>
    %cst_263 = arith.constant dense<2147483647> : vector<2xi32>
    %500 = vector.multi_reduction <minsi>, %499, %cst_263 [1] : vector<2x4xi32> to vector<2xi32>
    %501 = vector.shape_cast %500 : vector<2xi32> to vector<2x1xi32>
    %c0_264 = arith.constant 0 : index
    %c0_265 = arith.constant 0 : index
    %502 = vector.load %arg28[%c0_264, %c0_265] : memref<2x1xi32, #tpu.memory_space<vmem>>, vector<2x1xi32>
    tpu.vector_store %arg28[%c0_264, %c0_265], %501 {strides = array<i32>} : memref<2x1xi32, #tpu.memory_space<vmem>>, vector<2x1xi32>,
    return
  }
}

</mosaic_0001>

<bundles_post_ra>
// kernel: forward.1
= control target key start
LH: loop header
LB: loop body
LE: loop exit
PB: predicated region body
PF: predicated region fallthrough
CT: control target
= control target key end

     0   :  { %s5303_s0 = inlined_call_operand.vmem [shape: s32[16,1], index: 0, kind: input, shape index: {}]   ;;  %s5304_s1 = inlined_call_operand.vmem [shape: s32[2,1], index: 1, kind: input, shape index: {}]   ;;  %s5305_s2 = inlined_call_operand.vmem [shape: f32[100,64], index: 2, kind: input, shape index: {}]   ;;  %s5306_s3 = inlined_call_operand.vmem [shape: f32[32,64], index: 3, kind: input, shape index: {}]   ;;  %s5307_s4 = inlined_call_operand.vmem [shape: f32[2,64], index: 4, kind: input, shape index: {}]   ;;  %s5308_s5 = inlined_call_operand.vmem [shape: f32[1,64], index: 5, kind: input, shape index: {}]   ;;  %s5309_s6 = inlined_call_operand.vmem [shape: f32[1,64], index: 6, kind: input, shape index: {}]   ;;  %s5310_s7 = inlined_call_operand.vmem [shape: bf16[4,64,32], index: 7, kind: input, shape index: {}]   ;;  %s5311_s8 = inlined_call_operand.vmem [shape: bf16[4,64,32], index: 8, kind: input, shape index: {}]   ;;  %s5312_s9 = inlined_call_operand.vmem [shape: bf16[4,64,32], index: 9, kind: input, shape index: {}]   ;;  %s5313_s10 = inlined_call_operand.vmem [shape: f32[4,1,32], index: 10, kind: input, shape index: {}]   ;;  %s5314_s11 = inlined_call_operand.vmem [shape: f32[4,1,32], index: 11, kind: input, shape index: {}]   ;;  %s5315_s12 = inlined_call_operand.vmem [shape: f32[4,1,32], index: 12, kind: input, shape index: {}]   ;;  %s5316_s13 = inlined_call_operand.vmem [shape: bf16[4,32,64], index: 13, kind: input, shape index: {}]   ;;  %s5317_s14 = inlined_call_operand.vmem [shape: f32[2,1,64], index: 14, kind: input, shape index: {}]   ;;  %s5318_s15 = inlined_call_operand.vmem [shape: f32[2,1,64], index: 15, kind: input, shape index: {}]   ;;  %s5319_s16 = inlined_call_operand.vmem [shape: f32[2,1,64], index: 16, kind: input, shape index: {}]   ;;  %s5320_s17 = inlined_call_operand.vmem [shape: bf16[2,64,128], index: 17, kind: input, shape index: {}]   ;;  %s5321_s18 = inlined_call_operand.vmem [shape: f32[2,1,128], index: 18, kind: input, shape index: {}]   ;;  %s5322_s19 = inlined_call_operand.vmem [shape: bf16[2,128,64], index: 19, kind: input, shape index: {}]   ;;  %s5323_s20 = inlined_call_operand.vmem [shape: f32[2,1,64], index: 20, kind: input, shape index: {}]   ;;  %s5324_s21 = inlined_call_operand.vmem [shape: f32[2,1,64], index: 21, kind: input, shape index: {}]   ;;  %s5325_s22 = inlined_call_operand.vmem [shape: f32[2,1,64], index: 22, kind: input, shape index: {}]   ;;  %s5326_s23 = inlined_call_operand.vmem [shape: bf16[64,64], index: 23, kind: input, shape index: {}]   ;;  %s5327_s24 = inlined_call_operand.vmem [shape: f32[1,64], index: 24, kind: input, shape index: {}]   ;;  %s5328_s25 = inlined_call_operand.vmem [shape: bf16[64,4], index: 25, kind: input, shape index: {}]   ;;  %s5329_s26 = inlined_call_operand.vmem [shape: f32[1,4], index: 26, kind: input, shape index: {}]   ;;  %s5330_s27 = inlined_call_operand.hbm [shape: f32[1,1], index: 27, kind: output, shape index: {0}]   ;;  %s5331_s28 = inlined_call_operand.vmem [shape: s32[2,1], index: 28, kind: output, shape index: {1}]  }
   0x1   :  { %5341 = sst [smem:[#allocation5_spill]] %s5303_s0 }
   0x2   :  { %5342 = sst [smem:[#allocation6_spill]] %s5304_s1 }
   0x3   :  { %5343 = sst [smem:[#allocation7_spill]] %s5305_s2 }
   0x4   :  { %5344 = sst [smem:[#allocation8_spill]] %s5306_s3 }
   0x5   :  { %5345 = sst [smem:[#allocation9_spill]] %s5307_s4 }
   0x6   :  { %5346 = sst [smem:[#allocation10_spill]] %s5308_s5 }
   0x7   :  { %5347 = sst [smem:[#allocation11_spill]] %s5309_s6 }
   0x8   :  { %5348 = sst [smem:[#allocation12_spill]] %s5310_s7 }
   0x9   :  { %5349 = sst [smem:[#allocation13_spill]] %s5311_s8 }
   0xa   :  { %5350 = sst [smem:[#allocation14_spill]] %s5312_s9 }
   0xb   :  { %5351 = sst [smem:[#allocation15_spill]] %s5313_s10 }
   0xc   :  { %5352 = sst [smem:[#allocation16_spill]] %s5314_s11 }
   0xd   :  { %5353 = sst [smem:[#allocation17_spill]] %s5315_s12 }
   0xe   :  { %5354 = sst [smem:[#allocation18_spill]] %s5326_s23 }
   0xf   :  { %s5355_s9 = sld [smem:[#allocation5_spill]]  ;;  %s5356_s23 = sld [smem:[#allocation7_spill]]  ;;  %v4368_v2 = vmov 0   ;;  %v4369_v11 = vmov 0.0   ;;  %vm126_vm0 = vcmask 1043456  }
  0x10   :  { %4180 = vset.pattern.permute.xlu0 %v4368_v2  ;;  %4181 = vset.pattern.permute.xlu1 %v4368_v2 }
  0x11   :  { %3792 = vmatprep.subr.bf16.mxu1 %v4369_v11 }
  0x15   :  { %v90_v0 = vld [vmem:[%s5355_s9] sm:$0xff]  ;;  %v107_v3 = vld [vmem:[%s5356_s23 + $0x8] sm:$0xff]  ;;  %v108_v4 = vld [vmem:[%s5356_s23 + $0x10] sm:$0xff] }
  0x16   :  { %v106_v1 = vld [vmem:[%s5356_s23] sm:$0xff]  ;;  %v109_v5 = vld [vmem:[%s5356_s23 + $0x18] sm:$0xff]  ;;  %95 = vperm.xlu0 %4180, %v90_v0   ;;  %v91_v8 = vld [vmem:[%s5355_s9 + $0x8] sm:$0xff] }
  0x17   :  { %v4152_v6 = vpack.c.bf16 %v107_v3, %v106_v1  ;;  %v4156_v7 = vpack.c.bf16 %v109_v5, %v108_v4  ;;  %v110_v9 = vld [vmem:[%s5356_s23 + $0x20] sm:$0xff]  ;;  %v111_v10 = vld [vmem:[%s5356_s23 + $0x28] sm:$0xff]  ;;  %v112_v12 = vld [vmem:[%s5356_s23 + $0x30] sm:$0xff] }
  0x18   :  { %v113_v13 = vld [vmem:[%s5356_s23 + $0x38] sm:$0xff]  ;;  %v4160_v14 = vpack.c.bf16 %v111_v10, %v110_v9  ;;  %v114_v15 = vld [vmem:[%s5356_s23 + $0x40] sm:$0xff]  ;;  %v115_v16 = vld [vmem:[%s5356_s23 + $0x48] sm:$0xff] }
  0x19   :  { %4153 = vmatprep.subr.bf16.mxu0 %v4152_v6  ;;  %v4164_v17 = vpack.c.bf16 %v113_v13, %v112_v12  ;;  %v116_v18 = vld [vmem:[%s5356_s23 + $0x50] sm:$0xff]  ;;  %v117_v19 = vld [vmem:[%s5356_s23 + $0x58] sm:$0xff]  ;;  %v4168_v20 = vpack.c.bf16 %v115_v16, %v114_v15  ;;  %v118_v22 = vld [vmem:[%s5356_s23 + $0x60] sm:$0xf] }
  0x1a   :  { %4155 = vmatpush3.bf16.msra.mxu0 %v4152_v6  ;;  %98 = vperm.xlu0 %4180, %v91_v8   ;;  %v4172_v21 = vpack.c.bf16 %v117_v19, %v116_v18 }
  0x1b   :  { %4157 = vmatprep.subr.bf16.mxu0 %v4156_v7 }
  0x1e   :  { %4159 = vmatpush3.bf16.msra.mxu0 %v4156_v7 }
  0x1f   :  { %4161 = vmatprep.subr.bf16.mxu0 %v4160_v14 }
  0x22   :  { %4163 = vmatpush3.bf16.msra.mxu0 %v4160_v14 }
  0x23   :  { %4165 = vmatprep.subr.bf16.mxu0 %v4164_v17 }
  0x26   :  { %4167 = vmatpush3.bf16.msra.mxu0 %v4164_v17 }
  0x27   :  { %4169 = vmatprep.subr.bf16.mxu0 %v4168_v20 }
  0x2a   :  { %4171 = vmatpush3.bf16.msra.mxu0 %v4168_v20 }
  0x2b   :  { %4173 = vmatprep.subr.bf16.mxu0 %v4172_v21 }
  0x2e   :  { %4175 = vmatpush3.bf16.msra.mxu0 %v4172_v21 }
  0x2f   :  { %3787 = vmatprep.subr.msk.mxu0 %vm126_vm0, %v118_v22 }
  0x32   :  { %3788 = vmatpush3.msk.msra.mxu0 %vm126_vm0, %v118_v22 }
  0x33   :  { %3816 = vmatprep.subr.bf16.mxu0 %v4369_v11 }
  0x34   :  { %34 = vsyncpa [#allocation3], 0  ;;  %v92_v23 = vlaneseq  ;;  %vm119_vm1 = vcmask 818176   ;;  %s5357_s30 = sld [smem:[#allocation9_spill]]  ;;  %s5358_s10 = sld [smem:[#allocation8_spill]]  ;;  %vm216_vm4 = vcmask 523264  }
  0x35   :  { %s5359_s11 = sld [smem:[#allocation12_spill]]  ;;  %s5360_s7 = sld [smem:[#allocation14_spill]]  ;;  %vm4370_vm5 = vmmov 0   ;;  %vm510_vm6 = vcmask 261120   ;;  %vm605_vm7 = vcmask 64512   ;;  %vm3094_vm12 = vcmask 1041409  }
  0x36   :  { %v4566_v24 = vand.u32 127, %v92_v23  ;;  %v208_v29 = vshrl.u32 %v92_v23, 7  ;;  %3800 = vmatprep.mubr.msk.bf16.mxu1 %vm4370_vm5, %v4369_v11  ;;  %s5361_s12 = sld [smem:[#allocation10_spill]]  ;;  %s5362_s8 = sld [smem:[#allocation11_spill]]  ;;  %vm3255_vm13 = vcmask 25600  }
  0x37   :  { %s5364_s23 = sld [smem:[#allocation17_spill]]  ;;  %s5365_s6 = sld [smem:[#allocation16_spill]] }
  0x38   :  { %v209_v30 = vsub.s32 0, %v208_v29  ;;  %s5366_s0 = sld [smem:[#allocation15_spill]] }
  0x3a   :  { %v206_v31 = vld [vmem:[%s5357_s30] sm:$0x3]  ;;  %s5363_s30 = sld [smem:[#allocation13_spill]] }
  0x3b   :  { %v210_v32 = vrot.slane %v206_v31, %v209_v30  ;;  %v205_v33 = vld [vmem:[%s5358_s10] sm:$0xff]  ;;  %v4184_v53 = vld [vmem:[%s5359_s11 + $0x8] sm:$0xff]   ;;  %v4186_v55 = vld [vmem:[%s5359_s11 + $0x10] sm:$0xff]  }
  0x3c   :  { %v4182_v51 = vld [vmem:[%s5359_s11] sm:$0xff]   ;;  %v4185_v54 = vld [vmem:[%s5360_s7 + $0x8] sm:$0xff]   ;;  %v4187_v56 = vld [vmem:[%s5360_s7 + $0x10] sm:$0xff]  }
  0x3d   :  { %v211_v34 = vadd.f32 %v210_v32, %v205_v33  ;;  %v4183_v52 = vld [vmem:[%s5360_s7] sm:$0xff]   ;;  %3793 = vmatpush3.bf16.msra.mxu1 %v4182_v51  ;;  %v4188_v57 = vld [vmem:[%s5359_s11 + $0x18] sm:$0xff]   ;;  %v4193_v16 = vld [vmem:[%s5359_s11 + $0x28] sm:$0xff]  }
  0x3e   :  { %3794 = vmatprep.subr.bf16.mxu1 %v4369_v11  ;;  %v4189_v58 = vld [vmem:[%s5360_s7 + $0x18] sm:$0xff]   ;;  %v3327_v3 = vld [vmem:[%s5361_s12] ss:$0 sm:$0xff]  ;;  %v4195_v18 = vld [vmem:[%s5359_s11 + $0x30] sm:$0xff]  }
  0x3f   :  { %v3328_v7 = vld [vmem:[%s5362_s8] ss:$0 sm:$0xff]  ;;  %v4197_v20 = vld [vmem:[%s5359_s11 + $0x38] sm:$0xff]   ;;  %v4199_v22 = vld [vmem:[%s5360_s7 + $0x28] sm:$0xff]  }
  0x40   :  { %v4190_v12 = vld [vmem:[%s5363_s30] sm:$0xff]   ;;  %v4192_v15 = vld [vmem:[%s5363_s30 + $0x8] sm:$0xff]   ;;  %v4194_v17 = vld [vmem:[%s5363_s30 + $0x10] sm:$0xff]  }
  0x41   :  { %3795 = vmatpush3.bf16.msra.mxu1 %v4184_v53  ;;  %v4191_v13 = vld [vmem:[%s5359_s11 + $0x20] sm:$0xff]   ;;  %v4196_v19 = vld [vmem:[%s5363_s30 + $0x18] sm:$0xff]   ;;  %v4200_v23 = vld [vmem:[%s5360_s7 + $0x30] sm:$0xff]  }
  0x42   :  { %3796 = vmatprep.subr.bf16.mxu1 %v4369_v11  ;;  %v4198_v21 = vld [vmem:[%s5360_s7 + $0x20] sm:$0xff]  }
  0x43   :  { %v3341_v30 = vld [vmem:[%s5364_s23] ss:$0 sm:$0xff] }
  0x45   :  { %3797 = vmatpush3.bf16.msra.mxu1 %v4186_v55  ;;  %v3390_v55 = vld [vmem:[%s5364_s23 + $0x1] ss:$0 sm:$0xff] }
  0x46   :  { %3798 = vmatprep.subr.bf16.mxu1 %v4369_v11 }
  0x49   :  { %3799 = vmatpush3.bf16.msra.mxu1 %v4188_v57 }
  0x4a   :  { %3804 = vmatprep.subr.bf16.mxu1 %v4369_v11 }
  0x95   :  { %v96_v25 = vpop.permute.xlu0 %95 }
  0x96   :  { %vm100_vm2 = vcmp.eq.s32.totalorder %v4566_v24, %v96_v25  ;;  %v4201_v25 = vld [vmem:[%s5360_s7 + $0x38] sm:$0xff]  }
  0x97   :  { %v3322_v26 = vsel %vm100_vm2, 1.0, %v4369_v11  ;;  %vm3302_vm2 = vcmask 1024  }
  0x98   :  { %3789 = vmatprep.mubr.msk.f32.mxu0 %vm119_vm1, %v3322_v26 }
  0x99   :  { %v99_v27 = vpop.permute.xlu0 %98 }
  0x9a   :  { %vm101_vm3 = vcmp.eq.s32.totalorder %v4566_v24, %v99_v27 }
  0x9b   :  { %v3323_v28 = vsel %vm101_vm3, 1.0, %v4369_v11  ;;  %vm3283_vm3 = vcmask 0  }
  0x9c   :  { %3790 = vmatmul.mubr.msk.f32.vlgmr.msra.gmra.mrb[0].mxu0 %vm119_vm1, %v3323_v28  ;;  %vm3274_vm1 = vcmask 1041408  }
  0x9d   :  { %3817 = vmatpush3.bf16.msra.mxu0 %v4183_v52  ;;  %3824 = vmatprep.mubr.msk.bf16.mxu0 %vm4370_vm5, %v4369_v11 }
  0x9e   :  { %3818 = vmatprep.subr.bf16.mxu0 %v4369_v11 }
  0xa1   :  { %3819 = vmatpush3.bf16.msra.mxu0 %v4185_v54 }
  0xa2   :  { %3820 = vmatprep.subr.bf16.mxu0 %v4369_v11 }
  0xa5   :  { %3821 = vmatpush3.bf16.msra.mxu0 %v4187_v56 }
  0xa6   :  { %3822 = vmatprep.subr.bf16.mxu0 %v4369_v11 }
  0xa9   :  { %3823 = vmatpush3.bf16.msra.mxu0 %v4189_v58 }
  0xaa   :  { %3852 = vmatprep.subr.bf16.mxu0 %v4369_v11 }
 0x16f   :  { %v3791_v35 = vpop.f32.mrb[0].mxu0 }
 0x170   :  { %v196_v36 = vpop.f32.mrb[1].mxu0  ;;  %v213_v38 = vadd.f32 %v3791_v35, %v211_v34 }
 0x171   :  { %v212_v37 = vadd.f32 %v211_v34, %v196_v36  ;;  %v3335_v36 = vld [vmem:[%s5365_s6] ss:$0 sm:$0xff] }
 0x172   :  { %v220_v40 = vsel %vm216_vm4, %v213_v38, 0.0 }
 0x173   :  { %v217_v39 = vsel %vm216_vm4, %v212_v37, 0.0 }
 0x174   :  { %218 = vadd.xlane.f32.xlu1 %v217_v39 }
 0x178   :  { %221 = vadd.xlane.f32.xlu1 %v220_v40 }
 0x201   :  { %v219_v41 = vpop.xlane.xlu1 %218 }
 0x202   :  { %v224_v42 = vmul.f32 0.015625, %v219_v41 }
 0x204   :  { %v226_v43 = vsub.f32 %v212_v37, %v224_v42 }
 0x205   :  { %v222_v44 = vpop.xlane.xlu1 %221 }
 0x206   :  { %v225_v45 = vmul.f32 0.015625, %v222_v44  ;;  %v228_v46 = vmul.f32 %v226_v43, %v226_v43 }
 0x208   :  { %v227_v47 = vsub.f32 %v213_v38, %v225_v45  ;;  %v230_v48 = vsel %vm216_vm4, %v228_v46, 0.0 }
 0x209   :  { %231 = vadd.xlane.f32.xlu0 %v230_v48 }
 0x20a   :  { %v229_v49 = vmul.f32 %v227_v47, %v227_v47 }
 0x20c   :  { %v233_v50 = vsel %vm216_vm4, %v229_v49, 0.0 }
 0x20d   :  { %234 = vadd.xlane.f32.xlu1 %v233_v50 }
 0x296   :  { %v232_v59 = vpop.xlane.xlu0 %231 }
 0x297   :  { %v236_v60 = vmul.f32 0.015625, %v232_v59 }
 0x299   :  { %v238_v61 = vadd.f32 1e-12, %v236_v60 }
 0x29a   :  { %v235_v62 = vpop.xlane.xlu1 %234 }
 0x29b   :  { %4270 = vrsqrt.f32 %v238_v61  ;;  %v237_v63 = vmul.f32 0.015625, %v235_v62 }
 0x29d   :  { %v239_v0 = vadd.f32 1e-12, %v237_v63 }
 0x29f   :  { %4272 = vrsqrt.f32 %v239_v0 }
 0x2a5   :  { %v4271_v1 = vpop.eup %4270 }
 0x2a6   :  { %v242_v2 = vmul.f32 %v4271_v1, %v226_v43 }
 0x2a8   :  { %v250_v5 = vmul.f32 %v3327_v3, %v242_v2 }
 0x2a9   :  { %v4273_v4 = vpop.eup %4272 }
 0x2aa   :  { %v243_v6 = vmul.f32 %v4273_v4, %v227_v47  ;;  %v4624_v9 = vadd.f32 %v3328_v7, %v250_v5  ;;  %v3329_v47 = vld [vmem:[%s5366_s0] ss:$0 sm:$0xff] }
 0x2ac   :  { %v251_v8 = vmul.f32 %v3327_v3, %v243_v6 }
 0x2ae   :  { %v4626_v10 = vadd.f32 %v3328_v7, %v251_v8 }
 0x2b0   :  { %v4636_v14 = vpack.c.bf16 %v4626_v10, %v4624_v9 }
 0x2b2   :  { %3801 = vmatmul.mubr.msk.bf16.vlgmr.msra.gmra.mrb[0].mxu1 %vm216_vm4, %v4636_v14  ;;  %3825 = vmatmul.mubr.msk.bf16.vlgmr.msra.gmra.mrb[4].mxu0 %vm216_vm4, %v4636_v14 }
 0x2b3   :  { %3805 = vmatpush3.bf16.msra.mxu1 %v4190_v12  ;;  %3853 = vmatpush3.bf16.msra.mxu0 %v4191_v13 }
 0x2b4   :  { %3806 = vmatprep.subr.bf16.mxu1 %v4369_v11  ;;  %3854 = vmatprep.subr.bf16.mxu0 %v4369_v11 }
 0x2b5   :  { %3812 = vmatprep.mubr.msk.bf16.mxu1 %vm4370_vm5, %v4369_v11  ;;  %3860 = vmatprep.mubr.msk.bf16.mxu0 %vm4370_vm5, %v4369_v11 }
 0x2b7   :  { %3807 = vmatpush3.bf16.msra.mxu1 %v4192_v15  ;;  %3855 = vmatpush3.bf16.msra.mxu0 %v4193_v16 }
 0x2b8   :  { %3808 = vmatprep.subr.bf16.mxu1 %v4369_v11  ;;  %3856 = vmatprep.subr.bf16.mxu0 %v4369_v11 }
 0x2bb   :  { %3809 = vmatpush3.bf16.msra.mxu1 %v4194_v17  ;;  %3857 = vmatpush3.bf16.msra.mxu0 %v4195_v18 }
 0x2bc   :  { %3810 = vmatprep.subr.bf16.mxu1 %v4369_v11  ;;  %3858 = vmatprep.subr.bf16.mxu0 %v4369_v11 }
 0x2bf   :  { %3811 = vmatpush3.bf16.msra.mxu1 %v4196_v19  ;;  %3859 = vmatpush3.bf16.msra.mxu0 %v4197_v20 }
 0x2c0   :  { %3876 = vmatprep.subr.bf16.mxu0 %v4369_v11  ;;  %3828 = vmatprep.subr.bf16.mxu1 %v4369_v11 }
 0x2c2   :  { %3813 = vmatmul.mubr.msk.bf16.vlgmr.msra.gmra.mrb[4].mxu1 %vm216_vm4, %v4636_v14  ;;  %3861 = vmatmul.mubr.msk.bf16.vlgmr.msra.gmra.mrb[8].mxu0 %vm216_vm4, %v4636_v14 }
 0x2c3   :  { %3877 = vmatpush3.bf16.msra.mxu0 %v4198_v21  ;;  %3884 = vmatprep.mubr.msk.bf16.mxu0 %vm4370_vm5, %v4369_v11 }
 0x2c4   :  { %3878 = vmatprep.subr.bf16.mxu0 %v4369_v11  ;;  %3830 = vmatprep.mubr.msk.bf16.mxu1 %vm4370_vm5, %v4369_v11 }
 0x2c7   :  { %3879 = vmatpush3.bf16.msra.mxu0 %v4199_v22 }
 0x2c8   :  { %3880 = vmatprep.subr.bf16.mxu0 %v4369_v11 }
 0x2cb   :  { %3881 = vmatpush3.bf16.msra.mxu0 %v4200_v23 }
 0x2cc   :  { %3882 = vmatprep.subr.bf16.mxu0 %v4369_v11 }
 0x2cf   :  { %3883 = vmatpush3.bf16.msra.mxu0 %v4201_v25 }
 0x2d0   :  { %3900 = vmatprep.subr.bf16.mxu0 %v4369_v11 }
 0x2d2   :  { %3885 = vmatmul.mubr.msk.bf16.vlgmr.msra.gmra.mrb[12].mxu0 %vm216_vm4, %v4636_v14 }
 0x2d3   :  { %3902 = vmatprep.mubr.msk.bf16.mxu0 %vm4370_vm5, %v4369_v11 }
 0x385   :  { %v337_v26 = vpop.f32.mrb[0].mxu1  ;;  %v497_v27 = vpop.f32.mrb[4].mxu0 }
 0x386   :  { %v3802_v28 = vpop.f32.mrb[1].mxu1  ;;  %v3826_v29 = vpop.f32.mrb[5].mxu0  ;;  %v338_v50 = vadd.f32 %v3329_v47, %v337_v26  ;;  %v498_v53 = vadd.f32 %v3341_v30, %v497_v27 }
 0x387   :  { %v340_v31 = vpop.f32.mrb[2].mxu1  ;;  %v500_v32 = vpop.f32.mrb[6].mxu0 }
 0x388   :  { %v4703_v33 = vadd.f32 %v3341_v30, %v500_v32  ;;  %v3803_v34 = vpop.f32.mrb[3].mxu1  ;;  %v3827_v35 = vpop.f32.mrb[7].mxu0  ;;  %v504_v52 = vpack.c.bf16 %v338_v50, %v338_v50  ;;  %v341_v56 = vadd.f32 %v3329_v47, %v340_v31  ;;  %v508_v58 = vpack.c.bf16 %v498_v53, %v498_v53 }
 0x38a   :  { %v505_v62 = vpack.c.bf16 %v341_v56, %v341_v56  ;;  %v634_v2 = vsel %vm126_vm0, %v508_v58, 0  ;;  %v509_v35 = vpack.c.bf16 %v4703_v33, %v4703_v33  ;;  %v4203_v33 = vld [vmem:[%s5363_s30 + $0x28] sm:$0xff]  }
 0x395   :  { %v417_v37 = vpop.f32.mrb[4].mxu1  ;;  %v4708_v38 = vpop.f32.mrb[8].mxu0 }
 0x396   :  { %v418_v39 = vadd.f32 %v3335_v36, %v417_v37  ;;  %v3814_v40 = vpop.f32.mrb[5].mxu1  ;;  %v3862_v41 = vpop.f32.mrb[9].mxu0 }
 0x397   :  { %v420_v42 = vpop.f32.mrb[6].mxu1  ;;  %v4710_v43 = vpop.f32.mrb[10].mxu0 }
 0x398   :  { %v506_v44 = vpack.c.bf16 %v418_v39, %v418_v39  ;;  %v3815_v45 = vpop.f32.mrb[7].mxu1  ;;  %v3863_v46 = vpop.f32.mrb[11].mxu0  ;;  %v421_v49 = vadd.f32 %v3335_v36, %v420_v42  ;;  %v680_v39 = vsel %vm126_vm0, %v509_v35, 0  ;;  %v4202_v42 = vld [vmem:[%s5363_s30 + $0x20] sm:$0xff]  }
 0x399   :  { %v4204_v45 = vld [vmem:[%s5363_s30 + $0x30] sm:$0xff]   ;;  %v4205_v46 = vld [vmem:[%s5363_s30 + $0x38] sm:$0xff]  }
 0x39a   :  { %v515_v48 = vsel %vm510_vm6, %v506_v44, 0  ;;  %v507_v51 = vpack.c.bf16 %v421_v49, %v421_v49 }
 0x39b   :  { %3829 = vmatpush3.bf16.xpose.msra.mxu1 %v515_v48 }
 0x39c   :  { %3834 = vmatprep.subr.bf16.mxu1 %v4369_v11  ;;  %v561_v54 = vsel %vm510_vm6, %v507_v51, 0 }
 0x3a2   :  { %3831 = vmatmul.mubr.msk.bf16.vlgmr.msra.gmra.mrb[8].mxu1 %vm510_vm6, %v504_v52 }
 0x3a3   :  { %3835 = vmatpush3.bf16.xpose.msra.mxu1 %v561_v54  ;;  %3836 = vmatprep.mubr.msk.bf16.mxu1 %vm4370_vm5, %v4369_v11 }
 0x3a4   :  { %3840 = vmatprep.subr.bf16.mxu1 %v4369_v11 }
 0x3a5   :  { %v966_v57 = vpop.f32.mrb[12].mxu0 }
 0x3a6   :  { %v967_v59 = vadd.f32 %v3390_v55, %v966_v57  ;;  %v3886_v60 = vpop.f32.mrb[13].mxu0 }
 0x3a7   :  { %v969_v61 = vpop.f32.mrb[14].mxu0 }
 0x3a8   :  { %v977_v63 = vpack.c.bf16 %v967_v59, %v967_v59  ;;  %v4725_v0 = vadd.f32 %v3390_v55, %v969_v61  ;;  %v3887_v1 = vpop.f32.mrb[15].mxu0 }
 0x3aa   :  { %v1101_v3 = vsel %vm126_vm0, %v977_v63, 0  ;;  %3837 = vmatmul.mubr.msk.bf16.vlgmr.msra.gmra.mrb[12].mxu1 %vm510_vm6, %v505_v62  ;;  %v3360_v62 = vld [vmem:[%s5366_s0 + $0x1] ss:$0 sm:$0xff] }
 0x3ab   :  { %3841 = vmatpush3.bf16.msra.mxu1 %v634_v2  ;;  %3901 = vmatpush3.bf16.msra.mxu0 %v1101_v3  ;;  %v803_v2 = vadd.f32 %v3360_v62, %v4708_v38 }
 0x3ac   :  { %3842 = vmatprep.mubr.msk.bf16.mxu1 %vm4370_vm5, %v4369_v11  ;;  %3846 = vmatprep.subr.bf16.mxu1 %v4369_v11 }
 0x3ad   :  { %3912 = vmatprep.subr.bf16.mxu0 %v4369_v11 }
 0x475   :  { %v551_v4 = vpop.f32.mrb[8].mxu1 }
 0x476   :  { %v603_v5 = vmul.f32 0.17677669, %v551_v4  ;;  %v3832_v6 = vpop.f32.mrb[9].mxu1  ;;  %v973_v4 = vpack.c.bf16 %v803_v2, %v803_v2 }
 0x477   :  { %v554_v7 = vpop.f32.mrb[10].mxu1  ;;  %v806_v6 = vadd.f32 %v3360_v62, %v4710_v43 }
 0x478   :  { %v3833_v8 = vpop.f32.mrb[11].mxu1  ;;  %v606_v12 = vsel %vm605_vm7, %v603_v5, -inf  ;;  %v978_v7 = vpack.c.bf16 %v4725_v0, %v4725_v0 }
 0x479   :  { %607 = vmax.xlane.f32.xlu1 %v606_v12  ;;  %v974_v38 = vpack.c.bf16 %v806_v6, %v806_v6 }
 0x47a   :  { %v1147_v8 = vsel %vm126_vm0, %v978_v7, 0 }
 0x47d   :  { %v597_v13 = vpop.f32.mrb[12].mxu1 }
 0x47e   :  { %v604_v15 = vmul.f32 0.17677669, %v597_v13  ;;  %v3838_v16 = vpop.f32.mrb[13].mxu1 }
 0x47f   :  { %v600_v17 = vpop.f32.mrb[14].mxu1 }
 0x480   :  { %v3839_v18 = vpop.f32.mrb[15].mxu1  ;;  %v609_v19 = vsel %vm605_vm7, %v604_v15, -inf }
 0x481   :  { %610 = vmax.xlane.f32.xlu1 %v609_v19 }
 0x506   :  { %v608_v20 = vpop.xlane.xlu1 %607 }
 0x507   :  { %v612_v21 = vsub.f32 %v603_v5, %v608_v20 }
 0x509   :  { %v614_v22 = vmul.f32 1.442695, %v612_v21 }
 0x50b   :  { %4274 = vpow2.f32 %v614_v22 }
 0x50e   :  { %v611_v23 = vpop.xlane.xlu1 %610 }
 0x50f   :  { %v613_v25 = vsub.f32 %v604_v15, %v611_v23 }
 0x511   :  { %v616_v26 = vmul.f32 1.442695, %v613_v25 }
 0x513   :  { %4276 = vpow2.f32 %v616_v26 }
 0x515   :  { %v4275_v27 = vpop.eup %4274 }
 0x516   :  { %v618_v28 = vsel %vm605_vm7, %v4275_v27, 0.0 }
 0x517   :  { %619 = vadd.xlane.f32.xlu1 %v618_v28 }
 0x51d   :  { %v4277_v29 = vpop.eup %4276 }
 0x51e   :  { %v621_v30 = vsel %vm605_vm7, %v4277_v29, 0.0 }
 0x51f   :  { %622 = vadd.xlane.f32.xlu1 %v621_v30 }
 0x5a4   :  { %v620_v31 = vpop.xlane.xlu1 %619 }
 0x5a5   :  { %4278 = vrcp.f32 %v620_v31 }
 0x5ac   :  { %v623_v32 = vpop.xlane.xlu1 %622 }
 0x5ad   :  { %4280 = vrcp.f32 %v623_v32 }
 0x5af   :  { %v4279_v34 = vpop.eup %4278 }
 0x5b0   :  { %v625_v36 = vmul.f32 %v4279_v34, %v4275_v27 }
 0x5b2   :  { %v628_v37 = vpack.c.bf16 %v625_v36, %v625_v36 }
 0x5b4   :  { %3843 = vmatmul.mubr.msk.bf16.vlgmr.msra.gmra.mrb[16].mxu1 %vm605_vm7, %v628_v37 }
 0x5b5   :  { %3847 = vmatpush3.bf16.msra.mxu1 %v680_v39  ;;  %3848 = vmatprep.mubr.msk.bf16.mxu1 %vm4370_vm5, %v4369_v11 }
 0x5b6   :  { %3864 = vmatprep.subr.bf16.mxu1 %v4369_v11 }
 0x5b7   :  { %v4281_v40 = vpop.eup %4280 }
 0x5b8   :  { %v627_v41 = vmul.f32 %v4281_v40, %v4277_v29 }
 0x5ba   :  { %v629_v44 = vpack.c.bf16 %v627_v41, %v627_v41 }
 0x5bc   :  { %3849 = vmatmul.mubr.msk.bf16.vlgmr.msra.gmra.mrb[20].mxu1 %vm605_vm7, %v629_v44  ;;  %v4206_v44 = vld [vmem:[%s5316_s13] sm:$0xff]  }
 0x5bd   :  { %3865 = vmatpush3.bf16.msra.mxu1 %v4202_v42  ;;  %3872 = vmatprep.mubr.msk.bf16.mxu1 %vm4370_vm5, %v4369_v11 }
 0x5be   :  { %3866 = vmatprep.subr.bf16.mxu1 %v4369_v11 }
 0x5c1   :  { %3867 = vmatpush3.bf16.msra.mxu1 %v4203_v33 }
 0x5c2   :  { %3868 = vmatprep.subr.bf16.mxu1 %v4369_v11 }
 0x5c5   :  { %3869 = vmatpush3.bf16.msra.mxu1 %v4204_v45  ;;  %v4207_v45 = vld [vmem:[%s5316_s13 + $0x8] sm:$0xff]  }
 0x5c6   :  { %3870 = vmatprep.subr.bf16.mxu1 %v4369_v11 }
 0x5c9   :  { %3871 = vmatpush3.bf16.msra.mxu1 %v4205_v46  ;;  %v4208_v46 = vld [vmem:[%s5316_s13 + $0x10] sm:$0xff]  }
 0x5ca   :  { %3888 = vmatprep.subr.bf16.mxu1 %v4369_v11 }
 0x5cc   :  { %3873 = vmatmul.mubr.msk.bf16.vlgmr.msra.gmra.mrb[24].mxu1 %vm216_vm4, %v4636_v14  ;;  %v3375_v14 = vld [vmem:[%s5365_s6 + $0x1] ss:$0 sm:$0xff] }
 0x5cd   :  { %3890 = vmatprep.mubr.msk.bf16.mxu1 %vm4370_vm5, %v4369_v11 }
 0x687   :  { %v4768_v47 = vpop.f32.mrb[16].mxu1 }
 0x688   :  { %v3844_v48 = vpop.f32.mrb[17].mxu1 }
 0x689   :  { %v673_v49 = vpop.f32.mrb[18].mxu1  ;;  %v4209_v48 = vld [vmem:[%s5316_s13 + $0x18] sm:$0xff]  }
 0x68a   :  { %v3845_v50 = vpop.f32.mrb[19].mxu1 }
 0x68f   :  { %v4770_v51 = vpop.f32.mrb[20].mxu1 }
 0x690   :  { %v722_v52 = vpack.c.bf16 %v4770_v51, %v4768_v47  ;;  %v3850_v53 = vpop.f32.mrb[21].mxu1 }
 0x691   :  { %v719_v54 = vpop.f32.mrb[22].mxu1 }
 0x692   :  { %v3851_v55 = vpop.f32.mrb[23].mxu1 }
 0x69f   :  { %v884_v56 = vpop.f32.mrb[24].mxu1 }
 0x6a0   :  { %v885_v57 = vadd.f32 %v3375_v14, %v884_v56  ;;  %v3874_v58 = vpop.f32.mrb[25].mxu1 }
 0x6a1   :  { %v887_v59 = vpop.f32.mrb[26].mxu1 }
 0x6a2   :  { %v975_v60 = vpack.c.bf16 %v885_v57, %v885_v57  ;;  %v3875_v61 = vpop.f32.mrb[27].mxu1  ;;  %v888_v1 = vadd.f32 %v3375_v14, %v887_v59 }
 0x6a3   :  { %v3410_v61 = vld [vmem:[%s5317_s14] ss:$0 sm:$0xff] }
 0x6a4   :  { %v983_v63 = vsel %vm510_vm6, %v975_v60, 0  ;;  %v976_v3 = vpack.c.bf16 %v888_v1, %v888_v1 }
 0x6a5   :  { %3889 = vmatpush3.bf16.xpose.msra.mxu1 %v983_v63 }
 0x6a6   :  { %3894 = vmatprep.subr.bf16.mxu1 %v4369_v11  ;;  %v1029_v5 = vsel %vm510_vm6, %v976_v3, 0 }
 0x6ac   :  { %3891 = vmatmul.mubr.msk.bf16.vlgmr.msra.gmra.mrb[28].mxu1 %vm510_vm6, %v973_v4 }
 0x6ad   :  { %3895 = vmatpush3.bf16.xpose.msra.mxu1 %v1029_v5  ;;  %3896 = vmatprep.mubr.msk.bf16.mxu1 %vm4370_vm5, %v4369_v11 }
 0x6ae   :  { %3906 = vmatprep.subr.bf16.mxu1 %v4369_v11 }
 0x6b4   :  { %3897 = vmatmul.mubr.msk.bf16.vlgmr.msra.gmra.mrb[32].mxu1 %vm510_vm6, %v974_v38 }
 0x6b5   :  { %3907 = vmatpush3.bf16.msra.mxu1 %v1147_v8  ;;  %3908 = vmatprep.mubr.msk.bf16.mxu1 %vm4370_vm5, %v4369_v11 }
 0x6b6   :  { %3920 = vmatprep.subr.bf16.mxu1 %v4369_v11 }
 0x77f   :  { %v1019_v12 = vpop.f32.mrb[28].mxu1 }
 0x780   :  { %v1071_v13 = vmul.f32 0.17677669, %v1019_v12  ;;  %v3892_v15 = vpop.f32.mrb[29].mxu1 }
 0x781   :  { %v1022_v43 = vpop.f32.mrb[30].mxu1 }
 0x782   :  { %v3893_v16 = vpop.f32.mrb[31].mxu1  ;;  %v1073_v17 = vsel %vm605_vm7, %v1071_v13, -inf }
 0x783   :  { %1074 = vmax.xlane.f32.xlu1 %v1073_v17 }
 0x787   :  { %v1065_v0 = vpop.f32.mrb[32].mxu1 }
 0x788   :  { %v1072_v18 = vmul.f32 0.17677669, %v1065_v0  ;;  %v3898_v19 = vpop.f32.mrb[33].mxu1 }
 0x789   :  { %v1068_v20 = vpop.f32.mrb[34].mxu1 }
 0x78a   :  { %v3899_v21 = vpop.f32.mrb[35].mxu1  ;;  %v1076_v22 = vsel %vm605_vm7, %v1072_v18, -inf  ;;  %v4211_v20 = vld [vmem:[%s5320_s17 + $0x8] sm:$0xff]  }
 0x78b   :  { %1077 = vmax.xlane.f32.xlu1 %v1076_v22  ;;  %v4212_v21 = vld [vmem:[%s5320_s17 + $0x10] sm:$0xff]   ;;  %v4213_v22 = vld [vmem:[%s5320_s17 + $0x18] sm:$0xff]  }
 0x810   :  { %v1075_v23 = vpop.xlane.xlu1 %1074 }
 0x811   :  { %v1079_v25 = vsub.f32 %v1071_v13, %v1075_v23 }
 0x813   :  { %v1081_v26 = vmul.f32 1.442695, %v1079_v25 }
 0x815   :  { %4282 = vpow2.f32 %v1081_v26 }
 0x818   :  { %v1078_v27 = vpop.xlane.xlu1 %1077 }
 0x819   :  { %v1080_v28 = vsub.f32 %v1072_v18, %v1078_v27 }
 0x81b   :  { %v1083_v29 = vmul.f32 1.442695, %v1080_v28 }
 0x81d   :  { %4284 = vpow2.f32 %v1083_v29 }
 0x81f   :  { %v4283_v30 = vpop.eup %4282 }
 0x820   :  { %v1085_v31 = vsel %vm605_vm7, %v4283_v30, 0.0 }
 0x821   :  { %1086 = vadd.xlane.f32.xlu1 %v1085_v31  ;;  %v3411_v31 = vld [vmem:[%s5318_s15] ss:$0 sm:$0xff] }
 0x827   :  { %v4285_v32 = vpop.eup %4284 }
 0x828   :  { %v1088_v34 = vsel %vm605_vm7, %v4285_v32, 0.0 }
 0x829   :  { %1089 = vadd.xlane.f32.xlu0 %v1088_v34 }
 0x8ae   :  { %v1087_v35 = vpop.xlane.xlu1 %1086 }
 0x8af   :  { %4286 = vrcp.f32 %v1087_v35 }
 0x8b6   :  { %v1090_v36 = vpop.xlane.xlu0 %1089 }
 0x8b7   :  { %4288 = vrcp.f32 %v1090_v36 }
 0x8b9   :  { %v4287_v37 = vpop.eup %4286 }
 0x8ba   :  { %v1092_v39 = vmul.f32 %v4287_v37, %v4283_v30  ;;  %v3412_v37 = vld [vmem:[%s5319_s16] ss:$0 sm:$0xff] }
 0x8bc   :  { %v1095_v40 = vpack.c.bf16 %v1092_v39, %v1092_v39 }
 0x8be   :  { %3903 = vmatmul.mubr.msk.bf16.vlgmr.msra.gmra.mrb[16].mxu0 %vm605_vm7, %v1095_v40 }
 0x8bf   :  { %3916 = vmatprep.mubr.msk.bf16.mxu0 %vm4370_vm5, %v4369_v11  ;;  %3913 = vmatpush3.bf16.msra.mxu0 %v4208_v46  ;;  %v4217_v46 = vld [vmem:[%s5322_s19 + $0x18] sm:$0xff]  }
 0x8c0   :  { %3914 = vmatprep.subr.bf16.mxu0 %v4369_v11 }
 0x8c1   :  { %v4289_v41 = vpop.eup %4288 }
 0x8c2   :  { %v1094_v42 = vmul.f32 %v4289_v41, %v4285_v32 }
 0x8c3   :  { %3915 = vmatpush3.bf16.msra.mxu0 %v4209_v48  ;;  %v4218_v48 = vld [vmem:[%s5322_s19 + $0x20] sm:$0xff]  }
 0x8c4   :  { %v1096_v33 = vpack.c.bf16 %v1094_v42, %v1094_v42  ;;  %3928 = vmatprep.subr.bf16.mxu0 %v4369_v11 }
 0x8c6   :  { %3909 = vmatmul.mubr.msk.bf16.vlgmr.msra.gmra.mrb[36].mxu1 %vm605_vm7, %v1096_v33  ;;  %v4215_v33 = vld [vmem:[%s5322_s19 + $0x8] sm:$0xff]  }
 0x8c7   :  { %3921 = vmatpush3.bf16.msra.mxu1 %v4206_v44  ;;  %3924 = vmatprep.mubr.msk.bf16.mxu1 %vm4370_vm5, %v4369_v11  ;;  %v4214_v44 = vld [vmem:[%s5322_s19] sm:$0xff]  }
 0x8c8   :  { %3922 = vmatprep.subr.bf16.mxu1 %v4369_v11 }
 0x8cb   :  { %3923 = vmatpush3.bf16.msra.mxu1 %v4207_v45  ;;  %v4216_v45 = vld [vmem:[%s5322_s19 + $0x10] sm:$0xff]  }
 0x8cc   :  { %3940 = vmatprep.subr.bf16.mxu1 %v4369_v11 }
 0x8ce   :  { %3925 = vmatmul.mubr.msk.bf16.vlgmr.msra.gmra.mrb[40].mxu1 %vm510_vm6, %v722_v52 }
 0x8cf   :  { %3956 = vmatprep.mubr.msk.bf16.mxu1 %vm4370_vm5, %v4369_v11  ;;  %3941 = vmatpush3.bf16.msra.mxu1 %v4214_v44 }
 0x8d0   :  { %3942 = vmatprep.subr.bf16.mxu1 %v4369_v11 }
 0x8d3   :  { %3943 = vmatpush3.bf16.msra.mxu1 %v4215_v33 }
 0x8d4   :  { %3944 = vmatprep.subr.bf16.mxu1 %v4369_v11 }
 0x8d7   :  { %3945 = vmatpush3.bf16.msra.mxu1 %v4216_v45 }
 0x8d8   :  { %3946 = vmatprep.subr.bf16.mxu1 %v4369_v11 }
 0x8db   :  { %3947 = vmatpush3.bf16.msra.mxu1 %v4217_v46 }
 0x8dc   :  { %3948 = vmatprep.subr.bf16.mxu1 %v4369_v11 }
 0x8df   :  { %3949 = vmatpush3.bf16.msra.mxu1 %v4218_v48 }
 0x8e0   :  { %3950 = vmatprep.subr.bf16.mxu1 %v4369_v11 }
 0x991   :  { %v1137_v47 = vpop.f32.mrb[16].mxu0 }
 0x992   :  { %v3904_v49 = vpop.f32.mrb[17].mxu0 }
 0x993   :  { %v1140_v50 = vpop.f32.mrb[18].mxu0  ;;  %v4220_v49 = vld [vmem:[%s5322_s19 + $0x30] sm:$0xff]  }
 0x994   :  { %v3905_v51 = vpop.f32.mrb[19].mxu0  ;;  %v4221_v50 = vld [vmem:[%s5322_s19 + $0x38] sm:$0xff]  }
 0x995   :  { %v3413_v51 = vld [vmem:[%s5321_s18] ss:$0 sm:$0xff] }
 0x999   :  { %v1183_v52 = vpop.f32.mrb[36].mxu1 }
 0x99a   :  { %v1189_v53 = vpack.c.bf16 %v1183_v52, %v1137_v47  ;;  %v3910_v54 = vpop.f32.mrb[37].mxu1  ;;  %v4219_v47 = vld [vmem:[%s5322_s19 + $0x28] sm:$0xff]  }
 0x99b   :  { %v1186_v55 = vpop.f32.mrb[38].mxu1  ;;  %3951 = vmatpush3.bf16.msra.mxu1 %v4219_v47 }
 0x99c   :  { %v3911_v14 = vpop.f32.mrb[39].mxu1  ;;  %3917 = vmatmul.mubr.msk.bf16.vlgmr.msra.gmra.mrb[20].mxu0 %vm510_vm6, %v1189_v53  ;;  %3952 = vmatprep.subr.bf16.mxu1 %v4369_v11 }
 0x99d   :  { %3936 = vmatprep.mubr.msk.bf16.mxu0 %vm4370_vm5, %v4369_v11 }
 0x99f   :  { %3953 = vmatpush3.bf16.msra.mxu1 %v4220_v49  ;;  %v3419_v49 = vld [vmem:[%s5323_s20] ss:$0 sm:$0xff] }
 0x9a0   :  { %3954 = vmatprep.subr.bf16.mxu1 %v4369_v11 }
 0x9a1   :  { %v1300_v56 = vpop.f32.mrb[40].mxu1 }
 0x9a2   :  { %v3926_v57 = vpop.f32.mrb[41].mxu1 }
 0x9a3   :  { %v1303_v58 = vpop.f32.mrb[42].mxu1  ;;  %3955 = vmatpush3.bf16.msra.mxu1 %v4221_v50 }
 0x9a4   :  { %v3927_v59 = vpop.f32.mrb[43].mxu1  ;;  %3984 = vmatprep.subr.bf16.mxu1 %v4369_v11 }
 0xa6f   :  { %v1244_v60 = vpop.f32.mrb[20].mxu0 }
 0xa70   :  { %v1301_v62 = vadd.f32 %v1300_v56, %v1244_v60  ;;  %v3918_v63 = vpop.f32.mrb[21].mxu0 }
 0xa71   :  { %v1247_v1 = vpop.f32.mrb[22].mxu0 }
 0xa72   :  { %v1314_v2 = vadd.f32 %v3410_v61, %v1301_v62  ;;  %v1304_v3 = vadd.f32 %v1303_v58, %v1247_v1  ;;  %v3919_v4 = vpop.f32.mrb[23].mxu0 }
 0xa74   :  { %v1315_v5 = vadd.f32 %v3410_v61, %v1304_v3  ;;  %v1316_v6 = vadd.f32 %v1314_v2, %v4624_v9 }
 0xa76   :  { %v1320_v7 = vsel %vm216_vm4, %v1316_v6, 0.0  ;;  %v1317_v38 = vadd.f32 %v1315_v5, %v4626_v10  ;;  %v4210_v10 = vld [vmem:[%s5320_s17] sm:$0xff]  }
 0xa77   :  { %1321 = vadd.xlane.f32.xlu1 %v1320_v7  ;;  %3929 = vmatpush3.bf16.msra.mxu0 %v4210_v10 }
 0xa78   :  { %v1323_v8 = vsel %vm216_vm4, %v1317_v38, 0.0  ;;  %3930 = vmatprep.subr.bf16.mxu0 %v4369_v11 }
 0xa79   :  { %1324 = vadd.xlane.f32.xlu0 %v1323_v8 }
 0xa7b   :  { %3931 = vmatpush3.bf16.msra.mxu0 %v4211_v20 }
 0xa7c   :  { %3932 = vmatprep.subr.bf16.mxu0 %v4369_v11 }
 0xa7f   :  { %3933 = vmatpush3.bf16.msra.mxu0 %v4212_v21 }
 0xa80   :  { %3934 = vmatprep.subr.bf16.mxu0 %v4369_v11 }
 0xa83   :  { %3935 = vmatpush3.bf16.msra.mxu0 %v4213_v22 }
 0xa84   :  { %3960 = vmatprep.subr.bf16.mxu0 %v4369_v11 }
 0xb04   :  { %v1322_v12 = vpop.xlane.xlu1 %1321 }
 0xb05   :  { %v1326_v13 = vmul.f32 0.015625, %v1322_v12 }
 0xb06   :  { %v1325_v15 = vpop.xlane.xlu0 %1324 }
 0xb07   :  { %v1328_v43 = vsub.f32 %v1316_v6, %v1326_v13  ;;  %v1327_v16 = vmul.f32 0.015625, %v1325_v15 }
 0xb09   :  { %v1329_v17 = vsub.f32 %v1317_v38, %v1327_v16  ;;  %v1330_v0 = vmul.f32 %v1328_v43, %v1328_v43 }
 0xb0b   :  { %v1332_v18 = vsel %vm216_vm4, %v1330_v0, 0.0  ;;  %v1331_v19 = vmul.f32 %v1329_v17, %v1329_v17 }
 0xb0c   :  { %1333 = vadd.xlane.f32.xlu1 %v1332_v18 }
 0xb0d   :  { %v1335_v9 = vsel %vm216_vm4, %v1331_v19, 0.0 }
 0xb0e   :  { %1336 = vadd.xlane.f32.xlu0 %v1335_v9 }
 0xb99   :  { %v1334_v23 = vpop.xlane.xlu1 %1333 }
 0xb9a   :  { %v1338_v25 = vmul.f32 0.015625, %v1334_v23 }
 0xb9b   :  { %v1337_v26 = vpop.xlane.xlu0 %1336 }
 0xb9c   :  { %v1340_v27 = vadd.f32 1e-12, %v1338_v25  ;;  %v1339_v28 = vmul.f32 0.015625, %v1337_v26 }
 0xb9e   :  { %4290 = vrsqrt.f32 %v1340_v27  ;;  %v1341_v29 = vadd.f32 1e-12, %v1339_v28 }
 0xba0   :  { %4292 = vrsqrt.f32 %v1341_v29 }
 0xba8   :  { %v4291_v30 = vpop.eup %4290 }
 0xba9   :  { %v1344_v32 = vmul.f32 %v4291_v30, %v1328_v43 }
 0xbaa   :  { %v4293_v34 = vpop.eup %4292 }
 0xbab   :  { %v1352_v35 = vmul.f32 %v3411_v31, %v1344_v32  ;;  %v1345_v36 = vmul.f32 %v4293_v34, %v1329_v17 }
 0xbad   :  { %v1353_v39 = vmul.f32 %v3411_v31, %v1345_v36  ;;  %v4862_v40 = vadd.f32 %v3412_v37, %v1352_v35 }
 0xbaf   :  { %v4864_v41 = vadd.f32 %v3412_v37, %v1353_v39 }
 0xbb1   :  { %v1362_v42 = vpack.c.bf16 %v4864_v41, %v4862_v40 }
 0xbb3   :  { %3937 = vmatmul.mubr.msk.bf16.vlgmr.msra.gmra.mrb[24].mxu0 %vm216_vm4, %v1362_v42 }
 0xbb4   :  { %3968 = vmatprep.mubr.msk.bf16.mxu0 %vm4370_vm5, %v4369_v11 }
 0xc86   :  { %v1439_v52 = vpop.f32.mrb[24].mxu0 }
 0xc87   :  { %v1440_v53 = vadd.f32 %v3413_v51, %v1439_v52  ;;  %v3938_v54 = vpop.f32.mrb[25].mxu0 }
 0xc88   :  { %v1442_v55 = vpop.f32.mrb[26].mxu0 }
 0xc89   :  { %v1448_v14 = vmul.f32 0.70710677, %v1440_v53  ;;  %v1443_v56 = vadd.f32 %v3413_v51, %v1442_v55  ;;  %v3939_v57 = vpop.f32.mrb[27].mxu0  ;;  %v1446_v44 = vmul.f32 0.5, %v1440_v53 }
 0xc8b   :  { %v1450_v58 = vand.u32 2147483647, %v1448_v14  ;;  %v1449_v59 = vmul.f32 0.70710677, %v1443_v56  ;;  %vm1490_vm8 = vcmp.ge.f32.partialorder %v1448_v14, 0.0  ;;  %v1447_v33 = vmul.f32 0.5, %v1443_v56 }
 0xc8d   :  { %v1452_v60 = vmul.f32 0.3275911, %v1450_v58  ;;  %v1451_v61 = vand.u32 2147483647, %v1449_v59  ;;  %v1478_v2 = vsub.f32 0.0, %v1450_v58  ;;  %vm1491_vm9 = vcmp.ge.f32.partialorder %v1449_v59, 0.0 }
 0xc8f   :  { %v1454_v62 = vadd.f32 1.0, %v1452_v60  ;;  %v1453_v63 = vmul.f32 0.3275911, %v1451_v61  ;;  %v1479_v3 = vsub.f32 0.0, %v1451_v61  ;;  %v1480_v5 = vmul.f32 %v1478_v2, %v1450_v58 }
 0xc91   :  { %4294 = vrcp.f32 %v1454_v62  ;;  %v1455_v1 = vadd.f32 1.0, %v1453_v63  ;;  %v1481_v8 = vmul.f32 %v1479_v3, %v1451_v61  ;;  %v1482_v12 = vmul.f32 1.442695, %v1480_v5  ;;  %v4223_v5 = vld [vmem:[%s5360_s7 + $0x40] sm:$0xff]  }
 0xc93   :  { %4296 = vrcp.f32 %v1455_v1  ;;  %v1484_v17 = vmul.f32 1.442695, %v1481_v8  ;;  %v4227_v8 = vld [vmem:[%s5360_s7 + $0x50] sm:$0xff]  }
 0xc94   :  { %4298 = vpow2.f32 %v1482_v12  ;;  %v4228_v12 = vld [vmem:[%s5359_s11 + $0x58] sm:$0xff]  }
 0xc95   :  { %4300 = vpow2.f32 %v1484_v17 }
 0xc9b   :  { %v4295_v4 = vpop.eup %4294 }
 0xc9c   :  { %v1460_v6 = vmul.f32 1.0614054, %v4295_v4 }
 0xc9d   :  { %v4297_v7 = vpop.eup %4296 }
 0xc9e   :  { %v1462_v38 = vadd.f32 -1.4531521, %v1460_v6  ;;  %v1461_v13 = vmul.f32 1.0614054, %v4297_v7  ;;  %v4299_v26 = vpop.eup %4298  ;;  %v4224_v6 = vld [vmem:[%s5359_s11 + $0x48] sm:$0xff]  }
 0xc9f   :  { %v4301_v30 = vpop.eup %4300 }
 0xca0   :  { %v1464_v15 = vmul.f32 %v4295_v4, %v1462_v38  ;;  %v1463_v43 = vadd.f32 -1.4531521, %v1461_v13  ;;  %v4226_v38 = vld [vmem:[%s5359_s11 + $0x50] sm:$0xff]   ;;  %v4229_v13 = vld [vmem:[%s5360_s7 + $0x58] sm:$0xff]  }
 0xca2   :  { %v1466_v16 = vadd.f32 1.4214138, %v1464_v15  ;;  %v1465_v0 = vmul.f32 %v4297_v7, %v1463_v43 }
 0xca4   :  { %v1468_v18 = vmul.f32 %v4295_v4, %v1466_v16  ;;  %v1467_v19 = vadd.f32 1.4214138, %v1465_v0 }
 0xca6   :  { %v1470_v9 = vadd.f32 -0.28449672, %v1468_v18  ;;  %v1469_v10 = vmul.f32 %v4297_v7, %v1467_v19 }
 0xca8   :  { %v1472_v20 = vmul.f32 %v4295_v4, %v1470_v9  ;;  %v1471_v21 = vadd.f32 -0.28449672, %v1469_v10  ;;  %v3428_v9 = vld [vmem:[%s5324_s21] ss:$0 sm:$0xff] }
 0xcaa   :  { %v1474_v22 = vadd.f32 0.2548296, %v1472_v20  ;;  %v1473_v23 = vmul.f32 %v4297_v7, %v1471_v21 }
 0xcac   :  { %v1476_v25 = vmul.f32 %v4295_v4, %v1474_v22  ;;  %v1475_v27 = vadd.f32 0.2548296, %v1473_v23  ;;  %v3429_v23 = vld [vmem:[%s5325_s22] ss:$0 sm:$0xff] }
 0xcae   :  { %v1486_v28 = vmul.f32 %v4299_v26, %v1476_v25  ;;  %v1477_v29 = vmul.f32 %v4297_v7, %v1475_v27  ;;  %v4225_v7 = vld [vmem:[%s5360_s7 + $0x48] sm:$0xff]  }
 0xcb0   :  { %v1488_v31 = vsub.f32 1.0, %v1486_v28  ;;  %v1487_v32 = vmul.f32 %v4301_v30, %v1477_v29  ;;  %v4230_v28 = vld [vmem:[%s5363_s30 + $0x40] sm:$0xff]   ;;  %v4231_v30 = vld [vmem:[%s5363_s30 + $0x48] sm:$0xff]  }
 0xcb2   :  { %v1492_v34 = vsub.f32 0.0, %v1488_v31  ;;  %v1489_v35 = vsub.f32 1.0, %v1487_v32  ;;  %v4233_v32 = vld [vmem:[%s5363_s30 + $0x58] sm:$0xff]  }
 0xcb4   :  { %v1494_v36 = vsel %vm1490_vm8, %v1488_v31, %v1492_v34  ;;  %v1493_v37 = vsub.f32 0.0, %v1489_v35  ;;  %v4232_v31 = vld [vmem:[%s5363_s30 + $0x50] sm:$0xff]  }
 0xcb5   :  { %v1496_v39 = vadd.f32 1.0, %v1494_v36 }
 0xcb6   :  { %v1495_v42 = vsel %vm1491_vm9, %v1489_v35, %v1493_v37 }
 0xcb7   :  { %v1497_v45 = vadd.f32 1.0, %v1495_v42  ;;  %v1498_v46 = vmul.f32 %v1496_v39, %v1446_v44 }
 0xcb9   :  { %v1499_v48 = vmul.f32 %v1497_v45, %v1447_v33  ;;  %v3454_v45 = vld [vmem:[%s5365_s6 + $0x2] ss:$0 sm:$0xff] }
 0xcbb   :  { %v1500_v47 = vpack.c.bf16 %v1499_v48, %v1498_v46 }
 0xcbd   :  { %3957 = vmatmul.mubr.bf16.vlgmr.msra.gmra.mrb[44].mxu1 %v1500_v47 }
 0xcbe   :  { %3992 = vmatprep.mubr.msk.bf16.mxu1 %vm4370_vm5, %v4369_v11  ;;  %3985 = vmatpush3.bf16.msra.mxu1 %v4223_v5 }
 0xcbf   :  { %3986 = vmatprep.subr.bf16.mxu1 %v4369_v11 }
 0xcc2   :  { %3987 = vmatpush3.bf16.msra.mxu1 %v4225_v7 }
 0xcc3   :  { %3988 = vmatprep.subr.bf16.mxu1 %v4369_v11 }
 0xcc6   :  { %3989 = vmatpush3.bf16.msra.mxu1 %v4227_v8 }
 0xcc7   :  { %3990 = vmatprep.subr.bf16.mxu1 %v4369_v11 }
 0xcca   :  { %3991 = vmatpush3.bf16.msra.mxu1 %v4229_v13 }
 0xccb   :  { %4002 = vmatprep.subr.bf16.mxu1 %v4369_v11 }
 0xd90   :  { %v1606_v50 = vpop.f32.mrb[44].mxu1 }
 0xd91   :  { %v1607_v51 = vadd.f32 %v3419_v49, %v1606_v50  ;;  %v3958_v52 = vpop.f32.mrb[45].mxu1 }
 0xd92   :  { %v1609_v54 = vpop.f32.mrb[46].mxu1 }
 0xd93   :  { %v1610_v55 = vadd.f32 %v3419_v49, %v1609_v54  ;;  %v3959_v14 = vpop.f32.mrb[47].mxu1  ;;  %v1613_v53 = vadd.f32 %v1607_v51, %v4862_v40  ;;  %v3469_v49 = vld [vmem:[%s5364_s23 + $0x2] ss:$0 sm:$0xff] }
 0xd95   :  { %v1617_v56 = vsel %vm216_vm4, %v1613_v53, 0.0  ;;  %v1614_v57 = vadd.f32 %v1610_v55, %v4864_v41  ;;  %v4222_v41 = vld [vmem:[%s5359_s11 + $0x40] sm:$0xff]  }
 0xd96   :  { %1618 = vadd.xlane.f32.xlu1 %v1617_v56  ;;  %3961 = vmatpush3.bf16.msra.mxu0 %v4222_v41  ;;  %v3439_v55 = vld [vmem:[%s5366_s0 + $0x2] ss:$0 sm:$0xff] }
 0xd97   :  { %v1620_v58 = vsel %vm216_vm4, %v1614_v57, 0.0  ;;  %3962 = vmatprep.subr.bf16.mxu0 %v4369_v11 }
 0xd98   :  { %1621 = vadd.xlane.f32.xlu0 %v1620_v58 }
 0xd9a   :  { %3963 = vmatpush3.bf16.msra.mxu0 %v4224_v6 }
 0xd9b   :  { %3964 = vmatprep.subr.bf16.mxu0 %v4369_v11 }
 0xd9e   :  { %3965 = vmatpush3.bf16.msra.mxu0 %v4226_v38 }
 0xd9f   :  { %3966 = vmatprep.subr.bf16.mxu0 %v4369_v11 }
 0xda2   :  { %3967 = vmatpush3.bf16.msra.mxu0 %v4228_v12 }
 0xda3   :  { %3972 = vmatprep.subr.bf16.mxu0 %v4369_v11 }
 0xe23   :  { %v1619_v59 = vpop.xlane.xlu1 %1618 }
 0xe24   :  { %v1623_v60 = vmul.f32 0.015625, %v1619_v59 }
 0xe25   :  { %v1622_v61 = vpop.xlane.xlu0 %1621 }
 0xe26   :  { %v1625_v62 = vsub.f32 %v1613_v53, %v1623_v60  ;;  %v1624_v63 = vmul.f32 0.015625, %v1622_v61 }
 0xe28   :  { %v1626_v1 = vsub.f32 %v1614_v57, %v1624_v63  ;;  %v1627_v2 = vmul.f32 %v1625_v62, %v1625_v62 }
 0xe2a   :  { %v1629_v3 = vsel %vm216_vm4, %v1627_v2, 0.0  ;;  %v1628_v4 = vmul.f32 %v1626_v1, %v1626_v1 }
 0xe2b   :  { %1630 = vadd.xlane.f32.xlu1 %v1629_v3 }
 0xe2c   :  { %v1632_v40 = vsel %vm216_vm4, %v1628_v4, 0.0 }
 0xe2d   :  { %1633 = vadd.xlane.f32.xlu0 %v1632_v40 }
 0xeb8   :  { %v1631_v15 = vpop.xlane.xlu1 %1630 }
 0xeb9   :  { %v1635_v43 = vmul.f32 0.015625, %v1631_v15 }
 0xeba   :  { %v1634_v16 = vpop.xlane.xlu0 %1633 }
 0xebb   :  { %v1637_v17 = vadd.f32 1e-12, %v1635_v43  ;;  %v1636_v0 = vmul.f32 0.015625, %v1634_v16 }
 0xebd   :  { %4302 = vrsqrt.f32 %v1637_v17  ;;  %v1638_v18 = vadd.f32 1e-12, %v1636_v0 }
 0xebf   :  { %4304 = vrsqrt.f32 %v1638_v18 }
 0xec7   :  { %v4303_v19 = vpop.eup %4302 }
 0xec8   :  { %v1641_v10 = vmul.f32 %v4303_v19, %v1625_v62 }
 0xec9   :  { %v4305_v20 = vpop.eup %4304 }
 0xeca   :  { %v1649_v21 = vmul.f32 %v3428_v9, %v1641_v10  ;;  %v1642_v22 = vmul.f32 %v4305_v20, %v1626_v1 }
 0xecc   :  { %v1650_v25 = vmul.f32 %v3428_v9, %v1642_v22  ;;  %v4955_v26 = vadd.f32 %v3429_v23, %v1649_v21 }
 0xece   :  { %v4957_v27 = vadd.f32 %v3429_v23, %v1650_v25 }
 0xed0   :  { %v4964_v29 = vpack.c.bf16 %v4957_v27, %v4955_v26 }
 0xed2   :  { %3969 = vmatmul.mubr.msk.bf16.vlgmr.msra.gmra.mrb[28].mxu0 %vm216_vm4, %v4964_v29  ;;  %3993 = vmatmul.mubr.msk.bf16.vlgmr.msra.gmra.mrb[48].mxu1 %vm216_vm4, %v4964_v29 }
 0xed3   :  { %3973 = vmatpush3.bf16.msra.mxu0 %v4230_v28  ;;  %3980 = vmatprep.mubr.msk.bf16.mxu0 %vm4370_vm5, %v4369_v11 }
 0xed4   :  { %3974 = vmatprep.subr.bf16.mxu0 %v4369_v11  ;;  %4004 = vmatprep.mubr.msk.bf16.mxu1 %vm4370_vm5, %v4369_v11 }
 0xed7   :  { %3975 = vmatpush3.bf16.msra.mxu0 %v4231_v30 }
 0xed8   :  { %3976 = vmatprep.subr.bf16.mxu0 %v4369_v11 }
 0xedb   :  { %3977 = vmatpush3.bf16.msra.mxu0 %v4232_v31 }
 0xedc   :  { %3978 = vmatprep.subr.bf16.mxu0 %v4369_v11 }
 0xedf   :  { %3979 = vmatpush3.bf16.msra.mxu0 %v4233_v32  ;;  %v4234_v32 = vld [vmem:[%s5359_s11 + $0x60] sm:$0xff]  }
 0xee0   :  { %3996 = vmatprep.subr.bf16.mxu0 %v4369_v11 }
 0xee2   :  { %3981 = vmatmul.mubr.msk.bf16.vlgmr.msra.gmra.mrb[32].mxu0 %vm216_vm4, %v4964_v29 }
 0xee3   :  { %3998 = vmatprep.mubr.msk.bf16.mxu0 %vm4370_vm5, %v4369_v11 }
 0xfa5   :  { %v1738_v34 = vpop.f32.mrb[28].mxu0  ;;  %v1902_v35 = vpop.f32.mrb[48].mxu1 }
 0xfa6   :  { %v3970_v36 = vpop.f32.mrb[29].mxu0  ;;  %v3994_v37 = vpop.f32.mrb[49].mxu1  ;;  %v1903_v14 = vadd.f32 %v3469_v49, %v1902_v35  ;;  %v1739_v57 = vadd.f32 %v3439_v55, %v1738_v34 }
 0xfa7   :  { %v1741_v39 = vpop.f32.mrb[30].mxu0  ;;  %v1905_v42 = vpop.f32.mrb[50].mxu1  ;;  %v4235_v36 = vld [vmem:[%s5363_s30 + $0x60] sm:$0xff]  }
 0xfa8   :  { %v3971_v44 = vpop.f32.mrb[31].mxu0  ;;  %v3995_v33 = vpop.f32.mrb[51].mxu1  ;;  %v1906_v58 = vadd.f32 %v3469_v49, %v1905_v42  ;;  %v1913_v60 = vpack.c.bf16 %v1903_v14, %v1903_v14  ;;  %v1742_v61 = vadd.f32 %v3439_v55, %v1741_v39  ;;  %v1909_v62 = vpack.c.bf16 %v1739_v57, %v1739_v57  ;;  %v4236_v39 = vld [vmem:[%s5359_s11 + $0x68] sm:$0xff]   ;;  %v4244_v49 = vld [vmem:[%s5360_s7 + $0x70] sm:$0xff]  }
 0xfa9   :  { %v4237_v42 = vld [vmem:[%s5363_s30 + $0x68] sm:$0xff]   ;;  %v4238_v44 = vld [vmem:[%s5359_s11 + $0x70] sm:$0xff]  }
 0xfaa   :  { %v1914_v63 = vpack.c.bf16 %v1906_v58, %v1906_v58  ;;  %v2037_v1 = vsel %vm126_vm0, %v1913_v60, 0  ;;  %v1910_v2 = vpack.c.bf16 %v1742_v61, %v1742_v61  ;;  %v4239_v33 = vld [vmem:[%s5363_s30 + $0x70] sm:$0xff]  }
 0xfac   :  { %v2083_v3 = vsel %vm126_vm0, %v1914_v63, 0 }
 0xfb5   :  { %v1820_v46 = vpop.f32.mrb[32].mxu0 }
 0xfb6   :  { %v1821_v48 = vadd.f32 %v3454_v45, %v1820_v46  ;;  %v3982_v47 = vpop.f32.mrb[33].mxu0  ;;  %v4241_v46 = vld [vmem:[%s5363_s30 + $0x78] sm:$0xff]  }
 0xfb7   :  { %v1823_v50 = vpop.f32.mrb[34].mxu0  ;;  %v4243_v47 = vld [vmem:[%s5360_s7 + $0x68] sm:$0xff]  }
 0xfb8   :  { %v1911_v51 = vpack.c.bf16 %v1821_v48, %v1821_v48  ;;  %v1824_v52 = vadd.f32 %v3454_v45, %v1823_v50  ;;  %v3983_v54 = vpop.f32.mrb[35].mxu0  ;;  %v4240_v45 = vld [vmem:[%s5359_s11 + $0x78] sm:$0xff]   ;;  %v4242_v48 = vld [vmem:[%s5360_s7 + $0x60] sm:$0xff]  }
 0xfb9   :  { %v4245_v50 = vld [vmem:[%s5360_s7 + $0x78] sm:$0xff]  }
 0xfba   :  { %v1919_v53 = vsel %vm510_vm6, %v1911_v51, 0  ;;  %v1912_v56 = vpack.c.bf16 %v1824_v52, %v1824_v52 }
 0xfbb   :  { %3997 = vmatpush3.bf16.xpose.msra.mxu0 %v1919_v53 }
 0xfbc   :  { %v1965_v59 = vsel %vm510_vm6, %v1912_v56, 0  ;;  %4008 = vmatprep.subr.bf16.mxu0 %v4369_v11 }
 0xfbd   :  { %4003 = vmatpush3.bf16.xpose.msra.mxu1 %v1965_v59 }
 0xfbe   :  { %4014 = vmatprep.subr.bf16.mxu1 %v4369_v11 }
 0xfc2   :  { %3999 = vmatmul.mubr.msk.bf16.vlgmr.msra.gmra.mrb[36].mxu0 %vm510_vm6, %v1909_v62 }
 0xfc3   :  { %4009 = vmatpush3.bf16.msra.mxu0 %v2037_v1  ;;  %4010 = vmatprep.mubr.msk.bf16.mxu0 %vm4370_vm5, %v4369_v11 }
 0xfc4   :  { %4005 = vmatmul.mubr.msk.bf16.vlgmr.msra.gmra.mrb[52].mxu1 %vm510_vm6, %v1910_v2  ;;  %4020 = vmatprep.subr.bf16.mxu0 %v4369_v11 }
 0xfc5   :  { %4015 = vmatpush3.bf16.msra.mxu1 %v2083_v3  ;;  %4016 = vmatprep.mubr.msk.bf16.mxu1 %vm4370_vm5, %v4369_v11 }
 0xfc6   :  { %4032 = vmatprep.subr.bf16.mxu1 %v4369_v11 }
0x1095   :  { %v1955_v4 = vpop.f32.mrb[36].mxu0 }
0x1096   :  { %v2007_v40 = vmul.f32 0.17677669, %v1955_v4  ;;  %v4000_v41 = vpop.f32.mrb[37].mxu0 }
0x1097   :  { %v1958_v5 = vpop.f32.mrb[38].mxu0  ;;  %v2001_v6 = vpop.f32.mrb[52].mxu1  ;;  %v3492_v41 = vld [vmem:[%s5366_s0 + $0x3] ss:$0 sm:$0xff]  ;;  %s4371_s0 = smov [#allocation2]  }
0x1098   :  { %v2008_v7 = vmul.f32 0.17677669, %v2001_v6  ;;  %v4001_v38 = vpop.f32.mrb[39].mxu0  ;;  %v4006_v8 = vpop.f32.mrb[53].mxu1  ;;  %v2009_v12 = vsel %vm605_vm7, %v2007_v40, -inf }
0x1099   :  { %2010 = vmax.xlane.f32.xlu0 %v2009_v12  ;;  %v2004_v13 = vpop.f32.mrb[54].mxu1  ;;  %v3522_v12 = vld [vmem:[%s5364_s23 + $0x3] ss:$0 sm:$0xff] }
0x109a   :  { %v4007_v15 = vpop.f32.mrb[55].mxu1  ;;  %v2012_v43 = vsel %vm605_vm7, %v2008_v7, -inf }
0x109b   :  { %2013 = vmax.xlane.f32.xlu1 %v2012_v43 }
0x1126   :  { %v2011_v16 = vpop.xlane.xlu0 %2010 }
0x1127   :  { %v2015_v17 = vsub.f32 %v2007_v40, %v2011_v16 }
0x1128   :  { %v2014_v0 = vpop.xlane.xlu1 %2013 }
0x1129   :  { %v2017_v18 = vmul.f32 1.442695, %v2015_v17  ;;  %v2016_v19 = vsub.f32 %v2008_v7, %v2014_v0 }
0x112b   :  { %4306 = vpow2.f32 %v2017_v18  ;;  %v2019_v9 = vmul.f32 1.442695, %v2016_v19 }
0x112d   :  { %4308 = vpow2.f32 %v2019_v9 }
0x1135   :  { %v4307_v10 = vpop.eup %4306 }
0x1136   :  { %v2021_v20 = vsel %vm605_vm7, %v4307_v10, 0.0 }
0x1137   :  { %v4309_v21 = vpop.eup %4308  ;;  %2022 = vadd.xlane.f32.xlu0 %v2021_v20 }
0x1138   :  { %v2024_v22 = vsel %vm605_vm7, %v4309_v21, 0.0 }
0x1139   :  { %2025 = vadd.xlane.f32.xlu1 %v2024_v22 }
0x11c4   :  { %v2023_v23 = vpop.xlane.xlu0 %2022 }
0x11c5   :  { %4310 = vrcp.f32 %v2023_v23 }
0x11c6   :  { %v2026_v25 = vpop.xlane.xlu1 %2025 }
0x11c7   :  { %4312 = vrcp.f32 %v2026_v25 }
0x11cf   :  { %v4311_v28 = vpop.eup %4310 }
0x11d0   :  { %v2028_v30 = vmul.f32 %v4311_v28, %v4307_v10 }
0x11d1   :  { %v4313_v31 = vpop.eup %4312 }
0x11d2   :  { %v2030_v34 = vmul.f32 %v4313_v31, %v4309_v21  ;;  %v2031_v35 = vpack.c.bf16 %v2028_v30, %v2028_v30 }
0x11d4   :  { %4011 = vmatmul.mubr.msk.bf16.vlgmr.msra.gmra.mrb[40].mxu0 %vm605_vm7, %v2031_v35  ;;  %v2032_v37 = vpack.c.bf16 %v2030_v34, %v2030_v34 }
0x11d5   :  { %4021 = vmatpush3.bf16.msra.mxu0 %v4234_v32  ;;  %4028 = vmatprep.mubr.msk.bf16.mxu0 %vm4370_vm5, %v4369_v11 }
0x11d6   :  { %4017 = vmatmul.mubr.msk.bf16.vlgmr.msra.gmra.mrb[56].mxu1 %vm605_vm7, %v2032_v37  ;;  %4022 = vmatprep.subr.bf16.mxu0 %v4369_v11 }
0x11d7   :  { %4033 = vmatpush3.bf16.msra.mxu1 %v4235_v36  ;;  %4040 = vmatprep.mubr.msk.bf16.mxu1 %vm4370_vm5, %v4369_v11 }
0x11d8   :  { %4034 = vmatprep.subr.bf16.mxu1 %v4369_v11 }
0x11d9   :  { %4023 = vmatpush3.bf16.msra.mxu0 %v4236_v39 }
0x11da   :  { %4024 = vmatprep.subr.bf16.mxu0 %v4369_v11 }
0x11db   :  { %4035 = vmatpush3.bf16.msra.mxu1 %v4237_v42 }
0x11dc   :  { %4036 = vmatprep.subr.bf16.mxu1 %v4369_v11 }
0x11dd   :  { %4025 = vmatpush3.bf16.msra.mxu0 %v4238_v44 }
0x11de   :  { %4026 = vmatprep.subr.bf16.mxu0 %v4369_v11 }
0x11df   :  { %4037 = vmatpush3.bf16.msra.mxu1 %v4239_v33 }
0x11e0   :  { %4038 = vmatprep.subr.bf16.mxu1 %v4369_v11 }
0x11e1   :  { %4027 = vmatpush3.bf16.msra.mxu0 %v4240_v45 }
0x11e2   :  { %4044 = vmatprep.subr.bf16.mxu0 %v4369_v11 }
0x11e3   :  { %4039 = vmatpush3.bf16.msra.mxu1 %v4241_v46 }
0x11e4   :  { %4029 = vmatmul.mubr.msk.bf16.vlgmr.msra.gmra.mrb[44].mxu0 %vm216_vm4, %v4964_v29  ;;  %4056 = vmatprep.subr.bf16.mxu1 %v4369_v11 }
0x11e5   :  { %4045 = vmatpush3.bf16.msra.mxu0 %v4242_v48  ;;  %4052 = vmatprep.mubr.msk.bf16.mxu0 %vm4370_vm5, %v4369_v11 }
0x11e6   :  { %4041 = vmatmul.mubr.msk.bf16.vlgmr.msra.gmra.mrb[60].mxu1 %vm216_vm4, %v4964_v29  ;;  %4046 = vmatprep.subr.bf16.mxu0 %v4369_v11 }
0x11e7   :  { %4058 = vmatprep.mubr.msk.bf16.mxu1 %vm4370_vm5, %v4369_v11 }
0x11e9   :  { %4047 = vmatpush3.bf16.msra.mxu0 %v4243_v47 }
0x11ea   :  { %4048 = vmatprep.subr.bf16.mxu0 %v4369_v11 }
0x11ed   :  { %4049 = vmatpush3.bf16.msra.mxu0 %v4244_v49 }
0x11ee   :  { %4050 = vmatprep.subr.bf16.mxu0 %v4369_v11 }
0x11f1   :  { %4051 = vmatpush3.bf16.msra.mxu0 %v4245_v50 }
0x11f2   :  { %4068 = vmatprep.subr.bf16.mxu0 %v4369_v11 }
0x11f4   :  { %4053 = vmatmul.mubr.msk.bf16.vlgmr.msra.gmra.mrb[48].mxu0 %vm216_vm4, %v4964_v29  ;;  %v3507_v29 = vld [vmem:[%s5365_s6 + $0x3] ss:$0 sm:$0xff] }
0x11f5   :  { %4070 = vmatprep.mubr.msk.bf16.mxu0 %vm4370_vm5, %v4369_v11 }
0x12a7   :  { %v5084_v51 = vpop.f32.mrb[40].mxu0 }
0x12a8   :  { %v4012_v52 = vpop.f32.mrb[41].mxu0 }
0x12a9   :  { %v2076_v54 = vpop.f32.mrb[42].mxu0  ;;  %v5086_v55 = vpop.f32.mrb[56].mxu1 }
0x12aa   :  { %v2125_v14 = vpack.c.bf16 %v5086_v55, %v5084_v51  ;;  %v4013_v53 = vpop.f32.mrb[43].mxu0  ;;  %v4018_v56 = vpop.f32.mrb[57].mxu1 }
0x12ab   :  { %v2122_v57 = vpop.f32.mrb[58].mxu1 }
0x12ac   :  { %v4019_v58 = vpop.f32.mrb[59].mxu1 }
0x12b7   :  { %v2206_v59 = vpop.f32.mrb[44].mxu0 }
0x12b8   :  { %v4030_v60 = vpop.f32.mrb[45].mxu0  ;;  %v2207_v7 = vadd.f32 %v3492_v41, %v2206_v59 }
0x12b9   :  { %v2209_v61 = vpop.f32.mrb[46].mxu0  ;;  %v2288_v62 = vpop.f32.mrb[60].mxu1 }
0x12ba   :  { %v2289_v63 = vadd.f32 %v3507_v29, %v2288_v62  ;;  %v4031_v1 = vpop.f32.mrb[47].mxu0  ;;  %v4042_v2 = vpop.f32.mrb[61].mxu1  ;;  %v2377_v8 = vpack.c.bf16 %v2207_v7, %v2207_v7  ;;  %v2210_v43 = vadd.f32 %v3492_v41, %v2209_v61  ;;  %v4246_v61 = vld [vmem:[%s5316_s13 + $0x20] sm:$0xff]  }
0x12bb   :  { %v2291_v3 = vpop.f32.mrb[62].mxu1  ;;  %v4248_v1 = vld [vmem:[%s5316_s13 + $0x30] sm:$0xff]   ;;  %v4249_v2 = vld [vmem:[%s5316_s13 + $0x38] sm:$0xff]  }
0x12bc   :  { %v2379_v4 = vpack.c.bf16 %v2289_v63, %v2289_v63  ;;  %v4043_v40 = vpop.f32.mrb[63].mxu1  ;;  %v2292_v6 = vadd.f32 %v3507_v29, %v2291_v3  ;;  %v2378_v10 = vpack.c.bf16 %v2210_v43, %v2210_v43  ;;  %v4247_v63 = vld [vmem:[%s5316_s13 + $0x28] sm:$0xff]  }
0x12be   :  { %v2387_v5 = vsel %vm510_vm6, %v2379_v4, 0  ;;  %v2380_v38 = vpack.c.bf16 %v2292_v6, %v2292_v6 }
0x12bf   :  { %4057 = vmatpush3.bf16.xpose.msra.mxu1 %v2387_v5 }
0x12c0   :  { %4062 = vmatprep.subr.bf16.mxu1 %v4369_v11  ;;  %v2433_v13 = vsel %vm510_vm6, %v2380_v38, 0 }
0x12c6   :  { %4059 = vmatmul.mubr.msk.bf16.vlgmr.msra.gmra.mrb[64].mxu1 %vm510_vm6, %v2377_v8 }
0x12c7   :  { %v2370_v15 = vpop.f32.mrb[48].mxu0  ;;  %4063 = vmatpush3.bf16.xpose.msra.mxu1 %v2433_v13  ;;  %4064 = vmatprep.mubr.msk.bf16.mxu1 %vm4370_vm5, %v4369_v11 }
0x12c8   :  { %v2371_v16 = vadd.f32 %v3522_v12, %v2370_v15  ;;  %v4054_v17 = vpop.f32.mrb[49].mxu0  ;;  %4074 = vmatprep.subr.bf16.mxu1 %v4369_v11  ;;  %v3543_v15 = vld [vmem:[%s5317_s14 + $0x1] ss:$0 sm:$0xff] }
0x12c9   :  { %v2373_v0 = vpop.f32.mrb[50].mxu0 }
0x12ca   :  { %v2381_v18 = vpack.c.bf16 %v2371_v16, %v2371_v16  ;;  %v2374_v19 = vadd.f32 %v3522_v12, %v2373_v0  ;;  %v4055_v9 = vpop.f32.mrb[51].mxu0 }
0x12cc   :  { %v2505_v20 = vsel %vm126_vm0, %v2381_v18, 0  ;;  %v2382_v21 = vpack.c.bf16 %v2374_v19, %v2374_v19 }
0x12cd   :  { %4069 = vmatpush3.bf16.msra.mxu0 %v2505_v20 }
0x12ce   :  { %v2551_v22 = vsel %vm126_vm0, %v2382_v21, 0  ;;  %4065 = vmatmul.mubr.msk.bf16.vlgmr.msra.gmra.mrb[68].mxu1 %vm510_vm6, %v2378_v10  ;;  %4080 = vmatprep.subr.bf16.mxu0 %v4369_v11 }
0x12cf   :  { %4075 = vmatpush3.bf16.msra.mxu1 %v2551_v22  ;;  %4076 = vmatprep.mubr.msk.bf16.mxu1 %vm4370_vm5, %v4369_v11 }
0x12d0   :  { %4088 = vmatprep.subr.bf16.mxu1 %v4369_v11 }
0x1399   :  { %v2423_v23 = vpop.f32.mrb[64].mxu1 }
0x139a   :  { %v2475_v25 = vmul.f32 0.17677669, %v2423_v23  ;;  %v4060_v28 = vpop.f32.mrb[65].mxu1 }
0x139b   :  { %v2426_v30 = vpop.f32.mrb[66].mxu1 }
0x139c   :  { %v4061_v31 = vpop.f32.mrb[67].mxu1  ;;  %v2477_v32 = vsel %vm605_vm7, %v2475_v25, -inf }
0x139d   :  { %2478 = vmax.xlane.f32.xlu1 %v2477_v32 }
0x13a1   :  { %v2469_v34 = vpop.f32.mrb[68].mxu1 }
0x13a2   :  { %v2476_v35 = vmul.f32 0.17677669, %v2469_v34  ;;  %v4066_v36 = vpop.f32.mrb[69].mxu1 }
0x13a3   :  { %v2472_v37 = vpop.f32.mrb[70].mxu1 }
0x13a4   :  { %v4067_v39 = vpop.f32.mrb[71].mxu1  ;;  %v2480_v42 = vsel %vm605_vm7, %v2476_v35, -inf  ;;  %v4251_v37 = vld [vmem:[%s5320_s17 + $0x28] sm:$0xff]  }
0x13a5   :  { %2481 = vmax.xlane.f32.xlu0 %v2480_v42  ;;  %v4252_v39 = vld [vmem:[%s5320_s17 + $0x30] sm:$0xff]   ;;  %v4253_v42 = vld [vmem:[%s5320_s17 + $0x38] sm:$0xff]  }
0x142a   :  { %v2479_v44 = vpop.xlane.xlu1 %2478 }
0x142b   :  { %v2483_v33 = vsub.f32 %v2475_v25, %v2479_v44 }
0x142d   :  { %v2485_v45 = vmul.f32 1.442695, %v2483_v33 }
0x142f   :  { %4314 = vpow2.f32 %v2485_v45 }
0x1432   :  { %v2482_v46 = vpop.xlane.xlu0 %2481 }
0x1433   :  { %v2484_v48 = vsub.f32 %v2476_v35, %v2482_v46 }
0x1435   :  { %v2487_v47 = vmul.f32 1.442695, %v2484_v48 }
0x1437   :  { %4316 = vpow2.f32 %v2487_v47 }
0x1439   :  { %v4315_v49 = vpop.eup %4314 }
0x143a   :  { %v2489_v50 = vsel %vm605_vm7, %v4315_v49, 0.0 }
0x143b   :  { %2490 = vadd.xlane.f32.xlu1 %v2489_v50  ;;  %v3546_v50 = vld [vmem:[%s5318_s15 + $0x1] ss:$0 sm:$0xff] }
0x1441   :  { %v4317_v52 = vpop.eup %4316 }
0x1442   :  { %v2492_v54 = vsel %vm605_vm7, %v4317_v52, 0.0 }
0x1443   :  { %2493 = vadd.xlane.f32.xlu0 %v2492_v54 }
0x14c8   :  { %v2491_v53 = vpop.xlane.xlu1 %2490 }
0x14c9   :  { %4318 = vrcp.f32 %v2491_v53 }
0x14d0   :  { %v2494_v56 = vpop.xlane.xlu0 %2493 }
0x14d1   :  { %4320 = vrcp.f32 %v2494_v56 }
0x14d3   :  { %v4319_v57 = vpop.eup %4318 }
0x14d4   :  { %v2496_v58 = vmul.f32 %v4319_v57, %v4315_v49  ;;  %v3547_v57 = vld [vmem:[%s5319_s16 + $0x1] ss:$0 sm:$0xff] }
0x14d6   :  { %v2499_v59 = vpack.c.bf16 %v2496_v58, %v2496_v58 }
0x14d8   :  { %4071 = vmatmul.mubr.msk.bf16.vlgmr.msra.gmra.mrb[52].mxu0 %vm605_vm7, %v2499_v59 }
0x14d9   :  { %4084 = vmatprep.mubr.msk.bf16.mxu0 %vm4370_vm5, %v4369_v11  ;;  %4081 = vmatpush3.bf16.msra.mxu0 %v4248_v1  ;;  %v4257_v1 = vld [vmem:[%s5322_s19 + $0x58] sm:$0xff]  }
0x14da   :  { %4082 = vmatprep.subr.bf16.mxu0 %v4369_v11 }
0x14db   :  { %v4321_v29 = vpop.eup %4320 }
0x14dc   :  { %v2498_v60 = vmul.f32 %v4321_v29, %v4317_v52 }
0x14dd   :  { %4083 = vmatpush3.bf16.msra.mxu0 %v4249_v2  ;;  %v4258_v2 = vld [vmem:[%s5322_s19 + $0x60] sm:$0xff]  }
0x14de   :  { %v2500_v62 = vpack.c.bf16 %v2498_v60, %v2498_v60  ;;  %4096 = vmatprep.subr.bf16.mxu0 %v4369_v11 }
0x14e0   :  { %4077 = vmatmul.mubr.msk.bf16.vlgmr.msra.gmra.mrb[72].mxu1 %vm605_vm7, %v2500_v62  ;;  %v4255_v62 = vld [vmem:[%s5322_s19 + $0x48] sm:$0xff]  }
0x14e1   :  { %4089 = vmatpush3.bf16.msra.mxu1 %v4246_v61  ;;  %4092 = vmatprep.mubr.msk.bf16.mxu1 %vm4370_vm5, %v4369_v11  ;;  %v4254_v61 = vld [vmem:[%s5322_s19 + $0x40] sm:$0xff]  }
0x14e2   :  { %4090 = vmatprep.subr.bf16.mxu1 %v4369_v11 }
0x14e5   :  { %4091 = vmatpush3.bf16.msra.mxu1 %v4247_v63  ;;  %v4256_v63 = vld [vmem:[%s5322_s19 + $0x50] sm:$0xff]  }
0x14e6   :  { %4108 = vmatprep.subr.bf16.mxu1 %v4369_v11 }
0x14e8   :  { %4093 = vmatmul.mubr.msk.bf16.vlgmr.msra.gmra.mrb[76].mxu1 %vm510_vm6, %v2125_v14 }
0x14e9   :  { %4124 = vmatprep.mubr.msk.bf16.mxu1 %vm4370_vm5, %v4369_v11  ;;  %4109 = vmatpush3.bf16.msra.mxu1 %v4254_v61 }
0x14ea   :  { %4110 = vmatprep.subr.bf16.mxu1 %v4369_v11 }
0x14ed   :  { %4111 = vmatpush3.bf16.msra.mxu1 %v4255_v62 }
0x14ee   :  { %4112 = vmatprep.subr.bf16.mxu1 %v4369_v11 }
0x14f1   :  { %4113 = vmatpush3.bf16.msra.mxu1 %v4256_v63 }
0x14f2   :  { %4114 = vmatprep.subr.bf16.mxu1 %v4369_v11 }
0x14f5   :  { %4115 = vmatpush3.bf16.msra.mxu1 %v4257_v1 }
0x14f6   :  { %4116 = vmatprep.subr.bf16.mxu1 %v4369_v11 }
0x14f9   :  { %4117 = vmatpush3.bf16.msra.mxu1 %v4258_v2 }
0x14fa   :  { %4118 = vmatprep.subr.bf16.mxu1 %v4369_v11 }
0x15ab   :  { %v2541_v51 = vpop.f32.mrb[52].mxu0 }
0x15ac   :  { %v4072_v55 = vpop.f32.mrb[53].mxu0 }
0x15ad   :  { %v2544_v14 = vpop.f32.mrb[54].mxu0  ;;  %v4260_v55 = vld [vmem:[%s5322_s19 + $0x70] sm:$0xff]  }
0x15ae   :  { %v4073_v3 = vpop.f32.mrb[55].mxu0  ;;  %v4261_v14 = vld [vmem:[%s5322_s19 + $0x78] sm:$0xff]  }
0x15af   :  { %v3557_v3 = vld [vmem:[%s5321_s18 + $0x1] ss:$0 sm:$0xff] }
0x15b3   :  { %v2587_v4 = vpop.f32.mrb[72].mxu1 }
0x15b4   :  { %v2593_v40 = vpack.c.bf16 %v2587_v4, %v2541_v51  ;;  %v4078_v41 = vpop.f32.mrb[73].mxu1  ;;  %v4259_v51 = vld [vmem:[%s5322_s19 + $0x68] sm:$0xff]   ;;  %s5368_s19 = sld [smem:[#allocation6_spill]] }
0x15b5   :  { %v2590_v5 = vpop.f32.mrb[74].mxu1  ;;  %4119 = vmatpush3.bf16.msra.mxu1 %v4259_v51 }
0x15b6   :  { %v4079_v6 = vpop.f32.mrb[75].mxu1  ;;  %4085 = vmatmul.mubr.msk.bf16.vlgmr.msra.gmra.mrb[56].mxu0 %vm510_vm6, %v2593_v40  ;;  %4120 = vmatprep.subr.bf16.mxu1 %v4369_v11 }
0x15b7   :  { %4104 = vmatprep.mubr.msk.bf16.mxu0 %vm4370_vm5, %v4369_v11 }
0x15b9   :  { %4121 = vmatpush3.bf16.msra.mxu1 %v4260_v55  ;;  %v3580_v55 = vld [vmem:[%s5323_s20 + $0x1] ss:$0 sm:$0xff] }
0x15ba   :  { %4122 = vmatprep.subr.bf16.mxu1 %v4369_v11 }
0x15bb   :  { %v2704_v7 = vpop.f32.mrb[76].mxu1 }
0x15bc   :  { %v4094_v38 = vpop.f32.mrb[77].mxu1 }
0x15bd   :  { %v2707_v8 = vpop.f32.mrb[78].mxu1  ;;  %4123 = vmatpush3.bf16.msra.mxu1 %v4261_v14 }
0x15be   :  { %v4095_v12 = vpop.f32.mrb[79].mxu1 }
0x1689   :  { %v2648_v13 = vpop.f32.mrb[56].mxu0 }
0x168a   :  { %v2705_v43 = vadd.f32 %v2704_v7, %v2648_v13  ;;  %v4086_v16 = vpop.f32.mrb[57].mxu0 }
0x168b   :  { %v2651_v17 = vpop.f32.mrb[58].mxu0 }
0x168c   :  { %v2719_v0 = vadd.f32 %v3543_v15, %v2705_v43  ;;  %v2708_v18 = vadd.f32 %v2707_v8, %v2651_v17  ;;  %v4087_v19 = vpop.f32.mrb[59].mxu0 }
0x168e   :  { %v2720_v9 = vadd.f32 %v3543_v15, %v2708_v18  ;;  %v2721_v10 = vadd.f32 %v2719_v0, %v4955_v26 }
0x1690   :  { %v2727_v20 = vsel %vm216_vm4, %v2721_v10, 0.0  ;;  %v2722_v21 = vadd.f32 %v2720_v9, %v4957_v27  ;;  %v4250_v27 = vld [vmem:[%s5320_s17 + $0x20] sm:$0xff]   ;;  %s5367_s17 = sld [smem:[#allocation18_spill]] }
0x1691   :  { %2728 = vadd.xlane.f32.xlu1 %v2727_v20  ;;  %4097 = vmatpush3.bf16.msra.mxu0 %v4250_v27 }
0x1692   :  { %v2730_v22 = vsel %vm216_vm4, %v2722_v21, 0.0  ;;  %4098 = vmatprep.subr.bf16.mxu0 %v4369_v11 }
0x1693   :  { %2731 = vadd.xlane.f32.xlu0 %v2730_v22 }
0x1695   :  { %4099 = vmatpush3.bf16.msra.mxu0 %v4251_v37 }
0x1696   :  { %4100 = vmatprep.subr.bf16.mxu0 %v4369_v11 }
0x1699   :  { %4101 = vmatpush3.bf16.msra.mxu0 %v4252_v39 }
0x169a   :  { %4102 = vmatprep.subr.bf16.mxu0 %v4369_v11 }
0x169d   :  { %4103 = vmatpush3.bf16.msra.mxu0 %v4253_v42 }
0x169e   :  { %4128 = vmatprep.subr.bf16.mxu0 %v4369_v11 }
0x171e   :  { %v2729_v23 = vpop.xlane.xlu1 %2728 }
0x171f   :  { %v2733_v25 = vmul.f32 0.015625, %v2729_v23 }
0x1720   :  { %v2732_v28 = vpop.xlane.xlu0 %2731 }
0x1721   :  { %v2735_v30 = vsub.f32 %v2721_v10, %v2733_v25  ;;  %v2734_v31 = vmul.f32 0.015625, %v2732_v28 }
0x1723   :  { %v2736_v32 = vsub.f32 %v2722_v21, %v2734_v31  ;;  %v2737_v34 = vmul.f32 %v2735_v30, %v2735_v30 }
0x1725   :  { %v2739_v35 = vsel %vm216_vm4, %v2737_v34, 0.0  ;;  %v2738_v36 = vmul.f32 %v2736_v32, %v2736_v32 }
0x1726   :  { %2740 = vadd.xlane.f32.xlu1 %v2739_v35 }
0x1727   :  { %v2742_v26 = vsel %vm216_vm4, %v2738_v36, 0.0 }
0x1728   :  { %2743 = vadd.xlane.f32.xlu0 %v2742_v26 }
0x17b3   :  { %v2741_v44 = vpop.xlane.xlu1 %2740 }
0x17b4   :  { %v2745_v33 = vmul.f32 0.015625, %v2741_v44 }
0x17b5   :  { %v2744_v45 = vpop.xlane.xlu0 %2743 }
0x17b6   :  { %v2747_v46 = vadd.f32 1e-12, %v2745_v33  ;;  %v2746_v48 = vmul.f32 0.015625, %v2744_v45 }
0x17b8   :  { %4322 = vrsqrt.f32 %v2747_v46  ;;  %v2748_v47 = vadd.f32 1e-12, %v2746_v48 }
0x17ba   :  { %4324 = vrsqrt.f32 %v2748_v47 }
0x17c2   :  { %v4323_v49 = vpop.eup %4322 }
0x17c3   :  { %v2751_v52 = vmul.f32 %v4323_v49, %v2735_v30 }
0x17c4   :  { %v4325_v54 = vpop.eup %4324 }
0x17c5   :  { %v2759_v53 = vmul.f32 %v3546_v50, %v2751_v52  ;;  %v2752_v56 = vmul.f32 %v4325_v54, %v2736_v32 }
0x17c7   :  { %v2760_v58 = vmul.f32 %v3546_v50, %v2752_v56  ;;  %v5179_v59 = vadd.f32 %v3547_v57, %v2759_v53 }
0x17c9   :  { %v5181_v29 = vadd.f32 %v3547_v57, %v2760_v58 }
0x17cb   :  { %v2769_v60 = vpack.c.bf16 %v5181_v29, %v5179_v59 }
0x17cd   :  { %4105 = vmatmul.mubr.msk.bf16.vlgmr.msra.gmra.mrb[60].mxu0 %vm216_vm4, %v2769_v60 }
0x17ce   :  { %4136 = vmatprep.mubr.msk.bf16.mxu0 %vm4370_vm5, %v4369_v11 }
0x18a0   :  { %v2848_v4 = vpop.f32.mrb[60].mxu0 }
0x18a1   :  { %v2849_v40 = vadd.f32 %v3557_v3, %v2848_v4  ;;  %v4106_v41 = vpop.f32.mrb[61].mxu0 }
0x18a2   :  { %v2851_v5 = vpop.f32.mrb[62].mxu0 }
0x18a3   :  { %v2857_v6 = vmul.f32 0.70710677, %v2849_v40  ;;  %v2852_v7 = vadd.f32 %v3557_v3, %v2851_v5  ;;  %v4107_v38 = vpop.f32.mrb[63].mxu0  ;;  %v2855_v61 = vmul.f32 0.5, %v2849_v40 }
0x18a5   :  { %v2859_v8 = vand.u32 2147483647, %v2857_v6  ;;  %v2858_v12 = vmul.f32 0.70710677, %v2852_v7  ;;  %vm2899_vm10 = vcmp.ge.f32.partialorder %v2857_v6, 0.0  ;;  %v2856_v62 = vmul.f32 0.5, %v2852_v7 }
0x18a7   :  { %v2861_v13 = vmul.f32 0.3275911, %v2859_v8  ;;  %v2860_v15 = vand.u32 2147483647, %v2858_v12  ;;  %v2887_v0 = vsub.f32 0.0, %v2859_v8  ;;  %vm2900_vm11 = vcmp.ge.f32.partialorder %v2858_v12, 0.0 }
0x18a9   :  { %v2863_v43 = vadd.f32 1.0, %v2861_v13  ;;  %v2862_v16 = vmul.f32 0.3275911, %v2860_v15  ;;  %v2888_v18 = vsub.f32 0.0, %v2860_v15  ;;  %v2889_v9 = vmul.f32 %v2887_v0, %v2859_v8 }
0x18ab   :  { %4326 = vrcp.f32 %v2863_v43  ;;  %v2864_v17 = vadd.f32 1.0, %v2862_v16  ;;  %v2890_v22 = vmul.f32 %v2888_v18, %v2860_v15  ;;  %v2891_v23 = vmul.f32 1.442695, %v2889_v9  ;;  %v4263_v9 = vld [vmem:[%s5367_s17 + $0x8] sm:$0xff]  }
0x18ad   :  { %4328 = vrcp.f32 %v2864_v17  ;;  %v2893_v32 = vmul.f32 1.442695, %v2890_v22 }
0x18ae   :  { %4330 = vpow2.f32 %v2891_v23 }
0x18af   :  { %4332 = vpow2.f32 %v2893_v32  ;;  %v3591_v32 = vld [vmem:[%s5324_s21 + $0x1] ss:$0 sm:$0xff] }
0x18b5   :  { %v4327_v19 = vpop.eup %4326 }
0x18b6   :  { %v2869_v10 = vmul.f32 1.0614054, %v4327_v19 }
0x18b7   :  { %v4329_v20 = vpop.eup %4328 }
0x18b8   :  { %v2871_v21 = vadd.f32 -1.4531521, %v2869_v10  ;;  %v2870_v25 = vmul.f32 1.0614054, %v4329_v20  ;;  %v4331_v45 = vpop.eup %4330  ;;  %v4264_v10 = vld [vmem:[%s5367_s17 + $0x10] sm:$0xff]  }
0x18b9   :  { %v4333_v49 = vpop.eup %4332 }
0x18ba   :  { %v2873_v28 = vmul.f32 %v4327_v19, %v2871_v21  ;;  %v2872_v30 = vadd.f32 -1.4531521, %v2870_v25 }
0x18bc   :  { %v2875_v31 = vadd.f32 1.4214138, %v2873_v28  ;;  %v2874_v34 = vmul.f32 %v4329_v20, %v2872_v30 }
0x18be   :  { %v2877_v35 = vmul.f32 %v4327_v19, %v2875_v31  ;;  %v2876_v36 = vadd.f32 1.4214138, %v2874_v34 }
0x18c0   :  { %v2879_v26 = vadd.f32 -0.28449672, %v2877_v35  ;;  %v2878_v27 = vmul.f32 %v4329_v20, %v2876_v36  ;;  %v3592_v36 = vld [vmem:[%s5325_s22 + $0x1] ss:$0 sm:$0xff] }
0x18c2   :  { %v2881_v37 = vmul.f32 %v4327_v19, %v2879_v26  ;;  %v2880_v39 = vadd.f32 -0.28449672, %v2878_v27 }
0x18c4   :  { %v2883_v42 = vadd.f32 0.2548296, %v2881_v37  ;;  %v2882_v44 = vmul.f32 %v4329_v20, %v2880_v39 }
0x18c6   :  { %v2885_v33 = vmul.f32 %v4327_v19, %v2883_v42  ;;  %v2884_v46 = vadd.f32 0.2548296, %v2882_v44 }
0x18c8   :  { %v2895_v48 = vmul.f32 %v4331_v45, %v2885_v33  ;;  %v2886_v47 = vmul.f32 %v4329_v20, %v2884_v46  ;;  %v4265_v20 = vld [vmem:[%s5367_s17 + $0x18] sm:$0xff]  }
0x18ca   :  { %v2897_v50 = vsub.f32 1.0, %v2895_v48  ;;  %v2896_v52 = vmul.f32 %v4333_v49, %v2886_v47 }
0x18cc   :  { %v2901_v54 = vsub.f32 0.0, %v2897_v50  ;;  %v2898_v53 = vsub.f32 1.0, %v2896_v52  ;;  %v4267_v52 = vld [vmem:[%s5328_s25 + $0x8] sm:$0xff]  }
0x18ce   :  { %v2903_v56 = vsel %vm2899_vm10, %v2897_v50, %v2901_v54  ;;  %v2902_v57 = vsub.f32 0.0, %v2898_v53  ;;  %v4266_v50 = vld [vmem:[%s5328_s25] sm:$0xff]   ;;  %v4268_v54 = vld [vmem:[%s5328_s25 + $0x10] sm:$0xff]  }
0x18cf   :  { %v2905_v58 = vadd.f32 1.0, %v2903_v56  ;;  %v3593_v56 = vld [vmem:[%s5327_s24] ss:$0 sm:$0xff] }
0x18d0   :  { %v2904_v60 = vsel %vm2900_vm11, %v2898_v53, %v2902_v57  ;;  %v4269_v53 = vld [vmem:[%s5328_s25 + $0x18] sm:$0xff]  }
0x18d1   :  { %v2906_v63 = vadd.f32 1.0, %v2904_v60  ;;  %v2907_v1 = vmul.f32 %v2905_v58, %v2855_v61 }
0x18d3   :  { %v2908_v2 = vmul.f32 %v2906_v63, %v2856_v62 }
0x18d5   :  { %v2909_v51 = vpack.c.bf16 %v2908_v2, %v2907_v1  ;;  %v3599_v2 = vld [vmem:[%s5329_s26] ss:$0 sm:$0xff] }
0x18d7   :  { %4125 = vmatmul.mubr.bf16.vlgmr.msra.gmra.mrb[80].mxu1 %v2909_v51 }
0x19aa   :  { %v3017_v14 = vpop.f32.mrb[80].mxu1 }
0x19ab   :  { %v3018_v3 = vadd.f32 %v3580_v55, %v3017_v14  ;;  %v4126_v4 = vpop.f32.mrb[81].mxu1 }
0x19ac   :  { %v3020_v41 = vpop.f32.mrb[82].mxu1 }
0x19ad   :  { %v3021_v5 = vadd.f32 %v3580_v55, %v3020_v41  ;;  %v4127_v6 = vpop.f32.mrb[83].mxu1  ;;  %v3024_v38 = vadd.f32 %v3018_v3, %v5179_v59 }
0x19af   :  { %v3030_v40 = vsel %vm216_vm4, %v3024_v38, 0.0  ;;  %v3025_v7 = vadd.f32 %v3021_v5, %v5181_v29  ;;  %v4262_v29 = vld [vmem:[%s5367_s17] sm:$0xff]   ;;  %s3310_s17 = sshll.u32 %s4371_s0, 4  ;;  %s3311_s17 = int_to_ptr.vmem [resolvable:$true] %s3310_s17 }
0x19b0   :  { %3031 = vadd.xlane.f32.xlu0 %v3030_v40  ;;  %4129 = vmatpush3.bf16.msra.mxu0 %v4262_v29  ;;  %v3248_v5 = vld [vmem:[%s5368_s19] sm:$0x3]  ;;  %s4344_s5 = scalar_lea.vmem %s3311_s17, 16  ;;  %s4348_s15 = scalar_lea.vmem %s3311_s17, 32 }
0x19b1   :  { %v3033_v8 = vsel %vm216_vm4, %v3025_v7, 0.0  ;;  %4130 = vmatprep.subr.bf16.mxu0 %v4369_v11  ;;  %p4345_p0 = scmp.ne.s32.totalorder %s3311_s17, %s4344_s5  ;;  %p4349_p1 = scmp.lt.s32.totalorder %s3311_s17, %s3311_s17 }
0x19b2   :  { %3034 = vadd.xlane.f32.xlu1 %v3033_v8  ;;  %p4350_p2 = scmp.lt.s32.totalorder %s4348_s15, %s4344_s5 }
0x19b4   :  { %4131 = vmatpush3.bf16.msra.mxu0 %v4263_v9  ;;  %p4351_p3 = por %p4350_p2, %p4349_p1 }
0x19b5   :  { %4132 = vmatprep.subr.bf16.mxu0 %v4369_v11 }
0x19b6   :  { %p4352_p4 = pnand %p4351_p3, %p4345_p0 }
0x19b8   :  { %4133 = vmatpush3.bf16.msra.mxu0 %v4264_v10 }
0x19b9   :  { %4134 = vmatprep.subr.bf16.mxu0 %v4369_v11 }
0x19bc   :  { %4135 = vmatpush3.bf16.msra.mxu0 %v4265_v20 }
0x19bd   :  { %4140 = vmatprep.subr.bf16.mxu0 %v4369_v11 }
0x1a3d   :  { %v3032_v12 = vpop.xlane.xlu0 %3031 }
0x1a3e   :  { %v3036_v13 = vmul.f32 0.015625, %v3032_v12 }
0x1a3f   :  { %v3035_v15 = vpop.xlane.xlu1 %3034 }
0x1a40   :  { %v3038_v43 = vsub.f32 %v3024_v38, %v3036_v13  ;;  %v3037_v16 = vmul.f32 0.015625, %v3035_v15 }
0x1a42   :  { %v3039_v17 = vsub.f32 %v3025_v7, %v3037_v16  ;;  %v3040_v0 = vmul.f32 %v3038_v43, %v3038_v43 }
0x1a44   :  { %v3042_v18 = vsel %vm216_vm4, %v3040_v0, 0.0  ;;  %v3041_v19 = vmul.f32 %v3039_v17, %v3039_v17 }
0x1a45   :  { %3043 = vadd.xlane.f32.xlu0 %v3042_v18 }
0x1a46   :  { %v3045_v59 = vsel %vm216_vm4, %v3041_v19, 0.0 }
0x1a47   :  { %3046 = vadd.xlane.f32.xlu1 %v3045_v59 }
0x1ad2   :  { %v3044_v21 = vpop.xlane.xlu0 %3043 }
0x1ad3   :  { %v3048_v22 = vmul.f32 0.015625, %v3044_v21 }
0x1ad4   :  { %v3047_v23 = vpop.xlane.xlu1 %3046 }
0x1ad5   :  { %v3050_v25 = vadd.f32 1e-12, %v3048_v22  ;;  %v3049_v28 = vmul.f32 0.015625, %v3047_v23 }
0x1ad7   :  { %4334 = vrsqrt.f32 %v3050_v25  ;;  %v3051_v30 = vadd.f32 1e-12, %v3049_v28 }
0x1ad9   :  { %4336 = vrsqrt.f32 %v3051_v30 }
0x1ae1   :  { %v4335_v31 = vpop.eup %4334 }
0x1ae2   :  { %v3054_v34 = vmul.f32 %v4335_v31, %v3038_v43 }
0x1ae3   :  { %v4337_v35 = vpop.eup %4336 }
0x1ae4   :  { %v3062_v26 = vmul.f32 %v3591_v32, %v3054_v34  ;;  %v3055_v27 = vmul.f32 %v4337_v35, %v3039_v17 }
0x1ae6   :  { %v3070_v37 = vadd.f32 %v3592_v36, %v3062_v26  ;;  %v3063_v39 = vmul.f32 %v3591_v32, %v3055_v27 }
0x1ae8   :  { %v3071_v42 = vadd.f32 %v3592_v36, %v3063_v39  ;;  %v3072_v44 = vpack.c.bf16 %v3070_v37, %v3070_v37 }
0x1aea   :  { %v3073_v33 = vpack.c.bf16 %v3071_v42, %v3071_v42  ;;  %v3091_v46 = vunpack.c.l.b16 %v3072_v44 }
0x1aec   :  { %v3092_v45 = vunpack.c.l.b16 %v3073_v33 }
0x1aee   :  { %v3093_v48 = vrot.slane %v3092_v45, 7 }
0x1af0   :  { %v3095_v47 = vsel %vm3094_vm12, %v3093_v48, %v3091_v46 }
0x1af1   :  { %v3096_v49 = vpack.c.b16 %v3095_v47, %v3095_v47 }
0x1af3   :  { %4137 = vmatmul.mubr.msk.bf16.vlgmr.msra.gmra.mrb[64].mxu0 %vm216_vm4, %v3096_v49 }
0x1af4   :  { %4148 = vmatprep.mubr.msk.bf16.mxu0 %vm4370_vm5, %v4369_v11  ;;  %4141 = vmatpush3.bf16.msra.mxu0 %v4266_v50 }
0x1af5   :  { %4142 = vmatprep.subr.bf16.mxu0 %v4369_v11 }
0x1af8   :  { %4143 = vmatpush3.bf16.msra.mxu0 %v4267_v52 }
0x1af9   :  { %4144 = vmatprep.subr.bf16.mxu0 %v4369_v11 }
0x1afc   :  { %4145 = vmatpush3.bf16.msra.mxu0 %v4268_v54 }
0x1afd   :  { %4146 = vmatprep.subr.bf16.mxu0 %v4369_v11 }
0x1b00   :  { %4147 = vmatpush3.bf16.msra.mxu0 %v4269_v53 }
0x1bc6   :  { %v3158_v57 = vpop.f32.mrb[64].mxu0 }
0x1bc7   :  { %v3159_v58 = vadd.f32 %v3593_v56, %v3158_v57  ;;  %v4138_v60 = vpop.f32.mrb[65].mxu0 }
0x1bc8   :  { %v3161_v61 = vpop.f32.mrb[66].mxu0 }
0x1bc9   :  { %4338 = vtanh.f32 %v3159_v58  ;;  %v4139_v62 = vpop.f32.mrb[67].mxu0 }
0x1bd3   :  { %v4339_v63 = vpop.eup %4338 }
0x1bd4   :  { %v3165_v1 = vpack.c.bf16 %v4339_v63, %v4339_v63 }
0x1bd6   :  { %4149 = vmatmul.mubr.msk.bf16.vlgmr.msra.gmra.mrb[68].mxu0 %vm216_vm4, %v3165_v1 }
0x1ca9   :  { %v3242_v51 = vpop.f32.mrb[68].mxu0 }
0x1caa   :  { %v3243_v55 = vadd.f32 %v3599_v2, %v3242_v51  ;;  %v4150_v14 = vpop.f32.mrb[69].mxu0 }
0x1cab   :  { %v3245_v3 = vpop.f32.mrb[70].mxu0 }
0x1cac   :  { %v4151_v4 = vpop.f32.mrb[71].mxu0  ;;  %v3256_v41 = vsel %vm3255_vm13, %v3243_v55, -inf }
0x1cad   :  { %3257 = vmax.xlane.f32.xlu1 %v3256_v41 }
0x1cbe   :  { %3250 = vperm.xlu1 %4181, %v3248_v5  }
0x1d3a   :  { %v3258_v6 = vpop.xlane.xlu1 %3257 }
0x1d3b   :  { %v3259_v38 = vsub.f32 %v3243_v55, %v3258_v6  ;;  %vm3285_vm14 = vcmp.ge.f32.partialorder %v3243_v55, %v3258_v6 }
0x1d3c   :  { %v3286_v7 = vsel %vm3285_vm14, %v4566_v24, 4 }
0x1d3d   :  { %v3260_v40 = vmul.f32 1.442695, %v3259_v38  ;;  %v3287_v8 = vsel %vm3255_vm13, %v3286_v7, 2147483647 }
0x1d3e   :  { %v3289_v13 = vshra.s32 %v3287_v8, 16  ;;  %v3251_v17 = vpop.permute.xlu1 %3250  ;;  %v3288_v20 = vand.u32 65535, %v3287_v8 }
0x1d3f   :  { %4340 = vpow2.f32 %v3260_v40  ;;  %vm3252_vm15 = vcmp.eq.s32.totalorder %v4566_v24, %v3251_v17 }
0x1d40   :  { %v3291_v43 = vcvt.s32.f32 %v3289_v13  ;;  %v3605_v59 = vsel %vm3252_vm15, 1.0, %v4369_v11  ;;  %v3290_v22 = vcvt.s32.f32 %v3288_v20 }
0x1d49   :  { %v4341_v12 = vpop.eup %4340 }
0x1d4a   :  { %v3262_v15 = vsel %vm3255_vm13, %v4341_v12, 0.0 }
0x1d4b   :  { %3263 = vadd.xlane.f32.xlu0 %v3262_v15 }
0x1d4f   :  { %3292 = vmin.xlane.f32.xlu0 %v3291_v43 }
0x1dd8   :  { %v3264_v16 = vpop.xlane.xlu0 %3263 }
0x1dd9   :  { %4342 = vlog2.f32 %v3264_v16 }
0x1ddc   :  { %v3293_v9 = vpop.xlane.xlu0 %3292 }
0x1ddd   :  { %vm3294_vm0 = vcmp.eq.f32.partialorder %v3291_v43, %v3293_v9  ;;  %v3299_v28 = vcvt.f32.s32 %v3293_v9 }
0x1dde   :  { %v3295_v23 = vsel %vm3294_vm0, %v3290_v22, inf }
0x1ddf   :  { %v3300_v34 = vshll.u32 %v3299_v28, 16 }
0x1de3   :  { %v4343_v0 = vpop.eup %4342 }
0x1de4   :  { %v3266_v18 = vmul.f32 0.6931472, %v4343_v0 }
0x1de6   :  { %v3267_v19 = vadd.f32 %v3266_v18, %v3258_v6 }
0x1de8   :  { %v3268_v29 = vsub.f32 %v3243_v55, %v3267_v19 }
0x1dea   :  { %v3269_v10 = vmul.f32 %v3605_v59, %v3268_v29 }
0x1dec   :  { %v3270_v21 = vsel %vm3255_vm13, %v3269_v10, 0.0 }
0x1ded   :  { %3271 = vadd.xlane.f32.xlu0 %v3270_v21 }
0x1df1   :  { %3296 = vmin.xlane.f32.xlu0 %v3295_v23 }
0x1e7a   :  { %v3272_v25 = vpop.xlane.xlu0 %3271 }
0x1e7b   :  { %v3273_v30 = vsub.f32 0.0, %v3272_v25 }
0x1e7d   :  { %v3275_v31 = vsel %vm3274_vm1, %v3273_v30, 0.0 }
0x1e7e   :  { %v3276_v24 = vrot.slane %v3275_v31, 4  ;;  %v3297_v32 = vpop.xlane.xlu0 %3296 }
0x1e7f   :  { %v3298_v11 = vcvt.f32.s32 %v3297_v32 }
0x1e80   :  { %v3277_v35 = vadd.f32 %v3276_v24, %v3275_v31 }
0x1e81   :  { %v3301_v36 = vadd.s32 %v3300_v34, %v3298_v11 }
0x1e82   :  { %v3278_v26 = vrot.slane %v3277_v35, 2 }
0x1e83   :  { %3303 = vst.msk [vmem:[%s5331_s28] sm:$0x3] %vm3302_vm2, %v3301_v36 }
0x1e84   :  { %v3279_v27 = vadd.f32 %v3278_v26, %v3277_v35 }
0x1e86   :  { %v3280_v37 = vrot.slane %v3279_v27, 1 }
0x1e88   :  { %v3281_v39 = vadd.f32 %v3280_v37, %v3279_v27 }
0x1e8a   :  { %v3282_v42 = vmul.f32 0.5, %v3281_v39 }
0x1e8c   :  { %3284 = vst.msk [vmem:[#allocation2] sm:$0x1] %vm3283_vm3, %v3282_v42 }
0x1e8d   :  { %4355 = shalt.err (!%p4352_p4)
}
0x1e8e   :  { %s4356_s28 = scalar_lea.hbm %s5330_s27, 16 }
0x1e8f   :  { %p4357_p5 = scmp.ne.s32.totalorder %s5330_s27, %s4356_s28  ;;  %p4360_p6 = scmp.lt.u32.totalorder %s4356_s28, %s5330_s27 }
0x1e91   :  { %p4362_p7 = pnand %p4360_p6, %p4357_p5 }
0x1e93   :  { %4365 = shalt.err (!%p4362_p7)
}
0x1e94   :  { %3313 = dma.vmem_to_hbm [thread:$0]  %s3311_s17, 16, %s5330_s27, [#allocation3]  }
0x1e95   :  { %4366 = dma.done.wait [#allocation3], 16  }
0x1e96   :  { %4367 = vsyncadd [#allocation3], 4294967280 }
0x1e97   :  { %3321 = vsyncpa [#allocation3], 1 }

</bundles_post_ra>
